<compile_context>
chip_gen: v6e
topology: v6e:2x2x1
jax: 0.10.0
libtpu: 0.0.40
codegen_flags: <defaults>
</compile_context>

<pallas_src>
import functools
import numpy as np
import jax
import jax.numpy as jnp
from jax import lax
from jax.experimental import pallas as pl
from jax.experimental.pallas import tpu as pltpu

LANE = 128
F32 = jnp.float32
BF16 = jnp.bfloat16
I8 = jnp.int8

# Default tile sizes (shared by the pre-pad step and the kernel wrappers so the
# out-of-jit padding exactly matches what the kernels expect).
PROP_TILE = 512          # propagation graph tile (n x n stream)
GAT_TILE = 512           # GAT adjacency tile
MM_TM = 512              # matmul row tile
MM_TK = 512              # matmul contraction tile
CL_TILE = 512            # contrastive-loss tile

# Conservative scoped-VMEM budget: fits v7x's 64 MiB physical VMEM with ample
# headroom; tiles above use only a few MiB.  (Raise on v5e/v6e if desired.)
_VMEM_LIMIT = 32 * 1024 * 1024


def _round_up(x, m):
    return ((x + m - 1) // m) * m


def _pad2(x, rows, cols):
    pr = rows - x.shape[0]
    pc = cols - x.shape[1]
    if pr == 0 and pc == 0:
        return x
    return jnp.pad(x, ((0, pr), (0, pc)))


def _prep_operand(x, rows, cols, dtype):
    """Cast + zero-pad to (rows, cols, dtype); no-op if already prepared."""
    if x.shape == (rows, cols) and x.dtype == dtype:
        return x
    if x.dtype != dtype:
        x = x.astype(dtype)
    return _pad2(x, rows, cols)


def _square_dims(n, t):
    t = min(t, _round_up(n, LANE))
    n_p = _round_up(n, t)
    return t, n_p


def matmul_dims(m, k, n, tm=MM_TM, tk=MM_TK):
    tm = min(tm, _round_up(m, LANE))
    tk = min(tk, _round_up(k, LANE))
    mp = _round_up(m, tm)
    kp = _round_up(k, tk)
    np_ = _round_up(n, LANE)
    return tm, tk, mp, kp, np_


def _cparams(*sem):
    return pltpu.CompilerParams(dimension_semantics=tuple(sem),
                                vmem_limit_bytes=_VMEM_LIMIT)


# --------------------------------------------------------------------------
# Tiled matmuls: plain (out = A @ B) and blended (out = alpha*(A@B) + beta*C)
# --------------------------------------------------------------------------
def _mm_kernel(a_ref, b_ref, o_ref, acc_scr):
    k = pl.program_id(1)

    @pl.when(k == 0)
    def _():
        acc_scr[...] = jnp.zeros_like(acc_scr)

    acc_scr[...] += jnp.dot(a_ref[...], b_ref[...],
                            preferred_element_type=jnp.float32)

    @pl.when(k == pl.num_programs(1) - 1)
    def _():
        o_ref[...] = acc_scr[...]


def _mm_blend_kernel(a_ref, b_ref, c_ref, o_ref, acc_scr, *, alpha, beta):
    k = pl.program_id(1)

    @pl.when(k == 0)
    def _():
        acc_scr[...] = jnp.zeros_like(acc_scr)

    acc_scr[...] += jnp.dot(a_ref[...], b_ref[...],
                            preferred_element_type=jnp.float32)

    @pl.when(k == pl.num_programs(1) - 1)
    def _():
        o_ref[...] = acc_scr[...] * alpha + c_ref[...] * beta


def pallas_matmul(a, b, tm=MM_TM, tk=MM_TK):
    m, kdim = a.shape
    _, n = b.shape
    tm, tk, mp, kp, np_ = matmul_dims(m, kdim, n, tm, tk)
    a_p = _prep_operand(a, mp, kp, BF16)
    b_p = _prep_operand(b, kp, np_, BF16)
    out = pl.pallas_call(
        _mm_kernel,
        out_shape=jax.ShapeDtypeStruct((mp, np_), F32),
        grid_spec=pltpu.PrefetchScalarGridSpec(
            num_scalar_prefetch=0,
            grid=(mp // tm, kp // tk),
            in_specs=[
                pl.BlockSpec((tm, tk), lambda i, k: (i, k)),
                pl.BlockSpec((tk, np_), lambda i, k: (k, 0)),
            ],
            out_specs=pl.BlockSpec((tm, np_), lambda i, k: (i, 0)),
            scratch_shapes=[pltpu.VMEM((tm, np_), F32)],
        ),
        compiler_params=_cparams("parallel", "arbitrary"),
    )(a_p, b_p)
    return out[:m, :n]


def pallas_matmul_blend(a, b, c, alpha, beta, tm=MM_TM, tk=MM_TK):
    # a may be pre-padded; true dims come from b (contraction) and c (rows).
    kdim, n = b.shape
    m = c.shape[0]
    tm, tk, mp, kp, np_ = matmul_dims(m, kdim, n, tm, tk)
    a_p = _prep_operand(a, mp, kp, BF16)
    b_p = _prep_operand(b, kp, np_, BF16)
    c_p = _prep_operand(c, mp, np_, F32)
    kern = functools.partial(_mm_blend_kernel, alpha=float(alpha), beta=float(beta))
    out = pl.pallas_call(
        kern,
        out_shape=jax.ShapeDtypeStruct((mp, np_), F32),
        grid_spec=pltpu.PrefetchScalarGridSpec(
            num_scalar_prefetch=0,
            grid=(mp // tm, kp // tk),
            in_specs=[
                pl.BlockSpec((tm, tk), lambda i, k: (i, k)),
                pl.BlockSpec((tk, np_), lambda i, k: (k, 0)),
                pl.BlockSpec((tm, np_), lambda i, k: (i, 0)),
            ],
            out_specs=pl.BlockSpec((tm, np_), lambda i, k: (i, 0)),
            scratch_shapes=[pltpu.VMEM((tm, np_), F32)],
        ),
        compiler_params=_cparams("parallel", "arbitrary"),
    )(a_p, b_p, c_p)
    return out[:m, :n]


# --------------------------------------------------------------------------
# One propagation layer: cur = (G @ F) * scale ; acc += L2norm(cur)
# --------------------------------------------------------------------------
def _prop_layer_kernel(g_ref, f_ref, acc_in_ref, f_out_ref, acc_out_ref,
                       mm_scr, *, scale):
    k = pl.program_id(1)

    @pl.when(k == 0)
    def _():
        mm_scr[...] = jnp.zeros_like(mm_scr)

    mm_scr[...] += jnp.dot(g_ref[...], f_ref[...],
                           preferred_element_type=jnp.float32)

    @pl.when(k == pl.num_programs(1) - 1)
    def _():
        cur = mm_scr[...] * scale
        f_out_ref[...] = cur.astype(f_out_ref.dtype)
        ss = jnp.sum(cur * cur, axis=1, keepdims=True)
        inv = lax.rsqrt(jnp.maximum(ss, 1e-24))      # == 1 / max(||x||, 1e-12)
        acc_out_ref[...] = acc_in_ref[...] + cur * inv


def pallas_one_propagate(graph, feats, num_layers, t=PROP_TILE):
    n, d = feats.shape                     # d is the padded lane dim (128)
    t, n_p = _square_dims(n, t)
    g = _prep_operand(graph, n_p, n_p, BF16)     # pass-through if pre-padded
    acc = _pad2(feats if feats.dtype == F32 else feats.astype(F32), n_p, d)
    cur = acc.astype(BF16)
    for layer in range(num_layers):
        kern = functools.partial(_prop_layer_kernel, scale=1.0 / (layer + 2))
        cur, acc = pl.pallas_call(
            kern,
            out_shape=(jax.ShapeDtypeStruct((n_p, d), BF16),
                       jax.ShapeDtypeStruct((n_p, d), F32)),
            grid_spec=pltpu.PrefetchScalarGridSpec(
                num_scalar_prefetch=0,
                grid=(n_p // t, n_p // t),
                in_specs=[
                    pl.BlockSpec((t, t), lambda i, k: (i, k)),   # graph tile
                    pl.BlockSpec((t, d), lambda i, k: (k, 0)),   # features (K)
                    pl.BlockSpec((t, d), lambda i, k: (i, 0)),   # running acc
                ],
                out_specs=[
                    pl.BlockSpec((t, d), lambda i, k: (i, 0)),
                    pl.BlockSpec((t, d), lambda i, k: (i, 0)),
                ],
                scratch_shapes=[pltpu.VMEM((t, d), F32)],
            ),
            input_output_aliases={2: 1},      # acc_in -> acc_out (reuse buffer)
            compiler_params=_cparams("parallel", "arbitrary"),
        )(g, cur, acc)
    return acc[:n]


# --------------------------------------------------------------------------
# GAT attention (flash-style online softmax over source tiles), fused epilogue
# out = 0.5*(x + conv)*nw + x*sw      (Amatrix mean of [x, conv], then nw/sw)
# --------------------------------------------------------------------------
def _gat_attn_kernel(hh_src_ref, adj_ref, sdst_ref, ssrc_ref, x_ref, o_ref,
                     m_scr, l_scr, acc_scr, *, heads, dp, slope, nw, sw):
    # TODO(synk): AsymMatrix internals are not given; implemented as a standard
    # multi-head GAT (concat=False -> mean over heads); attention dropout omitted.
    j = pl.program_id(1)

    @pl.when(j == 0)
    def _():
        m_scr[...] = jnp.full(m_scr.shape, -1e30, dtype=m_scr.dtype)
        l_scr[...] = jnp.zeros_like(l_scr)
        acc_scr[...] = jnp.zeros_like(acc_scr)

    mask = adj_ref[...].astype(jnp.int32) > 0              # (tm, tk) edge mask

    for h in range(heads):
        s_d = sdst_ref[:, h:h + 1]                          # (tm, 1) f32
        s_s = ssrc_ref[h:h + 1, :]                          # (1, tk) f32
        e = s_d + s_s                                       # rank-1 scores
        e = jnp.where(e > 0, e, slope * e)                  # leaky relu
        e = jnp.where(mask, e, -1e30)                       # mask non-edges
        m_old = m_scr[h]
        m_new = jnp.maximum(m_old, jnp.max(e, axis=1, keepdims=True))
        scl = jnp.exp(m_old - m_new)
        p = jnp.where(mask, jnp.exp(e - m_new), 0.0)        # masked probs
        l_scr[h] = scl * l_scr[h] + jnp.sum(p, axis=1, keepdims=True)
        acc_scr[h] = scl * acc_scr[h] + jnp.dot(
            p.astype(BF16), hh_src_ref[:, h * dp:(h + 1) * dp],
            preferred_element_type=jnp.float32)
        m_scr[h] = m_new

    @pl.when(j == pl.num_programs(1) - 1)
    def _():
        x = x_ref[...]
        conv = jnp.zeros_like(x)
        for h in range(heads):
            inv = pl.reciprocal(l_scr[h] + 1e-16, approx=True)
            conv = conv + acc_scr[h] * inv
        conv = conv * (1.0 / heads)
        # fused Amatrix mean (0.5*(x+conv)) + nw/sw blend
        o_ref[...] = conv * (0.5 * nw) + x * (0.5 * nw + sw)


def pallas_gat_items(items_pad, gat_params, adj, heads, d, dp, nw, sw, t=GAT_TILE):
    n_items = items_pad.shape[0]

    # head-blocked zero padding of W: (D, H*D) -> (DP, H*DP)
    w = gat_params['W'].astype(F32)
    w_p = jnp.zeros((dp, heads * dp), F32)
    for h in range(heads):
        w_p = w_p.at[:d, h * dp:h * dp + d].set(w[:, h * d:(h + 1) * d])
    a_src = jnp.pad(gat_params['a_src'].astype(F32), ((0, 0), (0, dp - d)))
    a_dst = jnp.pad(gat_params['a_dst'].astype(F32), ((0, 0), (0, dp - d)))

    # one lane-dense MXU matmul for all heads: hh = x @ W   (N, H*DP)
    hh = pallas_matmul(items_pad, w_p)

    # rank-1 attention-score terms, hoisted out of the attention tile loop
    hh3 = hh.reshape(n_items, heads, dp)
    s_dst = jnp.einsum('nhd,hd->nh', hh3, a_dst)            # (N, H)
    s_srcT = jnp.einsum('nhd,hd->hn', hh3, a_src)           # (H, N)

    t, n_p = _square_dims(n_items, t)
    hh_p = _prep_operand(hh, n_p, heads * dp, BF16)
    if adj.dtype != I8:
        adj = (adj > 0).astype(I8)
    adj_p = _prep_operand(adj, n_p, n_p, I8)                # pass-through if prepped
    x_p = _prep_operand(items_pad, n_p, dp, F32)
    sdst_p = _prep_operand(s_dst, n_p, heads, F32)
    ssrc_p = _prep_operand(s_srcT, heads, n_p, F32)

    kern = functools.partial(_gat_attn_kernel, heads=heads, dp=dp,
                             slope=0.2, nw=float(nw), sw=float(sw))
    out = pl.pallas_call(
        kern,
        out_shape=jax.ShapeDtypeStruct((n_p, dp), F32),
        grid_spec=pltpu.PrefetchScalarGridSpec(
            num_scalar_prefetch=0,
            grid=(n_p // t, n_p // t),
            in_specs=[
                pl.BlockSpec((t, heads * dp), lambda i, j: (j, 0)),   # hh src rows
                pl.BlockSpec((t, t), lambda i, j: (i, j)),            # adj mask (int8)
                pl.BlockSpec((t, heads), lambda i, j: (i, 0)),        # dst scores
                pl.BlockSpec((heads, t), lambda i, j: (0, j)),        # src scores
                pl.BlockSpec((t, dp), lambda i, j: (i, 0)),           # x dst rows
            ],
            out_specs=pl.BlockSpec((t, dp), lambda i, j: (i, 0)),
            scratch_shapes=[
                pltpu.VMEM((heads, t, 1), F32),     # running max
                pltpu.VMEM((heads, t, 1), F32),     # running denom
                pltpu.VMEM((heads, t, dp), F32),    # running numerator
            ],
        ),
        compiler_params=_cparams("parallel", "arbitrary"),
    )(hh_p, adj_p, sdst_p, ssrc_p, x_p)
    return out[:n_items]


# --------------------------------------------------------------------------
# Contrastive (InfoNCE) loss, tiled over (query, key) blocks; query axis is
# "parallel" (dual-TensorCore on v7x); the BxB matrix is never materialized.
# --------------------------------------------------------------------------
def _closs_kernel(pos_ref, aug_diag_ref, aug_key_ref, o_ref,
                  posn_scr, ttl_scr, *, c_temp, b_true):
    j = pl.program_id(1)

    @pl.when(j == 0)
    def _():
        p = pos_ref[...]
        ss = jnp.sum(p * p, axis=1, keepdims=True)
        posn_scr[...] = p * lax.rsqrt(jnp.maximum(ss, 1e-24))
        ttl_scr[...] = jnp.zeros_like(ttl_scr)

    ak = aug_key_ref[...]
    ssk = jnp.sum(ak * ak, axis=1, keepdims=True)
    akn = ak * lax.rsqrt(jnp.maximum(ssk, 1e-24))
    scores = lax.dot_general(posn_scr[...], akn, (((1,), (1,)), ((), ())),
                             preferred_element_type=jnp.float32)        # (tq, tk)
    scores = jnp.exp(scores * (1.0 / c_temp))
    tk = akn.shape[0]
    cols = lax.broadcasted_iota(jnp.int32, (1, tk), 1) + j * tk
    valid = (cols < b_true).astype(jnp.float32)
    ttl_scr[...] += jnp.sum(scores * valid, axis=1, keepdims=True)

    @pl.when(j == pl.num_programs(1) - 1)
    def _():
        ad = aug_diag_ref[...]
        ssd = jnp.sum(ad * ad, axis=1, keepdims=True)
        adn = ad * lax.rsqrt(jnp.maximum(ssd, 1e-24))
        pos_score = jnp.sum(posn_scr[...] * adn, axis=1,
                            keepdims=True) * (1.0 / c_temp)
        o_ref[...] = jnp.log(ttl_scr[...]) - pos_score       # per-row loss


def pallas_closs(pos, aug, c_temp, t=CL_TILE):
    b, dp = pos.shape
    t = min(t, _round_up(b, 8))
    b_p = _round_up(b, t)
    pos_p = _prep_operand(pos, b_p, dp, F32)
    aug_p = _prep_operand(aug, b_p, dp, F32)
    kern = functools.partial(_closs_kernel, c_temp=float(c_temp), b_true=b)
    per_row = pl.pallas_call(
        kern,
        out_shape=jax.ShapeDtypeStruct((b_p, 1), F32),
        grid_spec=pltpu.PrefetchScalarGridSpec(
            num_scalar_prefetch=0,
            grid=(b_p // t, b_p // t),
            in_specs=[
                pl.BlockSpec((t, dp), lambda qi, kj: (qi, 0)),    # queries
                pl.BlockSpec((t, dp), lambda qi, kj: (qi, 0)),    # diag keys
                pl.BlockSpec((t, dp), lambda qi, kj: (kj, 0)),    # streamed keys
            ],
            out_specs=pl.BlockSpec((t, 1), lambda qi, kj: (qi, 0)),
            scratch_shapes=[pltpu.VMEM((t, dp), F32),
                            pltpu.VMEM((t, 1), F32)],
        ),
        compiler_params=_cparams("parallel", "arbitrary"),
    )(pos_p, aug_p, aug_p)
    return jnp.sum(per_row[:b, 0]) / b


# --------------------------------------------------------------------------
# BPR loss (numerically stable softplus).  Users arrive un-broadcast (B, DP),
# bundle negatives as a lane-dense (B, n_neg*DP) slab.
# --------------------------------------------------------------------------
def _bpr_kernel(ilu_ref, blu_ref, ilb_pos_ref, blb_pos_ref,
                ilb_neg_ref, blb_neg_ref, o_ref, *, n_neg, dp, n_rows):
    ilu = ilu_ref[...]
    blu = blu_ref[...]
    pos = (jnp.sum(ilu * ilb_pos_ref[...], axis=1, keepdims=True)
           + jnp.sum(blu * blb_pos_ref[...], axis=1, keepdims=True))    # (B, 1)
    total = jnp.zeros((1, 1), jnp.float32)
    for jn in range(n_neg):
        lo, hi = jn * dp, (jn + 1) * dp
        neg = (jnp.sum(ilu * ilb_neg_ref[:, lo:hi], axis=1, keepdims=True)
               + jnp.sum(blu * blb_neg_ref[:, lo:hi], axis=1, keepdims=True))
        x = neg - pos
        # -log(sigmoid(pos - neg)) == softplus(neg - pos), computed stably
        loss = jnp.maximum(x, 0.0) + jnp.log(1.0 + jnp.exp(-jnp.abs(x)))
        total = total + jnp.sum(loss, axis=0, keepdims=True)
    o_ref[...] = total * (1.0 / float(n_rows * n_neg))


def pallas_bpr(il_u, bl_u, il_b, bl_b):
    bsz, nb, dp = il_b.shape
    n_neg = nb - 1
    ilb_pos = il_b[:, 0, :]
    blb_pos = bl_b[:, 0, :]
    ilb_neg = il_b[:, 1:, :].reshape(bsz, n_neg * dp)
    blb_neg = bl_b[:, 1:, :].reshape(bsz, n_neg * dp)
    vmem = pl.BlockSpec(memory_space=pltpu.MemorySpace.VMEM)
    kern = functools.partial(_bpr_kernel, n_neg=n_neg, dp=dp, n_rows=bsz)
    out = pl.pallas_call(
        kern,
        out_shape=jax.ShapeDtypeStruct((1, 1), F32),
        in_specs=[vmem] * 6,
        out_specs=vmem,
    )(il_u.astype(F32), bl_u.astype(F32), ilb_pos.astype(F32),
      blb_pos.astype(F32), ilb_neg.astype(F32), blb_neg.astype(F32))
    return out[0, 0]


# --------------------------------------------------------------------------
# Graph construction (numpy glue, mirrors scipy-based __init__ of BunCa)
# TODO(synk): scipy sparse graphs / n_neigh_*.npy edge indices are replaced by
# dense synthetic graphs with identical math.
# --------------------------------------------------------------------------
def laplace_transform_dense(g):
    rowsum = g.sum(axis=1)
    colsum = g.sum(axis=0)
    dr = 1.0 / (np.sqrt(rowsum) + 1e-8)
    dc = 1.0 / (np.sqrt(colsum) + 1e-8)
    return (dr[:, None] * g) * dc[None, :]


def bipartite_block(g):
    r, c = g.shape
    top = np.concatenate([np.zeros((r, r)), g], axis=1)
    bot = np.concatenate([g.T, np.zeros((c, c))], axis=1)
    return np.concatenate([top, bot], axis=0)


def build_graphs(conf, rng):
    U, B, I = conf['num_users'], conf['num_bundles'], conf['num_items']
    ub = (rng.random((U, B)) < 0.4).astype(np.float32)
    ui = (rng.random((U, I)) < 0.4).astype(np.float32)
    bi = (rng.random((B, I)) < 0.4).astype(np.float32)

    item_level_graph = laplace_transform_dense(bipartite_block(ui))
    bi_propagate_graph = laplace_transform_dense(bipartite_block(bi))

    th = conf['hyperth']
    uu = ((ub @ ub.T) > th).astype(np.float32)
    bb = ((ub.T @ ub) > th).astype(np.float32)
    top = np.concatenate([uu, ub], axis=1)
    bot = np.concatenate([ub.T, bb], axis=1)
    bundle_level_graph = laplace_transform_dense(np.concatenate([top, bot], axis=0))

    bundle_agg_graph = bi / (bi.sum(axis=1, keepdims=True) + 1e-8)
    user_agg_graph = ui / (ui.sum(axis=1, keepdims=True) + 1e-8)

    iui_adj = ((ui.T @ ui) > 0).astype(np.float32)
    ibi_adj = ((bi.T @ bi) > 0).astype(np.float32)
    if conf['self_loop']:
        np.fill_diagonal(iui_adj, 1.0)
        np.fill_diagonal(ibi_adj, 1.0)

    g = dict(item_level_graph=item_level_graph,
             bi_propagate_graph=bi_propagate_graph,
             bundle_level_graph=bundle_level_graph,
             bundle_agg_graph=bundle_agg_graph,
             user_agg_graph=user_agg_graph,
             iui_adj=iui_adj, ibi_adj=ibi_adj)
    return {k: jnp.asarray(v, jnp.float32) for k, v in g.items()}


def preprocess_graphs(conf, graphs):
    """Pre-pad / pre-cast all dense graphs ONCE, outside the jitted step.
    (bf16 for Laplacian / agg graphs, int8 for the GAT adjacency masks.)"""
    U, B, I = conf['num_users'], conf['num_bundles'], conf['num_items']
    DP = _round_up(conf['embedding_size'], LANE)
    out = dict(graphs)

    def prep_prop(name, n):
        t, n_p = _square_dims(n, PROP_TILE)
        out[name] = _prep_operand(graphs[name], n_p, n_p, BF16)

    prep_prop('item_level_graph', U + I)
    prep_prop('bi_propagate_graph', B + I)
    prep_prop('bundle_level_graph', U + B)

    def prep_agg(name, m, k):
        _, _, mp, kp, _ = matmul_dims(m, k, DP)
        out[name] = _prep_operand(graphs[name], mp, kp, BF16)

    prep_agg('bundle_agg_graph', B, I)
    prep_agg('user_agg_graph', U, I)

    t, n_p = _square_dims(I, GAT_TILE)
    for name in ('iui_adj', 'ibi_adj'):
        adj = (graphs[name] > 0).astype(I8)
        out[name] = _prep_operand(adj, n_p, n_p, I8)
    return out


# --------------------------------------------------------------------------
# Parameters (deterministic init, mirrors init_emb / GAT layer shapes)
# --------------------------------------------------------------------------
def xavier_normal(key, shape):
    fan_in, fan_out = shape[0], shape[1]
    std = np.sqrt(2.0 / (fan_in + fan_out))
    return jax.random.normal(key, shape, jnp.float32) * std


def init_params(conf, key):
    U, B, I, D = (conf['num_users'], conf['num_bundles'],
                  conf['num_items'], conf['embedding_size'])
    H = conf['nhead']
    ks = jax.random.split(key, 9)
    params = dict(
        users_feature=xavier_normal(ks[0], (U, D)),
        bundles_feature=xavier_normal(ks[1], (B, D)),
        items_feature=xavier_normal(ks[2], (I, D)),
        iui_gat=dict(W=xavier_normal(ks[3], (D, H * D)),
                     a_src=jax.random.normal(ks[4], (H, D), jnp.float32) * 0.1,
                     a_dst=jax.random.normal(ks[5], (H, D), jnp.float32) * 0.1),
        ibi_gat=dict(W=xavier_normal(ks[6], (D, H * D)),
                     a_src=jax.random.normal(ks[7], (H, D), jnp.float32) * 0.1,
                     a_dst=jax.random.normal(ks[8], (H, D), jnp.float32) * 0.1),
    )
    return params


# --------------------------------------------------------------------------
# BunCa forward (propagate + cal_loss)
# --------------------------------------------------------------------------
def propagate(params, graphs, conf):
    U, B, I = conf['num_users'], conf['num_bundles'], conf['num_items']
    D, H = conf['embedding_size'], conf['nhead']
    DP = _round_up(D, LANE)
    nw, sw = conf['nw'], conf['sw']
    w1, w2, w3, w4 = conf['w1'], conf['w2'], conf['w3'], conf['w4']

    pad_d = lambda x: jnp.pad(x, ((0, 0), (0, DP - D)))
    users_f = pad_d(params['users_feature'])
    bundles_f = pad_d(params['bundles_feature'])
    items_f = pad_d(params['items_feature'])

    # ----- item-level (user-item) view -----
    il_items = pallas_gat_items(items_f, params['iui_gat'], graphs['iui_adj'],
                                H, D, DP, nw, sw)
    feats = jnp.concatenate([users_f, il_items], axis=0)
    allf = pallas_one_propagate(graphs['item_level_graph'], feats,
                                conf['num_layers'])
    IL_users_feature = allf[:U]
    IL_items_feature = allf[U:]

    # ----- bundle-item propagate view -----
    il_items2 = pallas_gat_items(items_f, params['ibi_gat'], graphs['ibi_adj'],
                                 H, D, DP, nw, sw)
    feats2 = jnp.concatenate([bundles_f, il_items2], axis=0)
    allf2 = pallas_one_propagate(graphs['bi_propagate_graph'], feats2,
                                 conf['num_layers'])
    BIL_bundles_feature = allf2[:B]
    IL_items_feature2 = allf2[B:]

    # aggregation matmuls with the w3/w4 fuse blends folded into the epilogue
    fuse_bundles = pallas_matmul_blend(graphs['bundle_agg_graph'],
                                       IL_items_feature,
                                       BIL_bundles_feature,
                                       alpha=1.0 - w3, beta=w3)
    fuse_users = pallas_matmul_blend(graphs['user_agg_graph'],
                                     IL_items_feature2,
                                     IL_users_feature,
                                     alpha=w4, beta=1.0 - w4)

    # ----- bundle-level (user-bundle) view -----
    feats3 = jnp.concatenate([users_f, bundles_f], axis=0)
    allf3 = pallas_one_propagate(graphs['bundle_level_graph'], feats3,
                                 conf['num_layers'])
    BL_users = allf3[:U] * w1
    BL_bundles = allf3[U:] * w2

    return [fuse_users, BL_users], [fuse_bundles, BL_bundles]


def bunca_forward(conf, params, graphs, users_idx, bundles_idx):
    users_feature, bundles_feature = propagate(params, graphs, conf)
    IL_uf, BL_uf = users_feature
    IL_bf, BL_bf = bundles_feature

    u = users_idx[:, 0]
    IL_u = IL_uf[u]                       # (B, DP), never broadcast to (B, nb, DP)
    BL_u = BL_uf[u]
    IL_b = IL_bf[bundles_idx]             # (B, nb, DP)
    BL_b = BL_bf[bundles_idx]

    bpr_loss = pallas_bpr(IL_u, BL_u, IL_b, BL_b)

    c_temp = conf['c_temp']
    cw = conf['contrast_weight']
    IL_b_pos = IL_b[:, 0, :]
    BL_b_pos = BL_b[:, 0, :]
    u_cross = pallas_closs(IL_u, BL_u, c_temp)
    b_cross = pallas_closs(IL_b_pos, BL_b_pos, c_temp)
    u_nat = IL_u + BL_u
    b_nat = IL_b_pos + BL_b_pos
    u_native = pallas_closs(u_nat, u_nat, c_temp)
    b_native = pallas_closs(b_nat, b_nat, c_temp)
    c_loss = (u_cross * cw[0] + b_cross * cw[1]
              + u_native * cw[2] + b_native * cw[3])
    return bpr_loss, c_loss


# --------------------------------------------------------------------------
if __name__ == "__main__":
    conf = dict(
        embedding_size=64, num_users=8, num_bundles=12, num_items=16,
        w1=1.0, w2=1.0, w3=0.5, w4=0.5,
        num_layers=2, c_temp=0.25, nhead=2,
        sw=1.0, nw=1.0, contrast_weight=[0.04, 0.04, 0.04, 0.04],
        hyperth=2.0, aug_type='ED',
        item_level_ratio=0.0, bundle_level_ratio=0.0, bundle_agg_ratio=0.0,
        self_loop=True, extra_layer=False,
    )

    key = jax.random.PRNGKey(0)
    k_params, k_users, k_bundles = jax.random.split(key, 3)
    params = init_params(conf, k_params)
    graphs = build_graphs(conf, np.random.default_rng(0))
    graphs = preprocess_graphs(conf, graphs)      # pad + cast once, outside jit

    # batch: (users (B,1), bundles (B, 1 pos + 2 negs))
    Bsz, nb = 4, 3
    users_idx = jax.random.randint(k_users, (Bsz, 1), 0, conf['num_users'])
    bundles_idx = jax.random.randint(k_bundles, (Bsz, nb), 0, conf['num_bundles'])

    fwd = jax.jit(functools.partial(bunca_forward, conf))
    bpr_loss, c_loss = fwd(params, graphs, users_idx, bundles_idx)
    bpr_loss = jax.block_until_ready(bpr_loss)
    c_loss = jax.block_until_ready(c_loss)

    assert np.isfinite(float(bpr_loss)) and np.isfinite(float(c_loss))
    print("KERNEL_OK")
</pallas_src>

<mosaic_0001>
module attributes {stable_mosaic.version = 11 : i64} {
  func.func @_mm_kernel(%arg0: i32, %arg1: i32, %arg2: memref<128x128xbf16, #tpu.memory_space<vmem>>, %arg3: memref<128x256xbf16, #tpu.memory_space<vmem>>, %arg4: memref<128x256xf32, #tpu.memory_space<vmem>>, %arg5: memref<128x256xf32, #tpu.memory_space<vmem>>) attributes {dimension_semantics = [#tpu.dimension_semantics<parallel>, #tpu.dimension_semantics<arbitrary>], iteration_bounds = array<i64: 1, 1>, scalar_prefetch = 0 : i64, scratch_operands = 1 : i64, tpu.core_type = #tpu.core_type<tc>, window_params = [{transform_indices = @transform_0, window_bounds = array<i64: 128, 128>}, {transform_indices = @transform_1, window_bounds = array<i64: 128, 256>}, {transform_indices = @transform_2, window_bounds = array<i64: 128, 256>}]} {
    %c0_i32 = arith.constant 0 : i32
    %0 = arith.cmpi eq, %arg1, %c0_i32 : i32
    %1 = arith.extui %0 : i1 to i32
    %c0_i32_0 = arith.constant 0 : i32
    %2 = arith.cmpi ne, %1, %c0_i32_0 : i32
    scf.if %2 {
      %cst_10 = arith.constant 0.000000e+00 : f32
      %12 = vector.broadcast %cst_10 : f32 to vector<128x256xf32>
      %c0_11 = arith.constant 0 : index
      %c0_12 = arith.constant 0 : index
      %13 = vector.load %arg5[%c0_11, %c0_12] : memref<128x256xf32, #tpu.memory_space<vmem>>, vector<128x256xf32>
      tpu.vector_store %arg5[%c0_11, %c0_12], %12 {strides = array<i32>} : memref<128x256xf32, #tpu.memory_space<vmem>>, vector<128x256xf32>,
    } else {
    }
    %c0 = arith.constant 0 : index
    %c0_1 = arith.constant 0 : index
    %3 = vector.load %arg5[%c0, %c0_1] : memref<128x256xf32, #tpu.memory_space<vmem>>, vector<128x256xf32>
    %c0_2 = arith.constant 0 : index
    %c0_3 = arith.constant 0 : index
    %4 = vector.load %arg2[%c0_2, %c0_3] : memref<128x128xbf16, #tpu.memory_space<vmem>>, vector<128x128xbf16>
    %c0_4 = arith.constant 0 : index
    %c0_5 = arith.constant 0 : index
    %5 = vector.load %arg3[%c0_4, %c0_5] : memref<128x256xbf16, #tpu.memory_space<vmem>>, vector<128x256xbf16>
    %cst = arith.constant dense<0.000000e+00> : vector<128x256xf32>
    %6 = tpu.matmul %4, %5, %cst {dimension_numbers = #tpu.dot_dimension_numbers<[1], [0], [0], [1], [0, 0, 1, 1], [], []>} : vector<128x128xbf16>, vector<128x256xbf16>, vector<128x256xf32> -> vector<128x256xf32>
    %7 = arith.addf %3, %6 : vector<128x256xf32>
    %c0_6 = arith.constant 0 : index
    %c0_7 = arith.constant 0 : index
    %8 = vector.load %arg5[%c0_6, %c0_7] : memref<128x256xf32, #tpu.memory_space<vmem>>, vector<128x256xf32>
    tpu.vector_store %arg5[%c0_6, %c0_7], %7 {strides = array<i32>} : memref<128x256xf32, #tpu.memory_space<vmem>>, vector<128x256xf32>,
    %c0_i32_8 = arith.constant 0 : i32
    %9 = arith.cmpi eq, %arg1, %c0_i32_8 : i32
    %10 = arith.extui %9 : i1 to i32
    %c0_i32_9 = arith.constant 0 : i32
    %11 = arith.cmpi ne, %10, %c0_i32_9 : i32
    scf.if %11 {
      %c0_10 = arith.constant 0 : index
      %c0_11 = arith.constant 0 : index
      %12 = vector.load %arg5[%c0_10, %c0_11] : memref<128x256xf32, #tpu.memory_space<vmem>>, vector<128x256xf32>
      %c0_12 = arith.constant 0 : index
      %c0_13 = arith.constant 0 : index
      %13 = vector.load %arg4[%c0_12, %c0_13] : memref<128x256xf32, #tpu.memory_space<vmem>>, vector<128x256xf32>
      tpu.vector_store %arg4[%c0_12, %c0_13], %12 {strides = array<i32>} : memref<128x256xf32, #tpu.memory_space<vmem>>, vector<128x256xf32>,
    } else {
    }
    return
  }
  func.func @transform_0(%arg0: i32, %arg1: i32) -> (i32, i32) {
    %c0_i32 = arith.constant 0 : i32
    return %arg0, %arg1 : i32, i32
  }
  func.func @transform_1(%arg0: i32, %arg1: i32) -> (i32, i32) {
    %c0_i32 = arith.constant 0 : i32
    %c0_i32_0 = arith.constant 0 : i32
    return %arg1, %c0_i32 : i32, i32
  }
  func.func @transform_2(%arg0: i32, %arg1: i32) -> (i32, i32) {
    %c0_i32 = arith.constant 0 : i32
    %c0_i32_0 = arith.constant 0 : i32
    return %arg0, %c0_i32 : i32, i32
  }
}

module attributes {stable_mosaic.version = 11 : i64} {
  func.func @_gat_attn_kernel(%arg0: i32, %arg1: i32, %arg2: memref<128x256xbf16, #tpu.memory_space<vmem>>, %arg3: memref<128x128xi8, #tpu.memory_space<vmem>>, %arg4: memref<128x2xf32, #tpu.memory_space<vmem>>, %arg5: memref<2x128xf32, #tpu.memory_space<vmem>>, %arg6: memref<128x128xf32, #tpu.memory_space<vmem>>, %arg7: memref<128x128xf32, #tpu.memory_space<vmem>>, %arg8: memref<2x128x1xf32, #tpu.memory_space<vmem>>, %arg9: memref<2x128x1xf32, #tpu.memory_space<vmem>>, %arg10: memref<2x128x128xf32, #tpu.memory_space<vmem>>) attributes {dimension_semantics = [#tpu.dimension_semantics<parallel>, #tpu.dimension_semantics<arbitrary>], iteration_bounds = array<i64: 1, 1>, scalar_prefetch = 0 : i64, scratch_operands = 3 : i64, tpu.core_type = #tpu.core_type<tc>, window_params = [{transform_indices = @transform_0, window_bounds = array<i64: 128, 256>}, {transform_indices = @transform_1, window_bounds = array<i64: 128, 128>}, {transform_indices = @transform_2, window_bounds = array<i64: 128, 2>}, {transform_indices = @transform_3, window_bounds = array<i64: 2, 128>}, {transform_indices = @transform_4, window_bounds = array<i64: 128, 128>}, {transform_indices = @transform_5, window_bounds = array<i64: 128, 128>}]} {
    %c0_i32 = arith.constant 0 : i32
    %0 = arith.cmpi eq, %arg1, %c0_i32 : i32
    %1 = arith.extui %0 : i1 to i32
    %c0_i32_0 = arith.constant 0 : i32
    %2 = arith.cmpi ne, %1, %c0_i32_0 : i32
    scf.if %2 {
      %cst_64 = arith.constant -1.000000e+30 : f32
      %104 = vector.broadcast %cst_64 : f32 to vector<2x128x1xf32>
      %c0_65 = arith.constant 0 : index
      %c0_66 = arith.constant 0 : index
      %c0_67 = arith.constant 0 : index
      %105 = vector.load %arg8[%c0_65, %c0_66, %c0_67] : memref<2x128x1xf32, #tpu.memory_space<vmem>>, vector<2x128x1xf32>
      tpu.vector_store %arg8[%c0_65, %c0_66, %c0_67], %104 {strides = array<i32>} : memref<2x128x1xf32, #tpu.memory_space<vmem>>, vector<2x128x1xf32>,
      %cst_68 = arith.constant 0.000000e+00 : f32
      %106 = vector.broadcast %cst_68 : f32 to vector<2x128x1xf32>
      %c0_69 = arith.constant 0 : index
      %c0_70 = arith.constant 0 : index
      %c0_71 = arith.constant 0 : index
      %107 = vector.load %arg9[%c0_69, %c0_70, %c0_71] : memref<2x128x1xf32, #tpu.memory_space<vmem>>, vector<2x128x1xf32>
      tpu.vector_store %arg9[%c0_69, %c0_70, %c0_71], %106 {strides = array<i32>} : memref<2x128x1xf32, #tpu.memory_space<vmem>>, vector<2x128x1xf32>,
      %cst_72 = arith.constant 0.000000e+00 : f32
      %108 = vector.broadcast %cst_72 : f32 to vector<2x128x128xf32>
      %c0_73 = arith.constant 0 : index
      %c0_74 = arith.constant 0 : index
      %c0_75 = arith.constant 0 : index
      %109 = vector.load %arg10[%c0_73, %c0_74, %c0_75] : memref<2x128x128xf32, #tpu.memory_space<vmem>>, vector<2x128x128xf32>
      tpu.vector_store %arg10[%c0_73, %c0_74, %c0_75], %108 {strides = array<i32>} : memref<2x128x128xf32, #tpu.memory_space<vmem>>, vector<2x128x128xf32>,
    } else {
    }
    %c0 = arith.constant 0 : index
    %c0_1 = arith.constant 0 : index
    %3 = vector.load %arg3[%c0, %c0_1] : memref<128x128xi8, #tpu.memory_space<vmem>>, vector<128x128xi8>
    %4 = arith.extsi %3 : vector<128x128xi8> to vector<128x128xi32>
    %c0_i32_2 = arith.constant 0 : i32
    %5 = vector.broadcast %c0_i32_2 : i32 to vector<128x128xi32>
    %6 = arith.cmpi sgt, %4, %5 : vector<128x128xi32>
    %c0_3 = arith.constant 0 : index
    %c0_4 = arith.constant 0 : index
    %7 = vector.load %arg4[%c0_3, %c0_4] : memref<128x2xf32, #tpu.memory_space<vmem>>, vector<128x1xf32>
    %c0_5 = arith.constant 0 : index
    %c0_6 = arith.constant 0 : index
    %8 = vector.load %arg5[%c0_5, %c0_6] : memref<2x128xf32, #tpu.memory_space<vmem>>, vector<1x128xf32>
    %9 = vector.broadcast %7 : vector<128x1xf32> to vector<128x128xf32>
    %10 = vector.broadcast %8 : vector<1x128xf32> to vector<128x128xf32>
    %11 = arith.addf %9, %10 : vector<128x128xf32>
    %cst = arith.constant 0.000000e+00 : f32
    %12 = vector.broadcast %cst : f32 to vector<128x128xf32>
    %13 = arith.cmpf ogt, %11, %12 : vector<128x128xf32>
    %cst_7 = arith.constant 2.000000e-01 : f32
    %14 = vector.broadcast %cst_7 : f32 to vector<128x128xf32>
    %15 = arith.mulf %14, %11 : vector<128x128xf32>
    %16 = arith.select %13, %11, %15 : vector<128x128xi1>, vector<128x128xf32>
    %cst_8 = arith.constant -1.000000e+30 : f32
    %17 = vector.broadcast %cst_8 : f32 to vector<128x128xf32>
    %18 = arith.select %6, %16, %17 : vector<128x128xi1>, vector<128x128xf32>
    %c0_9 = arith.constant 0 : index
    %c0_10 = arith.constant 0 : index
    %c0_11 = arith.constant 0 : index
    %19 = vector.load %arg8[%c0_9, %c0_10, %c0_11] : memref<2x128x1xf32, #tpu.memory_space<vmem>>, vector<1x128x1xf32>
    %20 = vector.shape_cast %19 : vector<1x128x1xf32> to vector<128x1xf32>
    %cst_12 = arith.constant dense<0xFF800000> : vector<128xf32>
    %21 = vector.multi_reduction <maximumf>, %18, %cst_12 [1] : vector<128x128xf32> to vector<128xf32>
    %22 = vector.shape_cast %21 : vector<128xf32> to vector<128x1xf32>
    %23 = arith.maximumf %20, %22 : vector<128x1xf32>
    %24 = arith.subf %20, %23 : vector<128x1xf32>
    %25 = math.exp %24 : vector<128x1xf32>
    %26 = vector.broadcast %23 : vector<128x1xf32> to vector<128x128xf32>
    %27 = arith.subf %18, %26 : vector<128x128xf32>
    %28 = math.exp %27 : vector<128x128xf32>
    %cst_13 = arith.constant 0.000000e+00 : f32
    %29 = vector.broadcast %cst_13 : f32 to vector<128x128xf32>
    %30 = arith.select %6, %28, %29 : vector<128x128xi1>, vector<128x128xf32>
    %c0_14 = arith.constant 0 : index
    %c0_15 = arith.constant 0 : index
    %c0_16 = arith.constant 0 : index
    %31 = vector.load %arg9[%c0_14, %c0_15, %c0_16] : memref<2x128x1xf32, #tpu.memory_space<vmem>>, vector<1x128x1xf32>
    %32 = vector.shape_cast %31 : vector<1x128x1xf32> to vector<128x1xf32>
    %33 = arith.mulf %25, %32 : vector<128x1xf32>
    %cst_17 = arith.constant dense<0.000000e+00> : vector<128xf32>
    %34 = vector.multi_reduction <add>, %30, %cst_17 [1] : vector<128x128xf32> to vector<128xf32>
    %35 = vector.shape_cast %34 : vector<128xf32> to vector<128x1xf32>
    %36 = arith.addf %33, %35 : vector<128x1xf32>
    %c0_18 = arith.constant 0 : index
    %c0_19 = arith.constant 0 : index
    %c0_20 = arith.constant 0 : index
    %37 = vector.load %arg9[%c0_18, %c0_19, %c0_20] : memref<2x128x1xf32, #tpu.memory_space<vmem>>, vector<1x128x1xf32>
    %38 = vector.shape_cast %37 : vector<1x128x1xf32> to vector<128x1xf32>
    %39 = vector.shape_cast %36 : vector<128x1xf32> to vector<1x128x1xf32>
    tpu.vector_store %arg9[%c0_18, %c0_19, %c0_20], %39 {strides = array<i32>} : memref<2x128x1xf32, #tpu.memory_space<vmem>>, vector<1x128x1xf32>,
    %c0_21 = arith.constant 0 : index
    %c0_22 = arith.constant 0 : index
    %c0_23 = arith.constant 0 : index
    %40 = vector.load %arg10[%c0_21, %c0_22, %c0_23] : memref<2x128x128xf32, #tpu.memory_space<vmem>>, vector<1x128x128xf32>
    %41 = vector.shape_cast %40 : vector<1x128x128xf32> to vector<128x128xf32>
    %42 = vector.broadcast %25 : vector<128x1xf32> to vector<128x128xf32>
    %43 = arith.mulf %42, %41 : vector<128x128xf32>
    %44 = arith.truncf %30 : vector<128x128xf32> to vector<128x128xbf16>
    %c0_24 = arith.constant 0 : index
    %c0_25 = arith.constant 0 : index
    %45 = vector.load %arg2[%c0_24, %c0_25] : memref<128x256xbf16, #tpu.memory_space<vmem>>, vector<128x128xbf16>
    %cst_26 = arith.constant dense<0.000000e+00> : vector<128x128xf32>
    %46 = tpu.matmul %44, %45, %cst_26 {dimension_numbers = #tpu.dot_dimension_numbers<[1], [0], [0], [1], [0, 0, 1, 1], [], []>} : vector<128x128xbf16>, vector<128x128xbf16>, vector<128x128xf32> -> vector<128x128xf32>
    %47 = arith.addf %43, %46 : vector<128x128xf32>
    %c0_27 = arith.constant 0 : index
    %c0_28 = arith.constant 0 : index
    %c0_29 = arith.constant 0 : index
    %48 = vector.load %arg10[%c0_27, %c0_28, %c0_29] : memref<2x128x128xf32, #tpu.memory_space<vmem>>, vector<1x128x128xf32>
    %49 = vector.shape_cast %48 : vector<1x128x128xf32> to vector<128x128xf32>
    %50 = vector.shape_cast %47 : vector<128x128xf32> to vector<1x128x128xf32>
    tpu.vector_store %arg10[%c0_27, %c0_28, %c0_29], %50 {strides = array<i32>} : memref<2x128x128xf32, #tpu.memory_space<vmem>>, vector<1x128x128xf32>,
    %c0_30 = arith.constant 0 : index
    %c0_31 = arith.constant 0 : index
    %c0_32 = arith.constant 0 : index
    %51 = vector.load %arg8[%c0_30, %c0_31, %c0_32] : memref<2x128x1xf32, #tpu.memory_space<vmem>>, vector<1x128x1xf32>
    %52 = vector.shape_cast %51 : vector<1x128x1xf32> to vector<128x1xf32>
    %53 = vector.shape_cast %23 : vector<128x1xf32> to vector<1x128x1xf32>
    tpu.vector_store %arg8[%c0_30, %c0_31, %c0_32], %53 {strides = array<i32>} : memref<2x128x1xf32, #tpu.memory_space<vmem>>, vector<1x128x1xf32>,
    %c0_33 = arith.constant 0 : index
    %c1 = arith.constant 1 : index
    %54 = vector.load %arg4[%c0_33, %c1] : memref<128x2xf32, #tpu.memory_space<vmem>>, vector<128x1xf32>
    %c1_34 = arith.constant 1 : index
    %c0_35 = arith.constant 0 : index
    %55 = vector.load %arg5[%c1_34, %c0_35] : memref<2x128xf32, #tpu.memory_space<vmem>>, vector<1x128xf32>
    %56 = vector.broadcast %54 : vector<128x1xf32> to vector<128x128xf32>
    %57 = vector.broadcast %55 : vector<1x128xf32> to vector<128x128xf32>
    %58 = arith.addf %56, %57 : vector<128x128xf32>
    %cst_36 = arith.constant 0.000000e+00 : f32
    %59 = vector.broadcast %cst_36 : f32 to vector<128x128xf32>
    %60 = arith.cmpf ogt, %58, %59 : vector<128x128xf32>
    %cst_37 = arith.constant 2.000000e-01 : f32
    %61 = vector.broadcast %cst_37 : f32 to vector<128x128xf32>
    %62 = arith.mulf %61, %58 : vector<128x128xf32>
    %63 = arith.select %60, %58, %62 : vector<128x128xi1>, vector<128x128xf32>
    %cst_38 = arith.constant -1.000000e+30 : f32
    %64 = vector.broadcast %cst_38 : f32 to vector<128x128xf32>
    %65 = arith.select %6, %63, %64 : vector<128x128xi1>, vector<128x128xf32>
    %c1_39 = arith.constant 1 : index
    %c0_40 = arith.constant 0 : index
    %c0_41 = arith.constant 0 : index
    %66 = vector.load %arg8[%c1_39, %c0_40, %c0_41] : memref<2x128x1xf32, #tpu.memory_space<vmem>>, vector<1x128x1xf32>
    %67 = vector.shape_cast %66 : vector<1x128x1xf32> to vector<128x1xf32>
    %cst_42 = arith.constant dense<0xFF800000> : vector<128xf32>
    %68 = vector.multi_reduction <maximumf>, %65, %cst_42 [1] : vector<128x128xf32> to vector<128xf32>
    %69 = vector.shape_cast %68 : vector<128xf32> to vector<128x1xf32>
    %70 = arith.maximumf %67, %69 : vector<128x1xf32>
    %71 = arith.subf %67, %70 : vector<128x1xf32>
    %72 = math.exp %71 : vector<128x1xf32>
    %73 = vector.broadcast %70 : vector<128x1xf32> to vector<128x128xf32>
    %74 = arith.subf %65, %73 : vector<128x128xf32>
    %75 = math.exp %74 : vector<128x128xf32>
    %cst_43 = arith.constant 0.000000e+00 : f32
    %76 = vector.broadcast %cst_43 : f32 to vector<128x128xf32>
    %77 = arith.select %6, %75, %76 : vector<128x128xi1>, vector<128x128xf32>
    %c1_44 = arith.constant 1 : index
    %c0_45 = arith.constant 0 : index
    %c0_46 = arith.constant 0 : index
    %78 = vector.load %arg9[%c1_44, %c0_45, %c0_46] : memref<2x128x1xf32, #tpu.memory_space<vmem>>, vector<1x128x1xf32>
    %79 = vector.shape_cast %78 : vector<1x128x1xf32> to vector<128x1xf32>
    %80 = arith.mulf %72, %79 : vector<128x1xf32>
    %cst_47 = arith.constant dense<0.000000e+00> : vector<128xf32>
    %81 = vector.multi_reduction <add>, %77, %cst_47 [1] : vector<128x128xf32> to vector<128xf32>
    %82 = vector.shape_cast %81 : vector<128xf32> to vector<128x1xf32>
    %83 = arith.addf %80, %82 : vector<128x1xf32>
    %c1_48 = arith.constant 1 : index
    %c0_49 = arith.constant 0 : index
    %c0_50 = arith.constant 0 : index
    %84 = vector.load %arg9[%c1_48, %c0_49, %c0_50] : memref<2x128x1xf32, #tpu.memory_space<vmem>>, vector<1x128x1xf32>
    %85 = vector.shape_cast %84 : vector<1x128x1xf32> to vector<128x1xf32>
    %86 = vector.shape_cast %83 : vector<128x1xf32> to vector<1x128x1xf32>
    tpu.vector_store %arg9[%c1_48, %c0_49, %c0_50], %86 {strides = array<i32>} : memref<2x128x1xf32, #tpu.memory_space<vmem>>, vector<1x128x1xf32>,
    %c1_51 = arith.constant 1 : index
    %c0_52 = arith.constant 0 : index
    %c0_53 = arith.constant 0 : index
    %87 = vector.load %arg10[%c1_51, %c0_52, %c0_53] : memref<2x128x128xf32, #tpu.memory_space<vmem>>, vector<1x128x128xf32>
    %88 = vector.shape_cast %87 : vector<1x128x128xf32> to vector<128x128xf32>
    %89 = vector.broadcast %72 : vector<128x1xf32> to vector<128x128xf32>
    %90 = arith.mulf %89, %88 : vector<128x128xf32>
    %91 = arith.truncf %77 : vector<128x128xf32> to vector<128x128xbf16>
    %c0_54 = arith.constant 0 : index
    %c128 = arith.constant 128 : index
    %92 = vector.load %arg2[%c0_54, %c128] : memref<128x256xbf16, #tpu.memory_space<vmem>>, vector<128x128xbf16>
    %cst_55 = arith.constant dense<0.000000e+00> : vector<128x128xf32>
    %93 = tpu.matmul %91, %92, %cst_55 {dimension_numbers = #tpu.dot_dimension_numbers<[1], [0], [0], [1], [0, 0, 1, 1], [], []>} : vector<128x128xbf16>, vector<128x128xbf16>, vector<128x128xf32> -> vector<128x128xf32>
    %94 = arith.addf %90, %93 : vector<128x128xf32>
    %c1_56 = arith.constant 1 : index
    %c0_57 = arith.constant 0 : index
    %c0_58 = arith.constant 0 : index
    %95 = vector.load %arg10[%c1_56, %c0_57, %c0_58] : memref<2x128x128xf32, #tpu.memory_space<vmem>>, vector<1x128x128xf32>
    %96 = vector.shape_cast %95 : vector<1x128x128xf32> to vector<128x128xf32>
    %97 = vector.shape_cast %94 : vector<128x128xf32> to vector<1x128x128xf32>
    tpu.vector_store %arg10[%c1_56, %c0_57, %c0_58], %97 {strides = array<i32>} : memref<2x128x128xf32, #tpu.memory_space<vmem>>, vector<1x128x128xf32>,
    %c1_59 = arith.constant 1 : index
    %c0_60 = arith.constant 0 : index
    %c0_61 = arith.constant 0 : index
    %98 = vector.load %arg8[%c1_59, %c0_60, %c0_61] : memref<2x128x1xf32, #tpu.memory_space<vmem>>, vector<1x128x1xf32>
    %99 = vector.shape_cast %98 : vector<1x128x1xf32> to vector<128x1xf32>
    %100 = vector.shape_cast %70 : vector<128x1xf32> to vector<1x128x1xf32>
    tpu.vector_store %arg8[%c1_59, %c0_60, %c0_61], %100 {strides = array<i32>} : memref<2x128x1xf32, #tpu.memory_space<vmem>>, vector<1x128x1xf32>,
    %c0_i32_62 = arith.constant 0 : i32
    %101 = arith.cmpi eq, %arg1, %c0_i32_62 : i32
    %102 = arith.extui %101 : i1 to i32
    %c0_i32_63 = arith.constant 0 : i32
    %103 = arith.cmpi ne, %102, %c0_i32_63 : i32
    scf.if %103 {
      %c0_64 = arith.constant 0 : index
      %c0_65 = arith.constant 0 : index
      %104 = vector.load %arg6[%c0_64, %c0_65] : memref<128x128xf32, #tpu.memory_space<vmem>>, vector<128x128xf32>
      %cst_66 = arith.constant 0.000000e+00 : f32
      %105 = vector.broadcast %cst_66 : f32 to vector<128x128xf32>
      %c0_67 = arith.constant 0 : index
      %c0_68 = arith.constant 0 : index
      %c0_69 = arith.constant 0 : index
      %106 = vector.load %arg9[%c0_67, %c0_68, %c0_69] : memref<2x128x1xf32, #tpu.memory_space<vmem>>, vector<1x128x1xf32>
      %107 = vector.shape_cast %106 : vector<1x128x1xf32> to vector<128x1xf32>
      %cst_70 = arith.constant 1.000000e-16 : f32
      %108 = vector.broadcast %cst_70 : f32 to vector<128x1xf32>
      %109 = arith.addf %107, %108 : vector<128x1xf32>
      %110 = tpu.reciprocal %109 {approx = true} : vector<128x1xf32> -> vector<128x1xf32>
      %c0_71 = arith.constant 0 : index
      %c0_72 = arith.constant 0 : index
      %c0_73 = arith.constant 0 : index
      %111 = vector.load %arg10[%c0_71, %c0_72, %c0_73] : memref<2x128x128xf32, #tpu.memory_space<vmem>>, vector<1x128x128xf32>
      %112 = vector.shape_cast %111 : vector<1x128x128xf32> to vector<128x128xf32>
      %113 = vector.broadcast %110 : vector<128x1xf32> to vector<128x128xf32>
      %114 = arith.mulf %112, %113 : vector<128x128xf32>
      %115 = arith.addf %105, %114 : vector<128x128xf32>
      %c1_74 = arith.constant 1 : index
      %c0_75 = arith.constant 0 : index
      %c0_76 = arith.constant 0 : index
      %116 = vector.load %arg9[%c1_74, %c0_75, %c0_76] : memref<2x128x1xf32, #tpu.memory_space<vmem>>, vector<1x128x1xf32>
      %117 = vector.shape_cast %116 : vector<1x128x1xf32> to vector<128x1xf32>
      %cst_77 = arith.constant 1.000000e-16 : f32
      %118 = vector.broadcast %cst_77 : f32 to vector<128x1xf32>
      %119 = arith.addf %117, %118 : vector<128x1xf32>
      %120 = tpu.reciprocal %119 {approx = true} : vector<128x1xf32> -> vector<128x1xf32>
      %c1_78 = arith.constant 1 : index
      %c0_79 = arith.constant 0 : index
      %c0_80 = arith.constant 0 : index
      %121 = vector.load %arg10[%c1_78, %c0_79, %c0_80] : memref<2x128x128xf32, #tpu.memory_space<vmem>>, vector<1x128x128xf32>
      %122 = vector.shape_cast %121 : vector<1x128x128xf32> to vector<128x128xf32>
      %123 = vector.broadcast %120 : vector<128x1xf32> to vector<128x128xf32>
      %124 = arith.mulf %122, %123 : vector<128x128xf32>
      %125 = arith.addf %115, %124 : vector<128x128xf32>
      %cst_81 = arith.constant 5.000000e-01 : f32
      %126 = vector.broadcast %cst_81 : f32 to vector<128x128xf32>
      %127 = arith.mulf %125, %126 : vector<128x128xf32>
      %cst_82 = arith.constant 5.000000e-01 : f32
      %128 = vector.broadcast %cst_82 : f32 to vector<128x128xf32>
      %129 = arith.mulf %127, %128 : vector<128x128xf32>
      %cst_83 = arith.constant 1.500000e+00 : f32
      %130 = vector.broadcast %cst_83 : f32 to vector<128x128xf32>
      %131 = arith.mulf %104, %130 : vector<128x128xf32>
      %132 = arith.addf %129, %131 : vector<128x128xf32>
      %c0_84 = arith.constant 0 : index
      %c0_85 = arith.constant 0 : index
      %133 = vector.load %arg7[%c0_84, %c0_85] : memref<128x128xf32, #tpu.memory_space<vmem>>, vector<128x128xf32>
      tpu.vector_store %arg7[%c0_84, %c0_85], %132 {strides = array<i32>} : memref<128x128xf32, #tpu.memory_space<vmem>>, vector<128x128xf32>,
    } else {
    }
    return
  }
  func.func @transform_0(%arg0: i32, %arg1: i32) -> (i32, i32) {
    %c0_i32 = arith.constant 0 : i32
    %c0_i32_0 = arith.constant 0 : i32
    return %arg1, %c0_i32 : i32, i32
  }
  func.func @transform_1(%arg0: i32, %arg1: i32) -> (i32, i32) {
    %c0_i32 = arith.constant 0 : i32
    return %arg0, %arg1 : i32, i32
  }
  func.func @transform_2(%arg0: i32, %arg1: i32) -> (i32, i32) {
    %c0_i32 = arith.constant 0 : i32
    %c0_i32_0 = arith.constant 0 : i32
    return %arg0, %c0_i32 : i32, i32
  }
  func.func @transform_3(%arg0: i32, %arg1: i32) -> (i32, i32) {
    %c0_i32 = arith.constant 0 : i32
    %c0_i32_0 = arith.constant 0 : i32
    return %c0_i32, %arg1 : i32, i32
  }
  func.func @transform_4(%arg0: i32, %arg1: i32) -> (i32, i32) {
    %c0_i32 = arith.constant 0 : i32
    %c0_i32_0 = arith.constant 0 : i32
    return %arg0, %c0_i32 : i32, i32
  }
  func.func @transform_5(%arg0: i32, %arg1: i32) -> (i32, i32) {
    %c0_i32 = arith.constant 0 : i32
    %c0_i32_0 = arith.constant 0 : i32
    return %arg0, %c0_i32 : i32, i32
  }
}

module attributes {stable_mosaic.version = 11 : i64} {
  func.func @_prop_layer_kernel(%arg0: i32, %arg1: i32, %arg2: memref<128x128xbf16, #tpu.memory_space<vmem>>, %arg3: memref<128x128xbf16, #tpu.memory_space<vmem>>, %arg4: memref<128x128xf32, #tpu.memory_space<vmem>>, %arg5: memref<128x128xbf16, #tpu.memory_space<vmem>>, %arg6: memref<128x128xf32, #tpu.memory_space<vmem>>, %arg7: memref<128x128xf32, #tpu.memory_space<vmem>>) attributes {dimension_semantics = [#tpu.dimension_semantics<parallel>, #tpu.dimension_semantics<arbitrary>], iteration_bounds = array<i64: 1, 1>, scalar_prefetch = 0 : i64, scratch_operands = 1 : i64, tpu.core_type = #tpu.core_type<tc>, window_params = [{transform_indices = @transform_0, window_bounds = array<i64: 128, 128>}, {transform_indices = @transform_1, window_bounds = array<i64: 128, 128>}, {transform_indices = @transform_2, window_bounds = array<i64: 128, 128>}, {transform_indices = @transform_3, window_bounds = array<i64: 128, 128>}, {transform_indices = @transform_4, window_bounds = array<i64: 128, 128>}]} {
    %c0_i32 = arith.constant 0 : i32
    %0 = arith.cmpi eq, %arg1, %c0_i32 : i32
    %1 = arith.extui %0 : i1 to i32
    %c0_i32_0 = arith.constant 0 : i32
    %2 = arith.cmpi ne, %1, %c0_i32_0 : i32
    scf.if %2 {
      %cst_10 = arith.constant 0.000000e+00 : f32
      %12 = vector.broadcast %cst_10 : f32 to vector<128x128xf32>
      %c0_11 = arith.constant 0 : index
      %c0_12 = arith.constant 0 : index
      %13 = vector.load %arg7[%c0_11, %c0_12] : memref<128x128xf32, #tpu.memory_space<vmem>>, vector<128x128xf32>
      tpu.vector_store %arg7[%c0_11, %c0_12], %12 {strides = array<i32>} : memref<128x128xf32, #tpu.memory_space<vmem>>, vector<128x128xf32>,
    } else {
    }
    %c0 = arith.constant 0 : index
    %c0_1 = arith.constant 0 : index
    %3 = vector.load %arg7[%c0, %c0_1] : memref<128x128xf32, #tpu.memory_space<vmem>>, vector<128x128xf32>
    %c0_2 = arith.constant 0 : index
    %c0_3 = arith.constant 0 : index
    %4 = vector.load %arg2[%c0_2, %c0_3] : memref<128x128xbf16, #tpu.memory_space<vmem>>, vector<128x128xbf16>
    %c0_4 = arith.constant 0 : index
    %c0_5 = arith.constant 0 : index
    %5 = vector.load %arg3[%c0_4, %c0_5] : memref<128x128xbf16, #tpu.memory_space<vmem>>, vector<128x128xbf16>
    %cst = arith.constant dense<0.000000e+00> : vector<128x128xf32>
    %6 = tpu.matmul %4, %5, %cst {dimension_numbers = #tpu.dot_dimension_numbers<[1], [0], [0], [1], [0, 0, 1, 1], [], []>} : vector<128x128xbf16>, vector<128x128xbf16>, vector<128x128xf32> -> vector<128x128xf32>
    %7 = arith.addf %3, %6 : vector<128x128xf32>
    %c0_6 = arith.constant 0 : index
    %c0_7 = arith.constant 0 : index
    %8 = vector.load %arg7[%c0_6, %c0_7] : memref<128x128xf32, #tpu.memory_space<vmem>>, vector<128x128xf32>
    tpu.vector_store %arg7[%c0_6, %c0_7], %7 {strides = array<i32>} : memref<128x128xf32, #tpu.memory_space<vmem>>, vector<128x128xf32>,
    %c0_i32_8 = arith.constant 0 : i32
    %9 = arith.cmpi eq, %arg1, %c0_i32_8 : i32
    %10 = arith.extui %9 : i1 to i32
    %c0_i32_9 = arith.constant 0 : i32
    %11 = arith.cmpi ne, %10, %c0_i32_9 : i32
    scf.if %11 {
      %c0_10 = arith.constant 0 : index
      %c0_11 = arith.constant 0 : index
      %12 = vector.load %arg7[%c0_10, %c0_11] : memref<128x128xf32, #tpu.memory_space<vmem>>, vector<128x128xf32>
      %cst_12 = arith.constant 5.000000e-01 : f32
      %13 = vector.broadcast %cst_12 : f32 to vector<128x128xf32>
      %14 = arith.mulf %12, %13 : vector<128x128xf32>
      %15 = arith.truncf %14 : vector<128x128xf32> to vector<128x128xbf16>
      %c0_13 = arith.constant 0 : index
      %c0_14 = arith.constant 0 : index
      %16 = vector.load %arg5[%c0_13, %c0_14] : memref<128x128xbf16, #tpu.memory_space<vmem>>, vector<128x128xbf16>
      tpu.vector_store %arg5[%c0_13, %c0_14], %15 {strides = array<i32>} : memref<128x128xbf16, #tpu.memory_space<vmem>>, vector<128x128xbf16>,
      %17 = arith.mulf %14, %14 : vector<128x128xf32>
      %cst_15 = arith.constant dense<0.000000e+00> : vector<128xf32>
      %18 = vector.multi_reduction <add>, %17, %cst_15 [1] : vector<128x128xf32> to vector<128xf32>
      %19 = vector.shape_cast %18 : vector<128xf32> to vector<128x1xf32>
      %cst_16 = arith.constant 1.000000e-24 : f32
      %20 = vector.broadcast %cst_16 : f32 to vector<128x1xf32>
      %21 = arith.maximumf %19, %20 : vector<128x1xf32>
      %22 = math.rsqrt %21 : vector<128x1xf32>
      %c0_17 = arith.constant 0 : index
      %c0_18 = arith.constant 0 : index
      %23 = vector.load %arg4[%c0_17, %c0_18] : memref<128x128xf32, #tpu.memory_space<vmem>>, vector<128x128xf32>
      %24 = vector.broadcast %22 : vector<128x1xf32> to vector<128x128xf32>
      %25 = arith.mulf %14, %24 : vector<128x128xf32>
      %26 = arith.addf %23, %25 : vector<128x128xf32>
      %c0_19 = arith.constant 0 : index
      %c0_20 = arith.constant 0 : index
      %27 = vector.load %arg6[%c0_19, %c0_20] : memref<128x128xf32, #tpu.memory_space<vmem>>, vector<128x128xf32>
      tpu.vector_store %arg6[%c0_19, %c0_20], %26 {strides = array<i32>} : memref<128x128xf32, #tpu.memory_space<vmem>>, vector<128x128xf32>,
    } else {
    }
    return
  }
  func.func @transform_0(%arg0: i32, %arg1: i32) -> (i32, i32) {
    %c0_i32 = arith.constant 0 : i32
    return %arg0, %arg1 : i32, i32
  }
  func.func @transform_1(%arg0: i32, %arg1: i32) -> (i32, i32) {
    %c0_i32 = arith.constant 0 : i32
    %c0_i32_0 = arith.constant 0 : i32
    return %arg1, %c0_i32 : i32, i32
  }
  func.func @transform_2(%arg0: i32, %arg1: i32) -> (i32, i32) {
    %c0_i32 = arith.constant 0 : i32
    %c0_i32_0 = arith.constant 0 : i32
    return %arg0, %c0_i32 : i32, i32
  }
  func.func @transform_3(%arg0: i32, %arg1: i32) -> (i32, i32) {
    %c0_i32 = arith.constant 0 : i32
    %c0_i32_0 = arith.constant 0 : i32
    return %arg0, %c0_i32 : i32, i32
  }
  func.func @transform_4(%arg0: i32, %arg1: i32) -> (i32, i32) {
    %c0_i32 = arith.constant 0 : i32
    %c0_i32_0 = arith.constant 0 : i32
    return %arg0, %c0_i32 : i32, i32
  }
}

module attributes {stable_mosaic.version = 11 : i64} {
  func.func @_prop_layer_kernel(%arg0: i32, %arg1: i32, %arg2: memref<128x128xbf16, #tpu.memory_space<vmem>>, %arg3: memref<128x128xbf16, #tpu.memory_space<vmem>>, %arg4: memref<128x128xf32, #tpu.memory_space<vmem>>, %arg5: memref<128x128xbf16, #tpu.memory_space<vmem>>, %arg6: memref<128x128xf32, #tpu.memory_space<vmem>>, %arg7: memref<128x128xf32, #tpu.memory_space<vmem>>) attributes {dimension_semantics = [#tpu.dimension_semantics<parallel>, #tpu.dimension_semantics<arbitrary>], iteration_bounds = array<i64: 1, 1>, scalar_prefetch = 0 : i64, scratch_operands = 1 : i64, tpu.core_type = #tpu.core_type<tc>, window_params = [{transform_indices = @transform_0, window_bounds = array<i64: 128, 128>}, {transform_indices = @transform_1, window_bounds = array<i64: 128, 128>}, {transform_indices = @transform_2, window_bounds = array<i64: 128, 128>}, {transform_indices = @transform_3, window_bounds = array<i64: 128, 128>}, {transform_indices = @transform_4, window_bounds = array<i64: 128, 128>}]} {
    %c0_i32 = arith.constant 0 : i32
    %0 = arith.cmpi eq, %arg1, %c0_i32 : i32
    %1 = arith.extui %0 : i1 to i32
    %c0_i32_0 = arith.constant 0 : i32
    %2 = arith.cmpi ne, %1, %c0_i32_0 : i32
    scf.if %2 {
      %cst_10 = arith.constant 0.000000e+00 : f32
      %12 = vector.broadcast %cst_10 : f32 to vector<128x128xf32>
      %c0_11 = arith.constant 0 : index
      %c0_12 = arith.constant 0 : index
      %13 = vector.load %arg7[%c0_11, %c0_12] : memref<128x128xf32, #tpu.memory_space<vmem>>, vector<128x128xf32>
      tpu.vector_store %arg7[%c0_11, %c0_12], %12 {strides = array<i32>} : memref<128x128xf32, #tpu.memory_space<vmem>>, vector<128x128xf32>,
    } else {
    }
    %c0 = arith.constant 0 : index
    %c0_1 = arith.constant 0 : index
    %3 = vector.load %arg7[%c0, %c0_1] : memref<128x128xf32, #tpu.memory_space<vmem>>, vector<128x128xf32>
    %c0_2 = arith.constant 0 : index
    %c0_3 = arith.constant 0 : index
    %4 = vector.load %arg2[%c0_2, %c0_3] : memref<128x128xbf16, #tpu.memory_space<vmem>>, vector<128x128xbf16>
    %c0_4 = arith.constant 0 : index
    %c0_5 = arith.constant 0 : index
    %5 = vector.load %arg3[%c0_4, %c0_5] : memref<128x128xbf16, #tpu.memory_space<vmem>>, vector<128x128xbf16>
    %cst = arith.constant dense<0.000000e+00> : vector<128x128xf32>
    %6 = tpu.matmul %4, %5, %cst {dimension_numbers = #tpu.dot_dimension_numbers<[1], [0], [0], [1], [0, 0, 1, 1], [], []>} : vector<128x128xbf16>, vector<128x128xbf16>, vector<128x128xf32> -> vector<128x128xf32>
    %7 = arith.addf %3, %6 : vector<128x128xf32>
    %c0_6 = arith.constant 0 : index
    %c0_7 = arith.constant 0 : index
    %8 = vector.load %arg7[%c0_6, %c0_7] : memref<128x128xf32, #tpu.memory_space<vmem>>, vector<128x128xf32>
    tpu.vector_store %arg7[%c0_6, %c0_7], %7 {strides = array<i32>} : memref<128x128xf32, #tpu.memory_space<vmem>>, vector<128x128xf32>,
    %c0_i32_8 = arith.constant 0 : i32
    %9 = arith.cmpi eq, %arg1, %c0_i32_8 : i32
    %10 = arith.extui %9 : i1 to i32
    %c0_i32_9 = arith.constant 0 : i32
    %11 = arith.cmpi ne, %10, %c0_i32_9 : i32
    scf.if %11 {
      %c0_10 = arith.constant 0 : index
      %c0_11 = arith.constant 0 : index
      %12 = vector.load %arg7[%c0_10, %c0_11] : memref<128x128xf32, #tpu.memory_space<vmem>>, vector<128x128xf32>
      %cst_12 = arith.constant 0.333333343 : f32
      %13 = vector.broadcast %cst_12 : f32 to vector<128x128xf32>
      %14 = arith.mulf %12, %13 : vector<128x128xf32>
      %15 = arith.truncf %14 : vector<128x128xf32> to vector<128x128xbf16>
      %c0_13 = arith.constant 0 : index
      %c0_14 = arith.constant 0 : index
      %16 = vector.load %arg5[%c0_13, %c0_14] : memref<128x128xbf16, #tpu.memory_space<vmem>>, vector<128x128xbf16>
      tpu.vector_store %arg5[%c0_13, %c0_14], %15 {strides = array<i32>} : memref<128x128xbf16, #tpu.memory_space<vmem>>, vector<128x128xbf16>,
      %17 = arith.mulf %14, %14 : vector<128x128xf32>
      %cst_15 = arith.constant dense<0.000000e+00> : vector<128xf32>
      %18 = vector.multi_reduction <add>, %17, %cst_15 [1] : vector<128x128xf32> to vector<128xf32>
      %19 = vector.shape_cast %18 : vector<128xf32> to vector<128x1xf32>
      %cst_16 = arith.constant 1.000000e-24 : f32
      %20 = vector.broadcast %cst_16 : f32 to vector<128x1xf32>
      %21 = arith.maximumf %19, %20 : vector<128x1xf32>
      %22 = math.rsqrt %21 : vector<128x1xf32>
      %c0_17 = arith.constant 0 : index
      %c0_18 = arith.constant 0 : index
      %23 = vector.load %arg4[%c0_17, %c0_18] : memref<128x128xf32, #tpu.memory_space<vmem>>, vector<128x128xf32>
      %24 = vector.broadcast %22 : vector<128x1xf32> to vector<128x128xf32>
      %25 = arith.mulf %14, %24 : vector<128x128xf32>
      %26 = arith.addf %23, %25 : vector<128x128xf32>
      %c0_19 = arith.constant 0 : index
      %c0_20 = arith.constant 0 : index
      %27 = vector.load %arg6[%c0_19, %c0_20] : memref<128x128xf32, #tpu.memory_space<vmem>>, vector<128x128xf32>
      tpu.vector_store %arg6[%c0_19, %c0_20], %26 {strides = array<i32>} : memref<128x128xf32, #tpu.memory_space<vmem>>, vector<128x128xf32>,
    } else {
    }
    return
  }
  func.func @transform_0(%arg0: i32, %arg1: i32) -> (i32, i32) {
    %c0_i32 = arith.constant 0 : i32
    return %arg0, %arg1 : i32, i32
  }
  func.func @transform_1(%arg0: i32, %arg1: i32) -> (i32, i32) {
    %c0_i32 = arith.constant 0 : i32
    %c0_i32_0 = arith.constant 0 : i32
    return %arg1, %c0_i32 : i32, i32
  }
  func.func @transform_2(%arg0: i32, %arg1: i32) -> (i32, i32) {
    %c0_i32 = arith.constant 0 : i32
    %c0_i32_0 = arith.constant 0 : i32
    return %arg0, %c0_i32 : i32, i32
  }
  func.func @transform_3(%arg0: i32, %arg1: i32) -> (i32, i32) {
    %c0_i32 = arith.constant 0 : i32
    %c0_i32_0 = arith.constant 0 : i32
    return %arg0, %c0_i32 : i32, i32
  }
  func.func @transform_4(%arg0: i32, %arg1: i32) -> (i32, i32) {
    %c0_i32 = arith.constant 0 : i32
    %c0_i32_0 = arith.constant 0 : i32
    return %arg0, %c0_i32 : i32, i32
  }
}

module attributes {stable_mosaic.version = 11 : i64} {
  func.func @_mm_blend_kernel(%arg0: i32, %arg1: i32, %arg2: memref<128x128xbf16, #tpu.memory_space<vmem>>, %arg3: memref<128x128xbf16, #tpu.memory_space<vmem>>, %arg4: memref<128x128xf32, #tpu.memory_space<vmem>>, %arg5: memref<128x128xf32, #tpu.memory_space<vmem>>, %arg6: memref<128x128xf32, #tpu.memory_space<vmem>>) attributes {dimension_semantics = [#tpu.dimension_semantics<parallel>, #tpu.dimension_semantics<arbitrary>], iteration_bounds = array<i64: 1, 1>, scalar_prefetch = 0 : i64, scratch_operands = 1 : i64, tpu.core_type = #tpu.core_type<tc>, window_params = [{transform_indices = @transform_0, window_bounds = array<i64: 128, 128>}, {transform_indices = @transform_1, window_bounds = array<i64: 128, 128>}, {transform_indices = @transform_2, window_bounds = array<i64: 128, 128>}, {transform_indices = @transform_3, window_bounds = array<i64: 128, 128>}]} {
    %c0_i32 = arith.constant 0 : i32
    %0 = arith.cmpi eq, %arg1, %c0_i32 : i32
    %1 = arith.extui %0 : i1 to i32
    %c0_i32_0 = arith.constant 0 : i32
    %2 = arith.cmpi ne, %1, %c0_i32_0 : i32
    scf.if %2 {
      %cst_10 = arith.constant 0.000000e+00 : f32
      %12 = vector.broadcast %cst_10 : f32 to vector<128x128xf32>
      %c0_11 = arith.constant 0 : index
      %c0_12 = arith.constant 0 : index
      %13 = vector.load %arg6[%c0_11, %c0_12] : memref<128x128xf32, #tpu.memory_space<vmem>>, vector<128x128xf32>
      tpu.vector_store %arg6[%c0_11, %c0_12], %12 {strides = array<i32>} : memref<128x128xf32, #tpu.memory_space<vmem>>, vector<128x128xf32>,
    } else {
    }
    %c0 = arith.constant 0 : index
    %c0_1 = arith.constant 0 : index
    %3 = vector.load %arg6[%c0, %c0_1] : memref<128x128xf32, #tpu.memory_space<vmem>>, vector<128x128xf32>
    %c0_2 = arith.constant 0 : index
    %c0_3 = arith.constant 0 : index
    %4 = vector.load %arg2[%c0_2, %c0_3] : memref<128x128xbf16, #tpu.memory_space<vmem>>, vector<128x128xbf16>
    %c0_4 = arith.constant 0 : index
    %c0_5 = arith.constant 0 : index
    %5 = vector.load %arg3[%c0_4, %c0_5] : memref<128x128xbf16, #tpu.memory_space<vmem>>, vector<128x128xbf16>
    %cst = arith.constant dense<0.000000e+00> : vector<128x128xf32>
    %6 = tpu.matmul %4, %5, %cst {dimension_numbers = #tpu.dot_dimension_numbers<[1], [0], [0], [1], [0, 0, 1, 1], [], []>} : vector<128x128xbf16>, vector<128x128xbf16>, vector<128x128xf32> -> vector<128x128xf32>
    %7 = arith.addf %3, %6 : vector<128x128xf32>
    %c0_6 = arith.constant 0 : index
    %c0_7 = arith.constant 0 : index
    %8 = vector.load %arg6[%c0_6, %c0_7] : memref<128x128xf32, #tpu.memory_space<vmem>>, vector<128x128xf32>
    tpu.vector_store %arg6[%c0_6, %c0_7], %7 {strides = array<i32>} : memref<128x128xf32, #tpu.memory_space<vmem>>, vector<128x128xf32>,
    %c0_i32_8 = arith.constant 0 : i32
    %9 = arith.cmpi eq, %arg1, %c0_i32_8 : i32
    %10 = arith.extui %9 : i1 to i32
    %c0_i32_9 = arith.constant 0 : i32
    %11 = arith.cmpi ne, %10, %c0_i32_9 : i32
    scf.if %11 {
      %c0_10 = arith.constant 0 : index
      %c0_11 = arith.constant 0 : index
      %12 = vector.load %arg6[%c0_10, %c0_11] : memref<128x128xf32, #tpu.memory_space<vmem>>, vector<128x128xf32>
      %cst_12 = arith.constant 5.000000e-01 : f32
      %13 = vector.broadcast %cst_12 : f32 to vector<128x128xf32>
      %14 = arith.mulf %12, %13 : vector<128x128xf32>
      %c0_13 = arith.constant 0 : index
      %c0_14 = arith.constant 0 : index
      %15 = vector.load %arg4[%c0_13, %c0_14] : memref<128x128xf32, #tpu.memory_space<vmem>>, vector<128x128xf32>
      %cst_15 = arith.constant 5.000000e-01 : f32
      %16 = vector.broadcast %cst_15 : f32 to vector<128x128xf32>
      %17 = arith.mulf %15, %16 : vector<128x128xf32>
      %18 = arith.addf %14, %17 : vector<128x128xf32>
      %c0_16 = arith.constant 0 : index
      %c0_17 = arith.constant 0 : index
      %19 = vector.load %arg5[%c0_16, %c0_17] : memref<128x128xf32, #tpu.memory_space<vmem>>, vector<128x128xf32>
      tpu.vector_store %arg5[%c0_16, %c0_17], %18 {strides = array<i32>} : memref<128x128xf32, #tpu.memory_space<vmem>>, vector<128x128xf32>,
    } else {
    }
    return
  }
  func.func @transform_0(%arg0: i32, %arg1: i32) -> (i32, i32) {
    %c0_i32 = arith.constant 0 : i32
    return %arg0, %arg1 : i32, i32
  }
  func.func @transform_1(%arg0: i32, %arg1: i32) -> (i32, i32) {
    %c0_i32 = arith.constant 0 : i32
    %c0_i32_0 = arith.constant 0 : i32
    return %arg1, %c0_i32 : i32, i32
  }
  func.func @transform_2(%arg0: i32, %arg1: i32) -> (i32, i32) {
    %c0_i32 = arith.constant 0 : i32
    %c0_i32_0 = arith.constant 0 : i32
    return %arg0, %c0_i32 : i32, i32
  }
  func.func @transform_3(%arg0: i32, %arg1: i32) -> (i32, i32) {
    %c0_i32 = arith.constant 0 : i32
    %c0_i32_0 = arith.constant 0 : i32
    return %arg0, %c0_i32 : i32, i32
  }
}

module attributes {stable_mosaic.version = 11 : i64} {
  func.func @_closs_kernel(%arg0: i32, %arg1: i32, %arg2: memref<8x128xf32, #tpu.memory_space<vmem>>, %arg3: memref<8x128xf32, #tpu.memory_space<vmem>>, %arg4: memref<8x128xf32, #tpu.memory_space<vmem>>, %arg5: memref<8x1xf32, #tpu.memory_space<vmem>>, %arg6: memref<8x128xf32, #tpu.memory_space<vmem>>, %arg7: memref<8x1xf32, #tpu.memory_space<vmem>>) attributes {dimension_semantics = [#tpu.dimension_semantics<parallel>, #tpu.dimension_semantics<arbitrary>], iteration_bounds = array<i64: 1, 1>, scalar_prefetch = 0 : i64, scratch_operands = 2 : i64, tpu.core_type = #tpu.core_type<tc>, window_params = [{transform_indices = @transform_0, window_bounds = array<i64: 8, 128>}, {transform_indices = @transform_1, window_bounds = array<i64: 8, 128>}, {transform_indices = @transform_2, window_bounds = array<i64: 8, 128>}, {transform_indices = @transform_3, window_bounds = array<i64: 8, 1>}]} {
    %c0_i32 = arith.constant 0 : i32
    %0 = arith.cmpi eq, %arg1, %c0_i32 : i32
    %1 = arith.extui %0 : i1 to i32
    %c0_i32_0 = arith.constant 0 : i32
    %2 = arith.cmpi ne, %1, %c0_i32_0 : i32
    scf.if %2 {
      %c0_14 = arith.constant 0 : index
      %c0_15 = arith.constant 0 : index
      %35 = vector.load %arg2[%c0_14, %c0_15] : memref<8x128xf32, #tpu.memory_space<vmem>>, vector<8x128xf32>
      %36 = arith.mulf %35, %35 : vector<8x128xf32>
      %cst_16 = arith.constant dense<0.000000e+00> : vector<8xf32>
      %37 = vector.multi_reduction <add>, %36, %cst_16 [1] : vector<8x128xf32> to vector<8xf32>
      %38 = vector.shape_cast %37 : vector<8xf32> to vector<8x1xf32>
      %cst_17 = arith.constant 1.000000e-24 : f32
      %39 = vector.broadcast %cst_17 : f32 to vector<8x1xf32>
      %40 = arith.maximumf %38, %39 : vector<8x1xf32>
      %41 = math.rsqrt %40 : vector<8x1xf32>
      %42 = vector.broadcast %41 : vector<8x1xf32> to vector<8x128xf32>
      %43 = arith.mulf %35, %42 : vector<8x128xf32>
      %c0_18 = arith.constant 0 : index
      %c0_19 = arith.constant 0 : index
      %44 = vector.load %arg6[%c0_18, %c0_19] : memref<8x128xf32, #tpu.memory_space<vmem>>, vector<8x128xf32>
      tpu.vector_store %arg6[%c0_18, %c0_19], %43 {strides = array<i32>} : memref<8x128xf32, #tpu.memory_space<vmem>>, vector<8x128xf32>,
      %cst_20 = arith.constant 0.000000e+00 : f32
      %45 = vector.broadcast %cst_20 : f32 to vector<8x1xf32>
      %c0_21 = arith.constant 0 : index
      %c0_22 = arith.constant 0 : index
      %46 = vector.load %arg7[%c0_21, %c0_22] : memref<8x1xf32, #tpu.memory_space<vmem>>, vector<8x1xf32>
      tpu.vector_store %arg7[%c0_21, %c0_22], %45 {strides = array<i32>} : memref<8x1xf32, #tpu.memory_space<vmem>>, vector<8x1xf32>,
    } else {
    }
    %c0 = arith.constant 0 : index
    %c0_1 = arith.constant 0 : index
    %3 = vector.load %arg4[%c0, %c0_1] : memref<8x128xf32, #tpu.memory_space<vmem>>, vector<8x128xf32>
    %4 = arith.mulf %3, %3 : vector<8x128xf32>
    %cst = arith.constant dense<0.000000e+00> : vector<8xf32>
    %5 = vector.multi_reduction <add>, %4, %cst [1] : vector<8x128xf32> to vector<8xf32>
    %6 = vector.shape_cast %5 : vector<8xf32> to vector<8x1xf32>
    %cst_2 = arith.constant 1.000000e-24 : f32
    %7 = vector.broadcast %cst_2 : f32 to vector<8x1xf32>
    %8 = arith.maximumf %6, %7 : vector<8x1xf32>
    %9 = math.rsqrt %8 : vector<8x1xf32>
    %10 = vector.broadcast %9 : vector<8x1xf32> to vector<8x128xf32>
    %11 = arith.mulf %3, %10 : vector<8x128xf32>
    %c0_3 = arith.constant 0 : index
    %c0_4 = arith.constant 0 : index
    %12 = vector.load %arg6[%c0_3, %c0_4] : memref<8x128xf32, #tpu.memory_space<vmem>>, vector<8x128xf32>
    %cst_5 = arith.constant dense<0.000000e+00> : vector<8x8xf32>
    %13 = tpu.matmul %12, %11, %cst_5 {dimension_numbers = #tpu.dot_dimension_numbers<[1], [1], [0], [0], [0, 0, 1, 0], [], []>} : vector<8x128xf32>, vector<8x128xf32>, vector<8x8xf32> -> vector<8x8xf32>
    %cst_6 = arith.constant 4.000000e+00 : f32
    %14 = vector.broadcast %cst_6 : f32 to vector<8x8xf32>
    %15 = arith.mulf %13, %14 : vector<8x8xf32>
    %16 = math.exp %15 : vector<8x8xf32>
    %17 = tpu.iota {dimensions = array<i32: 1>} : vector<1x8xi32>
    %c8_i32 = arith.constant 8 : i32
    %18 = arith.muli %arg1, %c8_i32 : i32
    %19 = vector.broadcast %18 : i32 to vector<1x8xi32>
    %20 = arith.addi %17, %19 : vector<1x8xi32>
    %c4_i32 = arith.constant 4 : i32
    %21 = vector.broadcast %c4_i32 : i32 to vector<1x8xi32>
    %22 = arith.cmpi slt, %20, %21 : vector<1x8xi32>
    %23 = arith.extui %22 : vector<1x8xi1> to vector<1x8xi32>
    %24 = arith.sitofp %23 : vector<1x8xi32> to vector<1x8xf32>
    %c0_7 = arith.constant 0 : index
    %c0_8 = arith.constant 0 : index
    %25 = vector.load %arg7[%c0_7, %c0_8] : memref<8x1xf32, #tpu.memory_space<vmem>>, vector<8x1xf32>
    %26 = vector.broadcast %24 : vector<1x8xf32> to vector<8x8xf32>
    %27 = arith.mulf %16, %26 : vector<8x8xf32>
    %cst_9 = arith.constant dense<0.000000e+00> : vector<8xf32>
    %28 = vector.multi_reduction <add>, %27, %cst_9 [1] : vector<8x8xf32> to vector<8xf32>
    %29 = vector.shape_cast %28 : vector<8xf32> to vector<8x1xf32>
    %30 = arith.addf %25, %29 : vector<8x1xf32>
    %c0_10 = arith.constant 0 : index
    %c0_11 = arith.constant 0 : index
    %31 = vector.load %arg7[%c0_10, %c0_11] : memref<8x1xf32, #tpu.memory_space<vmem>>, vector<8x1xf32>
    tpu.vector_store %arg7[%c0_10, %c0_11], %30 {strides = array<i32>} : memref<8x1xf32, #tpu.memory_space<vmem>>, vector<8x1xf32>,
    %c0_i32_12 = arith.constant 0 : i32
    %32 = arith.cmpi eq, %arg1, %c0_i32_12 : i32
    %33 = arith.extui %32 : i1 to i32
    %c0_i32_13 = arith.constant 0 : i32
    %34 = arith.cmpi ne, %33, %c0_i32_13 : i32
    scf.if %34 {
      %c0_14 = arith.constant 0 : index
      %c0_15 = arith.constant 0 : index
      %35 = vector.load %arg3[%c0_14, %c0_15] : memref<8x128xf32, #tpu.memory_space<vmem>>, vector<8x128xf32>
      %36 = arith.mulf %35, %35 : vector<8x128xf32>
      %cst_16 = arith.constant dense<0.000000e+00> : vector<8xf32>
      %37 = vector.multi_reduction <add>, %36, %cst_16 [1] : vector<8x128xf32> to vector<8xf32>
      %38 = vector.shape_cast %37 : vector<8xf32> to vector<8x1xf32>
      %cst_17 = arith.constant 1.000000e-24 : f32
      %39 = vector.broadcast %cst_17 : f32 to vector<8x1xf32>
      %40 = arith.maximumf %38, %39 : vector<8x1xf32>
      %41 = math.rsqrt %40 : vector<8x1xf32>
      %42 = vector.broadcast %41 : vector<8x1xf32> to vector<8x128xf32>
      %43 = arith.mulf %35, %42 : vector<8x128xf32>
      %c0_18 = arith.constant 0 : index
      %c0_19 = arith.constant 0 : index
      %44 = vector.load %arg6[%c0_18, %c0_19] : memref<8x128xf32, #tpu.memory_space<vmem>>, vector<8x128xf32>
      %45 = arith.mulf %44, %43 : vector<8x128xf32>
      %cst_20 = arith.constant dense<0.000000e+00> : vector<8xf32>
      %46 = vector.multi_reduction <add>, %45, %cst_20 [1] : vector<8x128xf32> to vector<8xf32>
      %47 = vector.shape_cast %46 : vector<8xf32> to vector<8x1xf32>
      %cst_21 = arith.constant 4.000000e+00 : f32
      %48 = vector.broadcast %cst_21 : f32 to vector<8x1xf32>
      %49 = arith.mulf %47, %48 : vector<8x1xf32>
      %c0_22 = arith.constant 0 : index
      %c0_23 = arith.constant 0 : index
      %50 = vector.load %arg7[%c0_22, %c0_23] : memref<8x1xf32, #tpu.memory_space<vmem>>, vector<8x1xf32>
      %51 = math.log %50 : vector<8x1xf32>
      %52 = arith.subf %51, %49 : vector<8x1xf32>
      %c0_24 = arith.constant 0 : index
      %c0_25 = arith.constant 0 : index
      %53 = vector.load %arg5[%c0_24, %c0_25] : memref<8x1xf32, #tpu.memory_space<vmem>>, vector<8x1xf32>
      tpu.vector_store %arg5[%c0_24, %c0_25], %52 {strides = array<i32>} : memref<8x1xf32, #tpu.memory_space<vmem>>, vector<8x1xf32>,
    } else {
    }
    return
  }
  func.func @transform_0(%arg0: i32, %arg1: i32) -> (i32, i32) {
    %c0_i32 = arith.constant 0 : i32
    %c0_i32_0 = arith.constant 0 : i32
    return %arg0, %c0_i32 : i32, i32
  }
  func.func @transform_1(%arg0: i32, %arg1: i32) -> (i32, i32) {
    %c0_i32 = arith.constant 0 : i32
    %c0_i32_0 = arith.constant 0 : i32
    return %arg0, %c0_i32 : i32, i32
  }
  func.func @transform_2(%arg0: i32, %arg1: i32) -> (i32, i32) {
    %c0_i32 = arith.constant 0 : i32
    %c0_i32_0 = arith.constant 0 : i32
    return %arg1, %c0_i32 : i32, i32
  }
  func.func @transform_3(%arg0: i32, %arg1: i32) -> (i32, i32) {
    %c0_i32 = arith.constant 0 : i32
    %c0_i32_0 = arith.constant 0 : i32
    return %arg0, %c0_i32 : i32, i32
  }
}

module attributes {stable_mosaic.version = 11 : i64} {
  func.func @_bpr_kernel(%arg0: memref<4x128xf32, #tpu.memory_space<vmem>>, %arg1: memref<4x128xf32, #tpu.memory_space<vmem>>, %arg2: memref<4x128xf32, #tpu.memory_space<vmem>>, %arg3: memref<4x128xf32, #tpu.memory_space<vmem>>, %arg4: memref<4x256xf32, #tpu.memory_space<vmem>>, %arg5: memref<4x256xf32, #tpu.memory_space<vmem>>, %arg6: memref<1x1xf32, #tpu.memory_space<vmem>>) attributes {dimension_semantics = [], scalar_prefetch = 0 : i64, scratch_operands = 0 : i64, tpu.core_type = #tpu.core_type<tc>} {
    %c0 = arith.constant 0 : index
    %c0_0 = arith.constant 0 : index
    %0 = vector.load %arg0[%c0, %c0_0] : memref<4x128xf32, #tpu.memory_space<vmem>>, vector<4x128xf32>
    %c0_1 = arith.constant 0 : index
    %c0_2 = arith.constant 0 : index
    %1 = vector.load %arg1[%c0_1, %c0_2] : memref<4x128xf32, #tpu.memory_space<vmem>>, vector<4x128xf32>
    %c0_3 = arith.constant 0 : index
    %c0_4 = arith.constant 0 : index
    %2 = vector.load %arg2[%c0_3, %c0_4] : memref<4x128xf32, #tpu.memory_space<vmem>>, vector<4x128xf32>
    %3 = arith.mulf %0, %2 : vector<4x128xf32>
    %cst = arith.constant dense<0.000000e+00> : vector<4xf32>
    %4 = vector.multi_reduction <add>, %3, %cst [1] : vector<4x128xf32> to vector<4xf32>
    %5 = vector.shape_cast %4 : vector<4xf32> to vector<4x1xf32>
    %c0_5 = arith.constant 0 : index
    %c0_6 = arith.constant 0 : index
    %6 = vector.load %arg3[%c0_5, %c0_6] : memref<4x128xf32, #tpu.memory_space<vmem>>, vector<4x128xf32>
    %7 = arith.mulf %1, %6 : vector<4x128xf32>
    %cst_7 = arith.constant dense<0.000000e+00> : vector<4xf32>
    %8 = vector.multi_reduction <add>, %7, %cst_7 [1] : vector<4x128xf32> to vector<4xf32>
    %9 = vector.shape_cast %8 : vector<4xf32> to vector<4x1xf32>
    %10 = arith.addf %5, %9 : vector<4x1xf32>
    %cst_8 = arith.constant 0.000000e+00 : f32
    %11 = vector.broadcast %cst_8 : f32 to vector<1x1xf32>
    %c0_9 = arith.constant 0 : index
    %c0_10 = arith.constant 0 : index
    %12 = vector.load %arg4[%c0_9, %c0_10] : memref<4x256xf32, #tpu.memory_space<vmem>>, vector<4x128xf32>
    %13 = arith.mulf %0, %12 : vector<4x128xf32>
    %cst_11 = arith.constant dense<0.000000e+00> : vector<4xf32>
    %14 = vector.multi_reduction <add>, %13, %cst_11 [1] : vector<4x128xf32> to vector<4xf32>
    %15 = vector.shape_cast %14 : vector<4xf32> to vector<4x1xf32>
    %c0_12 = arith.constant 0 : index
    %c0_13 = arith.constant 0 : index
    %16 = vector.load %arg5[%c0_12, %c0_13] : memref<4x256xf32, #tpu.memory_space<vmem>>, vector<4x128xf32>
    %17 = arith.mulf %1, %16 : vector<4x128xf32>
    %cst_14 = arith.constant dense<0.000000e+00> : vector<4xf32>
    %18 = vector.multi_reduction <add>, %17, %cst_14 [1] : vector<4x128xf32> to vector<4xf32>
    %19 = vector.shape_cast %18 : vector<4xf32> to vector<4x1xf32>
    %20 = arith.addf %15, %19 : vector<4x1xf32>
    %21 = arith.subf %20, %10 : vector<4x1xf32>
    %cst_15 = arith.constant 0.000000e+00 : f32
    %22 = vector.broadcast %cst_15 : f32 to vector<4x1xf32>
    %23 = arith.maximumf %21, %22 : vector<4x1xf32>
    %24 = math.absf %21 : vector<4x1xf32>
    %cst_16 = arith.constant 0.000000e+00 : f32
    %25 = vector.broadcast %cst_16 : f32 to vector<4x1xf32>
    %26 = arith.subf %25, %24 : vector<4x1xf32>
    %27 = math.exp %26 : vector<4x1xf32>
    %cst_17 = arith.constant 1.000000e+00 : f32
    %28 = vector.broadcast %cst_17 : f32 to vector<4x1xf32>
    %29 = arith.addf %28, %27 : vector<4x1xf32>
    %30 = math.log %29 : vector<4x1xf32>
    %31 = arith.addf %23, %30 : vector<4x1xf32>
    %cst_18 = arith.constant dense<0.000000e+00> : vector<1xf32>
    %32 = vector.multi_reduction <add>, %31, %cst_18 [0] : vector<4x1xf32> to vector<1xf32>
    %33 = vector.shape_cast %32 : vector<1xf32> to vector<1x1xf32>
    %34 = arith.addf %11, %33 : vector<1x1xf32>
    %c0_19 = arith.constant 0 : index
    %c128 = arith.constant 128 : index
    %35 = vector.load %arg4[%c0_19, %c128] : memref<4x256xf32, #tpu.memory_space<vmem>>, vector<4x128xf32>
    %36 = arith.mulf %0, %35 : vector<4x128xf32>
    %cst_20 = arith.constant dense<0.000000e+00> : vector<4xf32>
    %37 = vector.multi_reduction <add>, %36, %cst_20 [1] : vector<4x128xf32> to vector<4xf32>
    %38 = vector.shape_cast %37 : vector<4xf32> to vector<4x1xf32>
    %c0_21 = arith.constant 0 : index
    %c128_22 = arith.constant 128 : index
    %39 = vector.load %arg5[%c0_21, %c128_22] : memref<4x256xf32, #tpu.memory_space<vmem>>, vector<4x128xf32>
    %40 = arith.mulf %1, %39 : vector<4x128xf32>
    %cst_23 = arith.constant dense<0.000000e+00> : vector<4xf32>
    %41 = vector.multi_reduction <add>, %40, %cst_23 [1] : vector<4x128xf32> to vector<4xf32>
    %42 = vector.shape_cast %41 : vector<4xf32> to vector<4x1xf32>
    %43 = arith.addf %38, %42 : vector<4x1xf32>
    %44 = arith.subf %43, %10 : vector<4x1xf32>
    %cst_24 = arith.constant 0.000000e+00 : f32
    %45 = vector.broadcast %cst_24 : f32 to vector<4x1xf32>
    %46 = arith.maximumf %44, %45 : vector<4x1xf32>
    %47 = math.absf %44 : vector<4x1xf32>
    %cst_25 = arith.constant 0.000000e+00 : f32
    %48 = vector.broadcast %cst_25 : f32 to vector<4x1xf32>
    %49 = arith.subf %48, %47 : vector<4x1xf32>
    %50 = math.exp %49 : vector<4x1xf32>
    %cst_26 = arith.constant 1.000000e+00 : f32
    %51 = vector.broadcast %cst_26 : f32 to vector<4x1xf32>
    %52 = arith.addf %51, %50 : vector<4x1xf32>
    %53 = math.log %52 : vector<4x1xf32>
    %54 = arith.addf %46, %53 : vector<4x1xf32>
    %cst_27 = arith.constant dense<0.000000e+00> : vector<1xf32>
    %55 = vector.multi_reduction <add>, %54, %cst_27 [0] : vector<4x1xf32> to vector<1xf32>
    %56 = vector.shape_cast %55 : vector<1xf32> to vector<1x1xf32>
    %57 = arith.addf %34, %56 : vector<1x1xf32>
    %cst_28 = arith.constant 1.250000e-01 : f32
    %58 = vector.broadcast %cst_28 : f32 to vector<1x1xf32>
    %59 = arith.mulf %57, %58 : vector<1x1xf32>
    %c0_29 = arith.constant 0 : index
    %c0_30 = arith.constant 0 : index
    %60 = vector.load %arg6[%c0_29, %c0_30] : memref<1x1xf32, #tpu.memory_space<vmem>>, vector<1x1xf32>
    tpu.vector_store %arg6[%c0_29, %c0_30], %59 {strides = array<i32>} : memref<1x1xf32, #tpu.memory_space<vmem>>, vector<1x1xf32>,
    return
  }
}

</mosaic_0001>

<bundles_post_ra>
// kernel: bunca_forward.17
= control target key start
LH: loop header
LB: loop body
LE: loop exit
PB: predicated region body
PF: predicated region fallthrough
CT: control target
= control target key end

     0   :  { %v561_v1 = vmov 0   ;;  %s753_s1 = inlined_call_operand.vmem [shape: bf16[128,256], index: 1, kind: input, shape index: {}]   ;;  %s754_s0 = inlined_call_operand.vmem [shape: bf16[128,128], index: 0, kind: input, shape index: {}]   ;;  %s755_s2 = inlined_call_operand.vmem [shape: f32[128,256], index: 2, kind: output, shape index: {}]  }
   0x1   :  { %v529_v0 = vld [vmem:[%s753_s1 + $0x74] ss:$8 sps:$4 sm:$0xff]   ;;  %272 = vmatprep.mubr.bf16.mxu0 %v561_v1  ;;  %312 = vmatprep.mubr.bf16.mxu1 %v561_v1  ;;  %v531_v2 = vld [vmem:[%s753_s1 + $0x70] ss:$8 sps:$4 sm:$0xff]   ;;  %v532_v3 = vld [vmem:[%s753_s1 + $0x64] ss:$8 sps:$4 sm:$0xff]  }
   0x2   :  { %240 = vmatprep.subr.bf16.mxu0 %v529_v0  ;;  %512 = vmatprep.subr.bf16.mxu1 %v529_v0  ;;  %v534_v4 = vld [vmem:[%s753_s1 + $0x60] ss:$8 sps:$4 sm:$0xff]   ;;  %v535_v5 = vld [vmem:[%s753_s1 + $0x54] ss:$8 sps:$4 sm:$0xff]   ;;  %v537_v6 = vld [vmem:[%s753_s1 + $0x50] ss:$8 sps:$4 sm:$0xff]  }
   0x3   :  { %241 = vmatpush1.bf16.msra.mxu0 %v531_v2  ;;  %520 = vmatpush1.bf16.msra.mxu1 %v531_v2  ;;  %v538_v7 = vld [vmem:[%s753_s1 + $0x44] ss:$8 sps:$4 sm:$0xff]   ;;  %v540_v8 = vld [vmem:[%s753_s1 + $0x40] ss:$8 sps:$4 sm:$0xff]   ;;  %v541_v9 = vld [vmem:[%s753_s1 + $0x34] ss:$8 sps:$4 sm:$0xff]  }
   0x4   :  { %242 = vmatprep.subr.bf16.mxu0 %v532_v3  ;;  %513 = vmatprep.subr.bf16.mxu1 %v532_v3  ;;  %v543_v10 = vld [vmem:[%s753_s1 + $0x30] ss:$8 sps:$4 sm:$0xff]   ;;  %v544_v11 = vld [vmem:[%s753_s1 + $0x24] ss:$8 sps:$4 sm:$0xff]   ;;  %v546_v12 = vld [vmem:[%s753_s1 + $0x20] ss:$8 sps:$4 sm:$0xff]  }
   0x5   :  { %v547_v13 = vld [vmem:[%s753_s1 + $0x14] ss:$8 sps:$4 sm:$0xff]   ;;  %v549_v14 = vld [vmem:[%s753_s1 + $0x10] ss:$8 sps:$4 sm:$0xff]   ;;  %v550_v15 = vld [vmem:[%s753_s1 + $0x4] ss:$8 sps:$4 sm:$0xff]  }
   0x6   :  { %v552_v16 = vld [vmem:[%s753_s1] ss:$8 sps:$4 sm:$0xff]   ;;  %v557_v21 = vld [vmem:[%s754_s0 + $0x10] sm:$0xff]   ;;  %v559_v23 = vld [vmem:[%s754_s0 + $0x18] sm:$0xff]  }
   0x7   :  { %243 = vmatpush1.bf16.msra.mxu0 %v534_v4  ;;  %521 = vmatpush1.bf16.msra.mxu1 %v534_v4  ;;  %v553_v17 = vld [vmem:[%s754_s0] sm:$0xff]   ;;  %v555_v19 = vld [vmem:[%s754_s0 + $0x8] sm:$0xff]   ;;  %v558_v22 = vld [vmem:[%s754_s0 + $0x30] sm:$0xff]  }
   0x8   :  { %244 = vmatprep.subr.bf16.mxu0 %v535_v5  ;;  %514 = vmatprep.subr.bf16.mxu1 %v535_v5  ;;  %v554_v18 = vld [vmem:[%s754_s0 + $0x20] sm:$0xff]   ;;  %v556_v20 = vld [vmem:[%s754_s0 + $0x28] sm:$0xff]   ;;  %v560_v24 = vld [vmem:[%s754_s0 + $0x38] sm:$0xff]  }
   0xb   :  { %245 = vmatpush1.bf16.msra.mxu0 %v537_v6  ;;  %522 = vmatpush1.bf16.msra.mxu1 %v537_v6 }
   0xc   :  { %246 = vmatprep.subr.bf16.mxu0 %v538_v7  ;;  %515 = vmatprep.subr.bf16.mxu1 %v538_v7 }
   0xf   :  { %247 = vmatpush1.bf16.msra.mxu0 %v540_v8  ;;  %523 = vmatpush1.bf16.msra.mxu1 %v540_v8 }
  0x10   :  { %248 = vmatprep.subr.bf16.mxu0 %v541_v9  ;;  %516 = vmatprep.subr.bf16.mxu1 %v541_v9 }
  0x13   :  { %249 = vmatpush1.bf16.msra.mxu0 %v543_v10  ;;  %524 = vmatpush1.bf16.msra.mxu1 %v543_v10 }
  0x14   :  { %250 = vmatprep.subr.bf16.mxu0 %v544_v11  ;;  %517 = vmatprep.subr.bf16.mxu1 %v544_v11 }
  0x17   :  { %251 = vmatpush1.bf16.msra.mxu0 %v546_v12  ;;  %525 = vmatpush1.bf16.msra.mxu1 %v546_v12 }
  0x18   :  { %252 = vmatprep.subr.bf16.mxu0 %v547_v13  ;;  %518 = vmatprep.subr.bf16.mxu1 %v547_v13 }
  0x1b   :  { %253 = vmatpush1.bf16.msra.mxu0 %v549_v14  ;;  %526 = vmatpush1.bf16.msra.mxu1 %v549_v14 }
  0x1c   :  { %254 = vmatprep.subr.bf16.mxu0 %v550_v15  ;;  %519 = vmatprep.subr.bf16.mxu1 %v550_v15 }
  0x1f   :  { %255 = vmatpush1.bf16.msra.mxu0 %v552_v16  ;;  %527 = vmatpush1.bf16.msra.mxu1 %v552_v16 }
  0x22   :  { %273 = vmatmul.mubr.bf16.vlgmr.msra.gmra.mxu0 %v553_v17  ;;  %313 = vmatmul.mubr.bf16.vlgmr.msra.gmra.mxu1 %v554_v18 }
  0x23   :  { %282 = vmatprep.mubr.bf16.mxu0 %v561_v1  ;;  %322 = vmatprep.mubr.bf16.mxu1 %v561_v1 }
  0x2a   :  { %283 = vmatmul.mubr.bf16.gmra.mxu0 %v555_v19  ;;  %323 = vmatmul.mubr.bf16.gmra.mxu1 %v556_v20 }
  0x2b   :  { %292 = vmatprep.mubr.bf16.mxu0 %v561_v1  ;;  %332 = vmatprep.mubr.bf16.mxu1 %v561_v1 }
  0x32   :  { %293 = vmatmul.mubr.bf16.gmra.mxu0 %v557_v21  ;;  %333 = vmatmul.mubr.bf16.gmra.mxu1 %v558_v22 }
  0x33   :  { %302 = vmatprep.mubr.bf16.mxu0 %v561_v1  ;;  %342 = vmatprep.mubr.bf16.mxu1 %v561_v1 }
  0x3a   :  { %303 = vmatmul.mubr.bf16.gmra.mxu0 %v559_v23  ;;  %343 = vmatmul.mubr.bf16.gmra.mxu1 %v560_v24 }
  0xe2   :  { %v274_v25 = vpop.f32.mrf.mxu0  ;;  %v314_v26 = vpop.f32.mrf.mxu1 }
  0xe3   :  { %452 = vst [vmem:[%s755_s2] sm:$0xff] %v274_v25  ;;  %468 = vst [vmem:[%s755_s2 + $0x80] sm:$0xff] %v314_v26 }
  0xe4   :  { %v276_v27 = vpop.f32.mrf.mxu0  ;;  %v316_v28 = vpop.f32.mrf.mxu1 }
  0xe5   :  { %453 = vst [vmem:[%s755_s2 + $0x8] sm:$0xff] %v276_v27  ;;  %469 = vst [vmem:[%s755_s2 + $0x88] sm:$0xff] %v316_v28 }
  0xe6   :  { %v278_v29 = vpop.f32.mrf.mxu0  ;;  %v318_v30 = vpop.f32.mrf.mxu1 }
  0xe7   :  { %454 = vst [vmem:[%s755_s2 + $0x10] sm:$0xff] %v278_v29  ;;  %470 = vst [vmem:[%s755_s2 + $0x90] sm:$0xff] %v318_v30 }
  0xe8   :  { %v280_v31 = vpop.f32.mrf.mxu0  ;;  %v320_v32 = vpop.f32.mrf.mxu1 }
  0xe9   :  { %455 = vst [vmem:[%s755_s2 + $0x18] sm:$0xff] %v280_v31  ;;  %471 = vst [vmem:[%s755_s2 + $0x98] sm:$0xff] %v320_v32 }
  0xea   :  { %v284_v33 = vpop.f32.mrf.mxu0  ;;  %v324_v34 = vpop.f32.mrf.mxu1 }
  0xeb   :  { %456 = vst [vmem:[%s755_s2 + $0x20] sm:$0xff] %v284_v33  ;;  %472 = vst [vmem:[%s755_s2 + $0xa0] sm:$0xff] %v324_v34 }
  0xec   :  { %v286_v35 = vpop.f32.mrf.mxu0  ;;  %v326_v36 = vpop.f32.mrf.mxu1 }
  0xed   :  { %457 = vst [vmem:[%s755_s2 + $0x28] sm:$0xff] %v286_v35  ;;  %473 = vst [vmem:[%s755_s2 + $0xa8] sm:$0xff] %v326_v36 }
  0xee   :  { %v288_v37 = vpop.f32.mrf.mxu0  ;;  %v328_v38 = vpop.f32.mrf.mxu1 }
  0xef   :  { %458 = vst [vmem:[%s755_s2 + $0x30] sm:$0xff] %v288_v37  ;;  %474 = vst [vmem:[%s755_s2 + $0xb0] sm:$0xff] %v328_v38 }
  0xf0   :  { %v290_v39 = vpop.f32.mrf.mxu0  ;;  %v330_v40 = vpop.f32.mrf.mxu1 }
  0xf1   :  { %459 = vst [vmem:[%s755_s2 + $0x38] sm:$0xff] %v290_v39  ;;  %475 = vst [vmem:[%s755_s2 + $0xb8] sm:$0xff] %v330_v40 }
  0xf2   :  { %v294_v41 = vpop.f32.mrf.mxu0  ;;  %v334_v42 = vpop.f32.mrf.mxu1 }
  0xf3   :  { %460 = vst [vmem:[%s755_s2 + $0x40] sm:$0xff] %v294_v41  ;;  %476 = vst [vmem:[%s755_s2 + $0xc0] sm:$0xff] %v334_v42 }
  0xf4   :  { %v296_v43 = vpop.f32.mrf.mxu0  ;;  %v336_v44 = vpop.f32.mrf.mxu1 }
  0xf5   :  { %461 = vst [vmem:[%s755_s2 + $0x48] sm:$0xff] %v296_v43  ;;  %477 = vst [vmem:[%s755_s2 + $0xc8] sm:$0xff] %v336_v44 }
  0xf6   :  { %v298_v45 = vpop.f32.mrf.mxu0  ;;  %v338_v46 = vpop.f32.mrf.mxu1 }
  0xf7   :  { %462 = vst [vmem:[%s755_s2 + $0x50] sm:$0xff] %v298_v45  ;;  %478 = vst [vmem:[%s755_s2 + $0xd0] sm:$0xff] %v338_v46 }
  0xf8   :  { %v300_v47 = vpop.f32.mrf.mxu0  ;;  %v340_v48 = vpop.f32.mrf.mxu1 }
  0xf9   :  { %463 = vst [vmem:[%s755_s2 + $0x58] sm:$0xff] %v300_v47  ;;  %479 = vst [vmem:[%s755_s2 + $0xd8] sm:$0xff] %v340_v48 }
  0xfa   :  { %v304_v49 = vpop.f32.mrf.mxu0  ;;  %v344_v50 = vpop.f32.mrf.mxu1 }
  0xfb   :  { %464 = vst [vmem:[%s755_s2 + $0x60] sm:$0xff] %v304_v49  ;;  %480 = vst [vmem:[%s755_s2 + $0xe0] sm:$0xff] %v344_v50 }
  0xfc   :  { %v306_v51 = vpop.f32.mrf.mxu0  ;;  %v346_v52 = vpop.f32.mrf.mxu1 }
  0xfd   :  { %465 = vst [vmem:[%s755_s2 + $0x68] sm:$0xff] %v306_v51  ;;  %481 = vst [vmem:[%s755_s2 + $0xe8] sm:$0xff] %v346_v52 }
  0xfe   :  { %v308_v53 = vpop.f32.mrf.mxu0  ;;  %v348_v54 = vpop.f32.mrf.mxu1 }
  0xff   :  { %466 = vst [vmem:[%s755_s2 + $0x70] sm:$0xff] %v308_v53  ;;  %482 = vst [vmem:[%s755_s2 + $0xf0] sm:$0xff] %v348_v54 }
 0x100   :  { %v310_v55 = vpop.f32.mrf.mxu0  ;;  %v350_v56 = vpop.f32.mrf.mxu1 }
 0x101   :  { %467 = vst [vmem:[%s755_s2 + $0x78] sm:$0xff] %v310_v55  ;;  %483 = vst [vmem:[%s755_s2 + $0xf8] sm:$0xff] %v350_v56 }

// kernel: bunca_forward.19
= control target key start
LH: loop header
LB: loop body
LE: loop exit
PB: predicated region body
PF: predicated region fallthrough
CT: control target
= control target key end

     0   :  { %s1073_s1 = inlined_call_operand.vmem [shape: bf16[128,128], index: 1, kind: input, shape index: {}]   ;;  %s1074_s0 = inlined_call_operand.vmem [shape: bf16[128,128], index: 0, kind: input, shape index: {}]   ;;  %s1075_s3 = inlined_call_operand.vmem [shape: bf16[128,128], index: 3, kind: output, shape index: {0}]   ;;  %s1076_s2 = inlined_call_operand.vmem [shape: f32[128,128], index: 2, kind: input, shape index: {}, may-alias: {2,4}]   ;;  %s1077_s4 = inlined_call_operand.vmem [shape: f32[128,128], index: 4, kind: output, shape index: {1}, may-alias: {2,4}]  }
   0x1   :  { %v736_v0 = vld [vmem:[%s1073_s1 + $0x38] sm:$0xff]   ;;  %v737_v1 = vld [vmem:[%s1073_s1 + $0x30] sm:$0xff]   ;;  %v738_v2 = vld [vmem:[%s1073_s1 + $0x28] sm:$0xff]  }
   0x2   :  { %688 = vmatprep.subr.bf16.mxu0 %v736_v0  ;;  %720 = vmatprep.subr.bf16.mxu1 %v736_v0  ;;  %v739_v3 = vld [vmem:[%s1073_s1 + $0x20] sm:$0xff]   ;;  %v740_v6 = vld [vmem:[%s1073_s1 + $0x18] sm:$0xff]   ;;  %v741_v7 = vld [vmem:[%s1073_s1 + $0x10] sm:$0xff]  }
   0x3   :  { %689 = vmatpush3.bf16.msra.mxu0 %v736_v0  ;;  %728 = vmatpush3.bf16.msra.mxu1 %v736_v0  ;;  %v744_v4 = vld [vmem:[%s1074_s0] sm:$0xff]   ;;  %v742_v8 = vld [vmem:[%s1073_s1 + $0x8] sm:$0xff]   ;;  %v748_v12 = vld [vmem:[%s1074_s0 + $0x10] sm:$0xff]  }
   0x4   :  { %690 = vmatprep.subr.bf16.mxu0 %v737_v1  ;;  %721 = vmatprep.subr.bf16.mxu1 %v737_v1  ;;  %v745_v5 = vld [vmem:[%s1074_s0 + $0x20] sm:$0xff]   ;;  %v746_v10 = vld [vmem:[%s1074_s0 + $0x8] sm:$0xff]   ;;  %v750_v13 = vld [vmem:[%s1074_s0 + $0x30] sm:$0xff]  }
   0x5   :  { %704 = vmatprep.mubr.bf16.mxu0 %v744_v4  ;;  %712 = vmatprep.mubr.bf16.mxu1 %v745_v5  ;;  %v743_v9 = vld [vmem:[%s1073_s1] sm:$0xff]   ;;  %v747_v11 = vld [vmem:[%s1074_s0 + $0x28] sm:$0xff]   ;;  %v749_v14 = vld [vmem:[%s1074_s0 + $0x18] sm:$0xff]  }
   0x6   :  { %v751_v15 = vld [vmem:[%s1074_s0 + $0x38] sm:$0xff]  }
   0x7   :  { %691 = vmatpush3.bf16.msra.mxu0 %v737_v1  ;;  %729 = vmatpush3.bf16.msra.mxu1 %v737_v1 }
   0x8   :  { %692 = vmatprep.subr.bf16.mxu0 %v738_v2  ;;  %722 = vmatprep.subr.bf16.mxu1 %v738_v2 }
   0xb   :  { %693 = vmatpush3.bf16.msra.mxu0 %v738_v2  ;;  %730 = vmatpush3.bf16.msra.mxu1 %v738_v2 }
   0xc   :  { %694 = vmatprep.subr.bf16.mxu0 %v739_v3  ;;  %723 = vmatprep.subr.bf16.mxu1 %v739_v3 }
   0xf   :  { %695 = vmatpush3.bf16.msra.mxu0 %v739_v3  ;;  %731 = vmatpush3.bf16.msra.mxu1 %v739_v3 }
  0x10   :  { %696 = vmatprep.subr.bf16.mxu0 %v740_v6  ;;  %724 = vmatprep.subr.bf16.mxu1 %v740_v6 }
  0x13   :  { %697 = vmatpush3.bf16.msra.mxu0 %v740_v6  ;;  %732 = vmatpush3.bf16.msra.mxu1 %v740_v6 }
  0x14   :  { %698 = vmatprep.subr.bf16.mxu0 %v741_v7  ;;  %725 = vmatprep.subr.bf16.mxu1 %v741_v7 }
  0x17   :  { %699 = vmatpush3.bf16.msra.mxu0 %v741_v7  ;;  %733 = vmatpush3.bf16.msra.mxu1 %v741_v7 }
  0x18   :  { %700 = vmatprep.subr.bf16.mxu0 %v742_v8  ;;  %726 = vmatprep.subr.bf16.mxu1 %v742_v8 }
  0x1b   :  { %701 = vmatpush3.bf16.msra.mxu0 %v742_v8  ;;  %734 = vmatpush3.bf16.msra.mxu1 %v742_v8 }
  0x1c   :  { %702 = vmatprep.subr.bf16.mxu0 %v743_v9  ;;  %727 = vmatprep.subr.bf16.mxu1 %v743_v9 }
  0x1f   :  { %703 = vmatpush3.bf16.msra.mxu0 %v743_v9  ;;  %735 = vmatpush3.bf16.msra.mxu1 %v743_v9 }
  0x22   :  { %705 = vmatmul.mubr.bf16.vlgmr.msra.gmra.mxu0 %v746_v10  ;;  %713 = vmatmul.mubr.bf16.vlgmr.msra.gmra.mxu1 %v747_v11 }
  0x23   :  { %708 = vmatprep.mubr.bf16.mxu0 %v748_v12  ;;  %716 = vmatprep.mubr.bf16.mxu1 %v750_v13 }
  0x2a   :  { %709 = vmatmul.mubr.bf16.gmra.mxu0 %v749_v14  ;;  %717 = vmatmul.mubr.bf16.gmra.mxu1 %v751_v15 }
  0xe2   :  { %v706_v16 = vpop.f32.mrf.mxu0  ;;  %v714_v17 = vpop.f32.mrf.mxu1 }
  0xe3   :  { %v857_v18 = vmul.f32 0.5, %v706_v16  ;;  %v859_v19 = vmul.f32 0.5, %v714_v17 }
  0xe4   :  { %v215_v20 = vpop.f32.mrf.mxu0  ;;  %v247_v21 = vpop.f32.mrf.mxu1 }
  0xe5   :  { %v861_v22 = vmul.f32 0.5, %v215_v20  ;;  %v435_v23 = vmul.f32 %v859_v19, %v859_v19  ;;  %v427_v24 = vmul.f32 %v857_v18, %v857_v18  ;;  %v871_v29 = vmul.f32 0.5, %v247_v21 }
  0xe6   :  { %v707_v25 = vpop.f32.mrf.mxu0  ;;  %v715_v26 = vpop.f32.mrf.mxu1 }
  0xe7   :  { %v867_v27 = vmul.f32 0.5, %v707_v25  ;;  %v869_v28 = vmul.f32 0.5, %v715_v26  ;;  %461 = vadd.xlane.f32.xlu0 %v435_v23  ;;  %445 = vadd.xlane.f32.xlu1 %v427_v24  ;;  %v425_v32 = vmul.f32 %v861_v22, %v861_v22  ;;  %v433_v46 = vmul.f32 %v871_v29, %v871_v29 }
  0xe8   :  { %v218_v30 = vpop.f32.mrf.mxu0  ;;  %v250_v31 = vpop.f32.mrf.mxu1 }
  0xe9   :  { %v633_v33 = vpack.c.bf16 %v867_v27, %v857_v18  ;;  %v653_v34 = vpack.c.bf16 %v869_v28, %v859_v19  ;;  %v879_v35 = vmul.f32 0.5, %v218_v30  ;;  %v881_v36 = vmul.f32 0.5, %v250_v31  ;;  %v515_v31 = vld [vmem:[%s1076_s2 + $0x50] sm:$0xff] }
  0xea   :  { %v710_v37 = vpop.f32.mrf.mxu0  ;;  %v428_v38 = vmul.f32 %v867_v27, %v867_v27  ;;  %v718_v39 = vpop.f32.mrf.mxu1  ;;  %v436_v48 = vmul.f32 %v869_v28, %v869_v28 }
  0xeb   :  { %665 = vst [vmem:[%s1075_s3 + $0x8] sm:$0xff] %v633_v33   ;;  %669 = vst [vmem:[%s1075_s3 + $0x28] sm:$0xff] %v653_v34   ;;  %v628_v40 = vpack.c.bf16 %v879_v35, %v861_v22  ;;  %v648_v41 = vpack.c.bf16 %v881_v36, %v871_v29  ;;  %441 = vadd.xlane.f32.xlu0 %v425_v32  ;;  %v901_v44 = vmul.f32 0.5, %v710_v37  ;;  %v903_v45 = vmul.f32 0.5, %v718_v39  ;;  %v507_v37 = vld [vmem:[%s1076_s2 + $0x10] sm:$0xff] }
  0xec   :  { %447 = vadd.xlane.f32.xlu1 %v428_v38  ;;  %v231_v42 = vpop.f32.mrf.mxu0  ;;  %v263_v43 = vpop.f32.mrf.mxu1  ;;  %v426_v55 = vmul.f32 %v879_v35, %v879_v35  ;;  %v434_v61 = vmul.f32 %v881_v36, %v881_v36 }
  0xed   :  { %629 = vst [vmem:[%s1075_s3] sm:$0xff] %v628_v40   ;;  %668 = vst [vmem:[%s1075_s3 + $0x20] sm:$0xff] %v648_v41   ;;  %v911_v51 = vmul.f32 0.5, %v263_v43  ;;  %v915_v53 = vmul.f32 0.5, %v231_v42  ;;  %v431_v0 = vmul.f32 %v901_v44, %v901_v44  ;;  %v439_v6 = vmul.f32 %v903_v45, %v903_v45 }
  0xee   :  { %v711_v47 = vpop.f32.mrf.mxu0  ;;  %v719_v49 = vpop.f32.mrf.mxu1 }
  0xef   :  { %v909_v50 = vmul.f32 0.5, %v711_v47  ;;  %457 = vadd.xlane.f32.xlu0 %v433_v46  ;;  %v913_v52 = vmul.f32 0.5, %v719_v49  ;;  %v429_v2 = vmul.f32 %v915_v53, %v915_v53  ;;  %v437_v4 = vmul.f32 %v911_v51, %v911_v51  ;;  %v505_v47 = vld [vmem:[%s1076_s2] sm:$0xff] }
  0xf0   :  { %463 = vadd.xlane.f32.xlu1 %v436_v48  ;;  %v234_v54 = vpop.f32.mrf.mxu0  ;;  %v266_v56 = vpop.f32.mrf.mxu1 }
  0xf1   :  { %v643_v57 = vpack.c.bf16 %v909_v50, %v901_v44  ;;  %v921_v58 = vmul.f32 0.5, %v234_v54  ;;  %v663_v59 = vpack.c.bf16 %v913_v52, %v903_v45  ;;  %v925_v60 = vmul.f32 0.5, %v266_v56 }
  0xf2   :  { %v432_v1 = vmul.f32 %v909_v50, %v909_v50  ;;  %v440_v7 = vmul.f32 %v913_v52, %v913_v52 }
  0xf3   :  { %667 = vst [vmem:[%s1075_s3 + $0x18] sm:$0xff] %v643_v57   ;;  %v638_v62 = vpack.c.bf16 %v921_v58, %v915_v53  ;;  %671 = vst [vmem:[%s1075_s3 + $0x38] sm:$0xff] %v663_v59   ;;  %443 = vadd.xlane.f32.xlu0 %v426_v55  ;;  %v658_v63 = vpack.c.bf16 %v925_v60, %v911_v51  ;;  %v430_v3 = vmul.f32 %v921_v58, %v921_v58 }
  0xf4   :  { %459 = vadd.xlane.f32.xlu1 %v434_v61  ;;  %v438_v5 = vmul.f32 %v925_v60, %v925_v60 }
  0xf5   :  { %666 = vst [vmem:[%s1075_s3 + $0x10] sm:$0xff] %v638_v62   ;;  %670 = vst [vmem:[%s1075_s3 + $0x30] sm:$0xff] %v658_v63  }
  0xf7   :  { %453 = vadd.xlane.f32.xlu0 %v431_v0 }
  0xf8   :  { %455 = vadd.xlane.f32.xlu1 %v432_v1 }
  0xfb   :  { %449 = vadd.xlane.f32.xlu0 %v429_v2 }
  0xfc   :  { %451 = vadd.xlane.f32.xlu1 %v430_v3 }
  0xff   :  { %465 = vadd.xlane.f32.xlu0 %v437_v4 }
 0x100   :  { %467 = vadd.xlane.f32.xlu1 %v438_v5 }
 0x103   :  { %469 = vadd.xlane.f32.xlu0 %v439_v6 }
 0x104   :  { %471 = vadd.xlane.f32.xlu1 %v440_v7 }
 0x170   :  { %v462_v8 = vpop.xlane.xlu0 %461  ;;  %v446_v9 = vpop.xlane.xlu1 %445 }
 0x171   :  { %v483_v10 = vmax.f32 %v462_v8, 1e-24  ;;  %v475_v11 = vmax.f32 %v446_v9, 1e-24 }
 0x173   :  { %752 = vrsqrt.f32 %v483_v10 }
 0x174   :  { %754 = vrsqrt.f32 %v475_v11  ;;  %v442_v12 = vpop.xlane.xlu0 %441 }
 0x175   :  { %v473_v13 = vmax.f32 %v442_v12, 1e-24  ;;  %v448_v14 = vpop.xlane.xlu1 %447 }
 0x176   :  { %v476_v15 = vmax.f32 %v448_v14, 1e-24 }
 0x177   :  { %756 = vrsqrt.f32 %v473_v13 }
 0x178   :  { %758 = vrsqrt.f32 %v476_v15  ;;  %v458_v16 = vpop.xlane.xlu0 %457 }
 0x179   :  { %v481_v17 = vmax.f32 %v458_v16, 1e-24  ;;  %v464_v20 = vpop.xlane.xlu1 %463 }
 0x17a   :  { %v484_v21 = vmax.f32 %v464_v20, 1e-24 }
 0x17b   :  { %760 = vrsqrt.f32 %v481_v17 }
 0x17c   :  { %762 = vrsqrt.f32 %v484_v21  ;;  %v444_v23 = vpop.xlane.xlu0 %443 }
 0x17d   :  { %v460_v24 = vpop.xlane.xlu1 %459  ;;  %v474_v25 = vmax.f32 %v444_v23, 1e-24 }
 0x17e   :  { %v482_v26 = vmax.f32 %v460_v24, 1e-24 }
 0x17f   :  { %764 = vrsqrt.f32 %v474_v25 }
 0x180   :  { %v753_v30 = vpop.eup %752  ;;  %766 = vrsqrt.f32 %v482_v26  ;;  %v454_v32 = vpop.xlane.xlu0 %453 }
 0x181   :  { %v755_v33 = vpop.eup %754  ;;  %v531_v34 = vmul.f32 %v753_v30, %v859_v19  ;;  %v479_v38 = vmax.f32 %v454_v32, 1e-24  ;;  %v456_v39 = vpop.xlane.xlu1 %455 }
 0x182   :  { %v523_v40 = vmul.f32 %v755_v33, %v857_v18  ;;  %v480_v41 = vmax.f32 %v456_v39, 1e-24 }
 0x183   :  { %v547_v42 = vadd.f32 %v531_v34, %v515_v31  ;;  %768 = vrsqrt.f32 %v479_v38 }
 0x184   :  { %v757_v43 = vpop.eup %756  ;;  %v539_v46 = vadd.f32 %v523_v40, %v507_v37  ;;  %770 = vrsqrt.f32 %v480_v41  ;;  %v450_v48 = vpop.xlane.xlu0 %449 }
 0x185   :  { %v759_v19 = vpop.eup %758  ;;  %563 = vst [vmem:[%s1077_s4 + $0x50] sm:$0xff] %v547_v42  ;;  %v521_v49 = vmul.f32 %v757_v43, %v861_v22  ;;  %v477_v54 = vmax.f32 %v450_v48, 1e-24  ;;  %v452_v55 = vpop.xlane.xlu1 %451 }
 0x186   :  { %v524_v56 = vmul.f32 %v759_v19, %v867_v27  ;;  %v478_v57 = vmax.f32 %v452_v55, 1e-24 }
 0x187   :  { %v537_v59 = vadd.f32 %v521_v49, %v505_v47  ;;  %772 = vrsqrt.f32 %v477_v54 }
 0x188   :  { %v761_v61 = vpop.eup %760  ;;  %774 = vrsqrt.f32 %v478_v57  ;;  %v466_v63 = vpop.xlane.xlu0 %465 }
 0x189   :  { %v763_v0 = vpop.eup %762  ;;  %v529_v1 = vmul.f32 %v761_v61, %v871_v29  ;;  %v485_v2 = vmax.f32 %v466_v63, 1e-24  ;;  %v468_v3 = vpop.xlane.xlu1 %467 }
 0x18a   :  { %v532_v4 = vmul.f32 %v763_v0, %v869_v28  ;;  %v486_v5 = vmax.f32 %v468_v3, 1e-24 }
 0x18b   :  { %776 = vrsqrt.f32 %v485_v2 }
 0x18c   :  { %v508_v18 = vld [vmem:[%s1076_s2 + $0x18] sm:$0xff]  ;;  %v765_v7 = vpop.eup %764  ;;  %778 = vrsqrt.f32 %v486_v5  ;;  %v470_v9 = vpop.xlane.xlu0 %469 }
 0x18d   :  { %555 = vst [vmem:[%s1077_s4 + $0x10] sm:$0xff] %v539_v46  ;;  %v540_v62 = vadd.f32 %v524_v56, %v508_v18  ;;  %v767_v10 = vpop.eup %766  ;;  %v522_v11 = vmul.f32 %v765_v7, %v879_v35  ;;  %v487_v12 = vmax.f32 %v470_v9, 1e-24  ;;  %v472_v13 = vpop.xlane.xlu1 %471 }
 0x18e   :  { %v530_v14 = vmul.f32 %v767_v10, %v881_v36  ;;  %v488_v15 = vmax.f32 %v472_v13, 1e-24 }
 0x18f   :  { %780 = vrsqrt.f32 %v487_v12 }
 0x190   :  { %v769_v17 = vpop.eup %768  ;;  %782 = vrsqrt.f32 %v488_v15 }
 0x191   :  { %v771_v23 = vpop.eup %770  ;;  %v527_v35 = vmul.f32 %v769_v17, %v901_v44 }
 0x192   :  { %v528_v24 = vmul.f32 %v771_v23, %v909_v50 }
 0x194   :  { %v513_v22 = vld [vmem:[%s1076_s2 + $0x40] sm:$0xff]  ;;  %v773_v26 = vpop.eup %772 }
 0x195   :  { %553 = vst [vmem:[%s1077_s4] sm:$0xff] %v537_v59  ;;  %v545_v6 = vadd.f32 %v529_v1, %v513_v22  ;;  %v775_v32 = vpop.eup %774  ;;  %v525_v44 = vmul.f32 %v773_v26, %v915_v53 }
 0x196   :  { %v526_v50 = vmul.f32 %v775_v32, %v921_v58 }
 0x198   :  { %v777_v37 = vpop.eup %776 }
 0x199   :  { %v779_v40 = vpop.eup %778  ;;  %v533_v53 = vmul.f32 %v777_v37, %v911_v51 }
 0x19a   :  { %v534_v58 = vmul.f32 %v779_v40, %v925_v60 }
 0x19c   :  { %v516_v27 = vld [vmem:[%s1076_s2 + $0x58] sm:$0xff]  ;;  %v781_v43 = vpop.eup %780 }
 0x19d   :  { %556 = vst [vmem:[%s1077_s4 + $0x18] sm:$0xff] %v540_v62  ;;  %v548_v8 = vadd.f32 %v532_v4, %v516_v27  ;;  %v783_v48 = vpop.eup %782  ;;  %v535_v51 = vmul.f32 %v781_v43, %v903_v45 }
 0x19e   :  { %v536_v60 = vmul.f32 %v783_v48, %v913_v52 }
 0x1a4   :  { %v506_v29 = vld [vmem:[%s1076_s2 + $0x8] sm:$0xff] }
 0x1a5   :  { %561 = vst [vmem:[%s1077_s4 + $0x40] sm:$0xff] %v545_v6  ;;  %v538_v16 = vadd.f32 %v522_v11, %v506_v29 }
 0x1ac   :  { %v514_v28 = vld [vmem:[%s1076_s2 + $0x48] sm:$0xff] }
 0x1ad   :  { %564 = vst [vmem:[%s1077_s4 + $0x58] sm:$0xff] %v548_v8  ;;  %v546_v20 = vadd.f32 %v530_v14, %v514_v28 }
 0x1b4   :  { %v511_v21 = vld [vmem:[%s1076_s2 + $0x30] sm:$0xff] }
 0x1b5   :  { %554 = vst [vmem:[%s1077_s4 + $0x8] sm:$0xff] %v538_v16  ;;  %v543_v25 = vadd.f32 %v527_v35, %v511_v21 }
 0x1bc   :  { %v512_v36 = vld [vmem:[%s1076_s2 + $0x38] sm:$0xff] }
 0x1bd   :  { %562 = vst [vmem:[%s1077_s4 + $0x48] sm:$0xff] %v546_v20  ;;  %v544_v30 = vadd.f32 %v528_v24, %v512_v36 }
 0x1c4   :  { %v509_v31 = vld [vmem:[%s1076_s2 + $0x20] sm:$0xff] }
 0x1c5   :  { %559 = vst [vmem:[%s1077_s4 + $0x30] sm:$0xff] %v543_v25  ;;  %v541_v34 = vadd.f32 %v525_v44, %v509_v31 }
 0x1cc   :  { %v510_v33 = vld [vmem:[%s1076_s2 + $0x28] sm:$0xff] }
 0x1cd   :  { %560 = vst [vmem:[%s1077_s4 + $0x38] sm:$0xff] %v544_v30  ;;  %v542_v38 = vadd.f32 %v526_v50, %v510_v33 }
 0x1d4   :  { %v517_v39 = vld [vmem:[%s1076_s2 + $0x60] sm:$0xff] }
 0x1d5   :  { %557 = vst [vmem:[%s1077_s4 + $0x20] sm:$0xff] %v541_v34  ;;  %v549_v42 = vadd.f32 %v533_v53, %v517_v39 }
 0x1dc   :  { %v518_v41 = vld [vmem:[%s1076_s2 + $0x68] sm:$0xff] }
 0x1dd   :  { %558 = vst [vmem:[%s1077_s4 + $0x28] sm:$0xff] %v542_v38  ;;  %v550_v46 = vadd.f32 %v534_v58, %v518_v41 }
 0x1e4   :  { %v519_v47 = vld [vmem:[%s1076_s2 + $0x70] sm:$0xff] }
 0x1e5   :  { %565 = vst [vmem:[%s1077_s4 + $0x60] sm:$0xff] %v549_v42  ;;  %v551_v49 = vadd.f32 %v535_v51, %v519_v47 }
 0x1ec   :  { %v520_v19 = vld [vmem:[%s1076_s2 + $0x78] sm:$0xff] }
 0x1ed   :  { %566 = vst [vmem:[%s1077_s4 + $0x68] sm:$0xff] %v550_v46  ;;  %v552_v18 = vadd.f32 %v536_v60, %v520_v19  ;;  %567 = vst [vmem:[%s1077_s4 + $0x70] sm:$0xff] %v551_v49 }
 0x1ef   :  { %568 = vst [vmem:[%s1077_s4 + $0x78] sm:$0xff] %v552_v18 }

// kernel: bunca_forward.25
= control target key start
LH: loop header
LB: loop body
LE: loop exit
PB: predicated region body
PF: predicated region fallthrough
CT: control target
= control target key end

     0   :  { %s671_s1 = inlined_call_operand.vmem [shape: bf16[128,128], index: 1, kind: input, shape index: {}]   ;;  %s672_s0 = inlined_call_operand.vmem [shape: bf16[128,128], index: 0, kind: input, shape index: {}]   ;;  %s673_s2 = inlined_call_operand.vmem [shape: f32[128,128], index: 2, kind: input, shape index: {}]   ;;  %s674_s3 = inlined_call_operand.vmem [shape: f32[128,128], index: 3, kind: output, shape index: {}]  }
   0x1   :  { %v491_v0 = vld [vmem:[%s671_s1 + $0x38] sm:$0xff]   ;;  %v492_v1 = vld [vmem:[%s671_s1 + $0x30] sm:$0xff]   ;;  %v493_v2 = vld [vmem:[%s671_s1 + $0x28] sm:$0xff]  }
   0x2   :  { %443 = vmatprep.subr.bf16.mxu0 %v491_v0  ;;  %475 = vmatprep.subr.bf16.mxu1 %v491_v0  ;;  %v494_v3 = vld [vmem:[%s671_s1 + $0x20] sm:$0xff]   ;;  %v495_v6 = vld [vmem:[%s671_s1 + $0x18] sm:$0xff]   ;;  %v496_v7 = vld [vmem:[%s671_s1 + $0x10] sm:$0xff]  }
   0x3   :  { %444 = vmatpush3.bf16.msra.mxu0 %v491_v0  ;;  %483 = vmatpush3.bf16.msra.mxu1 %v491_v0  ;;  %v499_v4 = vld [vmem:[%s672_s0] sm:$0xff]   ;;  %v497_v8 = vld [vmem:[%s671_s1 + $0x8] sm:$0xff]   ;;  %v503_v12 = vld [vmem:[%s672_s0 + $0x10] sm:$0xff]  }
   0x4   :  { %445 = vmatprep.subr.bf16.mxu0 %v492_v1  ;;  %476 = vmatprep.subr.bf16.mxu1 %v492_v1  ;;  %v500_v5 = vld [vmem:[%s672_s0 + $0x20] sm:$0xff]   ;;  %v501_v10 = vld [vmem:[%s672_s0 + $0x8] sm:$0xff]   ;;  %v504_v13 = vld [vmem:[%s672_s0 + $0x30] sm:$0xff]  }
   0x5   :  { %459 = vmatprep.mubr.bf16.mxu0 %v499_v4  ;;  %467 = vmatprep.mubr.bf16.mxu1 %v500_v5  ;;  %v498_v9 = vld [vmem:[%s671_s1] sm:$0xff]   ;;  %v502_v11 = vld [vmem:[%s672_s0 + $0x28] sm:$0xff]   ;;  %v505_v14 = vld [vmem:[%s672_s0 + $0x18] sm:$0xff]  }
   0x6   :  { %v506_v15 = vld [vmem:[%s672_s0 + $0x38] sm:$0xff]   ;;  %v345_v16 = vld [vmem:[%s673_s2 + $0x10] sm:$0xff]  ;;  %v343_v18 = vld [vmem:[%s673_s2] sm:$0xff] }
   0x7   :  { %446 = vmatpush3.bf16.msra.mxu0 %v492_v1  ;;  %484 = vmatpush3.bf16.msra.mxu1 %v492_v1  ;;  %v353_v17 = vld [vmem:[%s673_s2 + $0x50] sm:$0xff]  ;;  %v351_v19 = vld [vmem:[%s673_s2 + $0x40] sm:$0xff]  ;;  %v361_v20 = vmul.f32 0.5, %v345_v16  ;;  %v346_v22 = vld [vmem:[%s673_s2 + $0x18] sm:$0xff]  ;;  %v359_v28 = vmul.f32 0.5, %v343_v18 }
   0x8   :  { %447 = vmatprep.subr.bf16.mxu0 %v493_v2  ;;  %477 = vmatprep.subr.bf16.mxu1 %v493_v2  ;;  %v369_v21 = vmul.f32 0.5, %v353_v17  ;;  %v354_v23 = vld [vmem:[%s673_s2 + $0x58] sm:$0xff]  ;;  %v367_v29 = vmul.f32 0.5, %v351_v19  ;;  %v344_v30 = vld [vmem:[%s673_s2 + $0x8] sm:$0xff]  ;;  %v362_v34 = vmul.f32 0.5, %v346_v22  ;;  %v349_v40 = vld [vmem:[%s673_s2 + $0x30] sm:$0xff] }
   0x9   :  { %v352_v31 = vld [vmem:[%s673_s2 + $0x48] sm:$0xff]  ;;  %v370_v35 = vmul.f32 0.5, %v354_v23  ;;  %v357_v41 = vld [vmem:[%s673_s2 + $0x70] sm:$0xff]  ;;  %v360_v44 = vmul.f32 0.5, %v344_v30  ;;  %v347_v50 = vld [vmem:[%s673_s2 + $0x20] sm:$0xff]  ;;  %v365_v54 = vmul.f32 0.5, %v349_v40 }
   0xa   :  { %v368_v45 = vmul.f32 0.5, %v352_v31  ;;  %v355_v51 = vld [vmem:[%s673_s2 + $0x60] sm:$0xff]  ;;  %v373_v55 = vmul.f32 0.5, %v357_v41  ;;  %v350_v60 = vld [vmem:[%s673_s2 + $0x38] sm:$0xff]  ;;  %v363_v0 = vmul.f32 0.5, %v347_v50 }
   0xb   :  { %448 = vmatpush3.bf16.msra.mxu0 %v493_v2  ;;  %485 = vmatpush3.bf16.msra.mxu1 %v493_v2  ;;  %v358_v61 = vld [vmem:[%s673_s2 + $0x78] sm:$0xff]  ;;  %v371_v1 = vmul.f32 0.5, %v355_v51 }
   0xc   :  { %449 = vmatprep.subr.bf16.mxu0 %v494_v3  ;;  %478 = vmatprep.subr.bf16.mxu1 %v494_v3 }
   0xf   :  { %450 = vmatpush3.bf16.msra.mxu0 %v494_v3  ;;  %486 = vmatpush3.bf16.msra.mxu1 %v494_v3 }
  0x10   :  { %451 = vmatprep.subr.bf16.mxu0 %v495_v6  ;;  %479 = vmatprep.subr.bf16.mxu1 %v495_v6 }
  0x13   :  { %452 = vmatpush3.bf16.msra.mxu0 %v495_v6  ;;  %487 = vmatpush3.bf16.msra.mxu1 %v495_v6  ;;  %v348_v6 = vld [vmem:[%s673_s2 + $0x28] sm:$0xff] }
  0x14   :  { %453 = vmatprep.subr.bf16.mxu0 %v496_v7  ;;  %480 = vmatprep.subr.bf16.mxu1 %v496_v7  ;;  %v364_v18 = vmul.f32 0.5, %v348_v6 }
  0x17   :  { %454 = vmatpush3.bf16.msra.mxu0 %v496_v7  ;;  %488 = vmatpush3.bf16.msra.mxu1 %v496_v7  ;;  %v356_v7 = vld [vmem:[%s673_s2 + $0x68] sm:$0xff] }
  0x18   :  { %455 = vmatprep.subr.bf16.mxu0 %v497_v8  ;;  %481 = vmatprep.subr.bf16.mxu1 %v497_v8  ;;  %v372_v19 = vmul.f32 0.5, %v356_v7 }
  0x1b   :  { %456 = vmatpush3.bf16.msra.mxu0 %v497_v8  ;;  %489 = vmatpush3.bf16.msra.mxu1 %v497_v8 }
  0x1c   :  { %457 = vmatprep.subr.bf16.mxu0 %v498_v9  ;;  %482 = vmatprep.subr.bf16.mxu1 %v498_v9 }
  0x1f   :  { %458 = vmatpush3.bf16.msra.mxu0 %v498_v9  ;;  %490 = vmatpush3.bf16.msra.mxu1 %v498_v9 }
  0x22   :  { %460 = vmatmul.mubr.bf16.vlgmr.msra.gmra.mxu0 %v501_v10  ;;  %468 = vmatmul.mubr.bf16.vlgmr.msra.gmra.mxu1 %v502_v11  ;;  %v366_v10 = vmul.f32 0.5, %v350_v60  ;;  %v374_v11 = vmul.f32 0.5, %v358_v61 }
  0x23   :  { %463 = vmatprep.mubr.bf16.mxu0 %v503_v12  ;;  %471 = vmatprep.mubr.bf16.mxu1 %v504_v13 }
  0x2a   :  { %464 = vmatmul.mubr.bf16.gmra.mxu0 %v505_v14  ;;  %472 = vmatmul.mubr.bf16.gmra.mxu1 %v506_v15 }
  0xe2   :  { %v461_v24 = vpop.f32.mrf.mxu0  ;;  %v469_v25 = vpop.f32.mrf.mxu1 }
  0xe3   :  { %v329_v26 = vmul.f32 0.5, %v461_v24  ;;  %v337_v27 = vmul.f32 0.5, %v469_v25 }
  0xe4   :  { %v213_v32 = vpop.f32.mrf.mxu0  ;;  %v245_v33 = vpop.f32.mrf.mxu1 }
  0xe5   :  { %v377_v36 = vadd.f32 %v361_v20, %v329_v26  ;;  %v385_v37 = vadd.f32 %v369_v21, %v337_v27  ;;  %v327_v38 = vmul.f32 0.5, %v213_v32  ;;  %v335_v39 = vmul.f32 0.5, %v245_v33 }
  0xe6   :  { %v462_v42 = vpop.f32.mrf.mxu0  ;;  %v470_v43 = vpop.f32.mrf.mxu1 }
  0xe7   :  { %393 = vst [vmem:[%s674_s3 + $0x10] sm:$0xff] %v377_v36  ;;  %401 = vst [vmem:[%s674_s3 + $0x50] sm:$0xff] %v385_v37  ;;  %v375_v46 = vadd.f32 %v359_v28, %v327_v38  ;;  %v383_v47 = vadd.f32 %v367_v29, %v335_v39  ;;  %v330_v48 = vmul.f32 0.5, %v462_v42  ;;  %v338_v49 = vmul.f32 0.5, %v470_v43 }
  0xe8   :  { %v216_v52 = vpop.f32.mrf.mxu0  ;;  %v248_v53 = vpop.f32.mrf.mxu1 }
  0xe9   :  { %391 = vst [vmem:[%s674_s3] sm:$0xff] %v375_v46  ;;  %399 = vst [vmem:[%s674_s3 + $0x40] sm:$0xff] %v383_v47  ;;  %v378_v56 = vadd.f32 %v362_v34, %v330_v48  ;;  %v386_v57 = vadd.f32 %v370_v35, %v338_v49  ;;  %v328_v58 = vmul.f32 0.5, %v216_v52  ;;  %v336_v59 = vmul.f32 0.5, %v248_v53 }
  0xea   :  { %v465_v62 = vpop.f32.mrf.mxu0  ;;  %v473_v63 = vpop.f32.mrf.mxu1 }
  0xeb   :  { %394 = vst [vmem:[%s674_s3 + $0x18] sm:$0xff] %v378_v56  ;;  %402 = vst [vmem:[%s674_s3 + $0x58] sm:$0xff] %v386_v57  ;;  %v376_v2 = vadd.f32 %v360_v44, %v328_v58  ;;  %v384_v3 = vadd.f32 %v368_v45, %v336_v59  ;;  %v333_v4 = vmul.f32 0.5, %v465_v62  ;;  %v341_v5 = vmul.f32 0.5, %v473_v63 }
  0xec   :  { %v229_v8 = vpop.f32.mrf.mxu0  ;;  %v261_v9 = vpop.f32.mrf.mxu1 }
  0xed   :  { %392 = vst [vmem:[%s674_s3 + $0x8] sm:$0xff] %v376_v2  ;;  %400 = vst [vmem:[%s674_s3 + $0x48] sm:$0xff] %v384_v3  ;;  %v381_v12 = vadd.f32 %v365_v54, %v333_v4  ;;  %v389_v13 = vadd.f32 %v373_v55, %v341_v5  ;;  %v331_v14 = vmul.f32 0.5, %v229_v8  ;;  %v339_v15 = vmul.f32 0.5, %v261_v9 }
  0xee   :  { %v466_v16 = vpop.f32.mrf.mxu0  ;;  %v474_v17 = vpop.f32.mrf.mxu1 }
  0xef   :  { %397 = vst [vmem:[%s674_s3 + $0x30] sm:$0xff] %v381_v12  ;;  %405 = vst [vmem:[%s674_s3 + $0x70] sm:$0xff] %v389_v13  ;;  %v379_v20 = vadd.f32 %v363_v0, %v331_v14  ;;  %v387_v21 = vadd.f32 %v371_v1, %v339_v15  ;;  %v334_v22 = vmul.f32 0.5, %v466_v16  ;;  %v342_v23 = vmul.f32 0.5, %v474_v17 }
  0xf0   :  { %v232_v24 = vpop.f32.mrf.mxu0  ;;  %v264_v25 = vpop.f32.mrf.mxu1 }
  0xf1   :  { %395 = vst [vmem:[%s674_s3 + $0x20] sm:$0xff] %v379_v20  ;;  %403 = vst [vmem:[%s674_s3 + $0x60] sm:$0xff] %v387_v21  ;;  %v382_v26 = vadd.f32 %v366_v10, %v334_v22  ;;  %v390_v27 = vadd.f32 %v374_v11, %v342_v23  ;;  %v332_v28 = vmul.f32 0.5, %v232_v24  ;;  %v340_v29 = vmul.f32 0.5, %v264_v25 }
  0xf3   :  { %398 = vst [vmem:[%s674_s3 + $0x38] sm:$0xff] %v382_v26  ;;  %406 = vst [vmem:[%s674_s3 + $0x78] sm:$0xff] %v390_v27  ;;  %v380_v30 = vadd.f32 %v364_v18, %v332_v28  ;;  %v388_v31 = vadd.f32 %v372_v19, %v340_v29 }
  0xf5   :  { %396 = vst [vmem:[%s674_s3 + $0x28] sm:$0xff] %v380_v30  ;;  %404 = vst [vmem:[%s674_s3 + $0x68] sm:$0xff] %v388_v31 }

// kernel: bunca_forward.20
= control target key start
LH: loop header
LB: loop body
LE: loop exit
PB: predicated region body
PF: predicated region fallthrough
CT: control target
= control target key end

     0   :  { %s1093_s0 = inlined_call_operand.vmem [shape: bf16[128,128], index: 0, kind: input, shape index: {}]   ;;  %s1094_s1 = inlined_call_operand.vmem [shape: bf16[128,128], index: 1, kind: input, shape index: {}]   ;;  %s1095_s2 = inlined_call_operand.vmem [shape: f32[128,128], index: 2, kind: input, shape index: {}, may-alias: {2,4}]   ;;  %s1096_s3 = inlined_call_operand.hbm [shape: bf16[128,128], index: 3, kind: output, shape index: {0}]   ;;  %s1097_s4 = inlined_call_operand.vmem [shape: f32[128,128], index: 4, kind: output, shape index: {1}, may-alias: {2,4}]  }
   0x1   :  { %v752_v0 = vld [vmem:[%s1094_s1 + $0x38] sm:$0xff]   ;;  %v753_v1 = vld [vmem:[%s1094_s1 + $0x30] sm:$0xff]   ;;  %v754_v2 = vld [vmem:[%s1094_s1 + $0x28] sm:$0xff]  }
   0x2   :  { %701 = vmatprep.subr.bf16.mxu0 %v752_v0  ;;  %733 = vmatprep.subr.bf16.mxu1 %v752_v0  ;;  %v755_v3 = vld [vmem:[%s1094_s1 + $0x20] sm:$0xff]   ;;  %v756_v6 = vld [vmem:[%s1094_s1 + $0x18] sm:$0xff]   ;;  %v757_v7 = vld [vmem:[%s1094_s1 + $0x10] sm:$0xff]  }
   0x3   :  { %702 = vmatpush3.bf16.msra.mxu0 %v752_v0  ;;  %741 = vmatpush3.bf16.msra.mxu1 %v752_v0  ;;  %v760_v4 = vld [vmem:[%s1093_s0] sm:$0xff]  }
   0x4   :  { %703 = vmatprep.subr.bf16.mxu0 %v753_v1  ;;  %734 = vmatprep.subr.bf16.mxu1 %v753_v1  ;;  %v761_v5 = vld [vmem:[%s1093_s0 + $0x20] sm:$0xff]  }
   0x5   :  { %717 = vmatprep.mubr.bf16.mxu0 %v760_v4  ;;  %725 = vmatprep.mubr.bf16.mxu1 %v761_v5 }
   0x7   :  { %704 = vmatpush3.bf16.msra.mxu0 %v753_v1  ;;  %742 = vmatpush3.bf16.msra.mxu1 %v753_v1 }
   0x8   :  { %705 = vmatprep.subr.bf16.mxu0 %v754_v2  ;;  %735 = vmatprep.subr.bf16.mxu1 %v754_v2 }
   0xb   :  { %706 = vmatpush3.bf16.msra.mxu0 %v754_v2  ;;  %743 = vmatpush3.bf16.msra.mxu1 %v754_v2 }
   0xc   :  { %707 = vmatprep.subr.bf16.mxu0 %v755_v3  ;;  %736 = vmatprep.subr.bf16.mxu1 %v755_v3 }
   0xf   :  { %708 = vmatpush3.bf16.msra.mxu0 %v755_v3  ;;  %744 = vmatpush3.bf16.msra.mxu1 %v755_v3 }
  0x10   :  { %709 = vmatprep.subr.bf16.mxu0 %v756_v6  ;;  %737 = vmatprep.subr.bf16.mxu1 %v756_v6 }
  0x11   :  { %10 = vsyncpa [#allocation4], 0  ;;  %v758_v8 = vld [vmem:[%s1094_s1 + $0x8] sm:$0xff]   ;;  %v759_v9 = vld [vmem:[%s1094_s1] sm:$0xff]  }
  0x12   :  { %v762_v10 = vld [vmem:[%s1093_s0 + $0x8] sm:$0xff]   ;;  %v764_v12 = vld [vmem:[%s1093_s0 + $0x10] sm:$0xff]   ;;  %v765_v14 = vld [vmem:[%s1093_s0 + $0x18] sm:$0xff]  }
  0x13   :  { %710 = vmatpush3.bf16.msra.mxu0 %v756_v6  ;;  %745 = vmatpush3.bf16.msra.mxu1 %v756_v6  ;;  %v763_v11 = vld [vmem:[%s1093_s0 + $0x28] sm:$0xff]   ;;  %v766_v13 = vld [vmem:[%s1093_s0 + $0x30] sm:$0xff]   ;;  %v767_v15 = vld [vmem:[%s1093_s0 + $0x38] sm:$0xff]   ;;  %s822_s0 = smov [#allocation3]  }
  0x14   :  { %711 = vmatprep.subr.bf16.mxu0 %v757_v7  ;;  %738 = vmatprep.subr.bf16.mxu1 %v757_v7  ;;  %s575_s20 = sshll.u32 %s822_s0, 4  ;;  %s576_s20 = int_to_ptr.vmem [resolvable:$true] %s575_s20 }
  0x15   :  { %s800_s21 = scalar_lea.vmem %s576_s20, 1024  ;;  %p805_p1 = scmp.lt.s32.totalorder %s576_s20, %s576_s20 }
  0x16   :  { %p801_p0 = scmp.ne.s32.totalorder %s576_s20, %s800_s21  ;;  %p806_p2 = scmp.lt.s32.totalorder %s800_s21, %s800_s21 }
  0x17   :  { %712 = vmatpush3.bf16.msra.mxu0 %v757_v7  ;;  %746 = vmatpush3.bf16.msra.mxu1 %v757_v7 }
  0x18   :  { %713 = vmatprep.subr.bf16.mxu0 %v758_v8  ;;  %739 = vmatprep.subr.bf16.mxu1 %v758_v8  ;;  %p807_p3 = por %p806_p2, %p805_p1 }
  0x1a   :  { %p808_p4 = pnand %p807_p3, %p801_p0 }
  0x1b   :  { %714 = vmatpush3.bf16.msra.mxu0 %v758_v8  ;;  %747 = vmatpush3.bf16.msra.mxu1 %v758_v8 }
  0x1c   :  { %715 = vmatprep.subr.bf16.mxu0 %v759_v9  ;;  %740 = vmatprep.subr.bf16.mxu1 %v759_v9 }
  0x1f   :  { %716 = vmatpush3.bf16.msra.mxu0 %v759_v9  ;;  %748 = vmatpush3.bf16.msra.mxu1 %v759_v9 }
  0x22   :  { %718 = vmatmul.mubr.bf16.vlgmr.msra.gmra.mxu0 %v762_v10  ;;  %726 = vmatmul.mubr.bf16.vlgmr.msra.gmra.mxu1 %v763_v11 }
  0x23   :  { %721 = vmatprep.mubr.bf16.mxu0 %v764_v12  ;;  %729 = vmatprep.mubr.bf16.mxu1 %v766_v13 }
  0x2a   :  { %722 = vmatmul.mubr.bf16.gmra.mxu0 %v765_v14  ;;  %730 = vmatmul.mubr.bf16.gmra.mxu1 %v767_v15 }
  0xe2   :  { %v719_v16 = vpop.f32.mrf.mxu0  ;;  %v727_v17 = vpop.f32.mrf.mxu1 }
  0xe3   :  { %v898_v18 = vmul.f32 0.33333334, %v719_v16  ;;  %v900_v19 = vmul.f32 0.33333334, %v727_v17 }
  0xe4   :  { %v216_v20 = vpop.f32.mrf.mxu0  ;;  %v248_v21 = vpop.f32.mrf.mxu1 }
  0xe5   :  { %v902_v22 = vmul.f32 0.33333334, %v216_v20  ;;  %v436_v23 = vmul.f32 %v900_v19, %v900_v19  ;;  %v428_v24 = vmul.f32 %v898_v18, %v898_v18  ;;  %v912_v29 = vmul.f32 0.33333334, %v248_v21 }
  0xe6   :  { %v720_v25 = vpop.f32.mrf.mxu0  ;;  %v728_v26 = vpop.f32.mrf.mxu1 }
  0xe7   :  { %v908_v27 = vmul.f32 0.33333334, %v720_v25  ;;  %v910_v28 = vmul.f32 0.33333334, %v728_v26  ;;  %462 = vadd.xlane.f32.xlu0 %v436_v23  ;;  %446 = vadd.xlane.f32.xlu1 %v428_v24  ;;  %v426_v32 = vmul.f32 %v902_v22, %v902_v22  ;;  %v434_v46 = vmul.f32 %v912_v29, %v912_v29 }
  0xe8   :  { %v219_v30 = vpop.f32.mrf.mxu0  ;;  %v251_v31 = vpop.f32.mrf.mxu1 }
  0xe9   :  { %v646_v33 = vpack.c.bf16 %v908_v27, %v898_v18  ;;  %v666_v34 = vpack.c.bf16 %v910_v28, %v900_v19  ;;  %v920_v35 = vmul.f32 0.33333334, %v219_v30  ;;  %v922_v36 = vmul.f32 0.33333334, %v251_v31 }
  0xea   :  { %v723_v37 = vpop.f32.mrf.mxu0  ;;  %v429_v38 = vmul.f32 %v908_v27, %v908_v27  ;;  %v731_v39 = vpop.f32.mrf.mxu1  ;;  %v437_v48 = vmul.f32 %v910_v28, %v910_v28 }
  0xeb   :  { %678 = vst [vmem:[#allocation3 + $0x8] sm:$0xff] %v646_v33   ;;  %682 = vst [vmem:[#allocation3 + $0x28] sm:$0xff] %v666_v34   ;;  %v641_v40 = vpack.c.bf16 %v920_v35, %v902_v22  ;;  %v661_v41 = vpack.c.bf16 %v922_v36, %v912_v29  ;;  %442 = vadd.xlane.f32.xlu0 %v426_v32  ;;  %v930_v44 = vmul.f32 0.33333334, %v723_v37  ;;  %v932_v45 = vmul.f32 0.33333334, %v731_v39 }
  0xec   :  { %448 = vadd.xlane.f32.xlu1 %v429_v38  ;;  %v232_v42 = vpop.f32.mrf.mxu0  ;;  %v264_v43 = vpop.f32.mrf.mxu1  ;;  %v427_v55 = vmul.f32 %v920_v35, %v920_v35  ;;  %v435_v61 = vmul.f32 %v922_v36, %v922_v36 }
  0xed   :  { %642 = vst [vmem:[#allocation3] sm:$0xff] %v641_v40   ;;  %681 = vst [vmem:[#allocation3 + $0x20] sm:$0xff] %v661_v41   ;;  %v940_v51 = vmul.f32 0.33333334, %v264_v43  ;;  %v944_v53 = vmul.f32 0.33333334, %v232_v42  ;;  %v432_v0 = vmul.f32 %v930_v44, %v930_v44  ;;  %v440_v6 = vmul.f32 %v932_v45, %v932_v45 }
  0xee   :  { %v724_v47 = vpop.f32.mrf.mxu0  ;;  %v732_v49 = vpop.f32.mrf.mxu1 }
  0xef   :  { %v938_v50 = vmul.f32 0.33333334, %v724_v47  ;;  %458 = vadd.xlane.f32.xlu0 %v434_v46  ;;  %v942_v52 = vmul.f32 0.33333334, %v732_v49  ;;  %v430_v2 = vmul.f32 %v944_v53, %v944_v53  ;;  %v438_v4 = vmul.f32 %v940_v51, %v940_v51 }
  0xf0   :  { %464 = vadd.xlane.f32.xlu1 %v437_v48  ;;  %v235_v54 = vpop.f32.mrf.mxu0  ;;  %v267_v56 = vpop.f32.mrf.mxu1 }
  0xf1   :  { %v656_v57 = vpack.c.bf16 %v938_v50, %v930_v44  ;;  %v950_v58 = vmul.f32 0.33333334, %v235_v54  ;;  %v676_v59 = vpack.c.bf16 %v942_v52, %v932_v45  ;;  %v954_v60 = vmul.f32 0.33333334, %v267_v56 }
  0xf2   :  { %v433_v1 = vmul.f32 %v938_v50, %v938_v50  ;;  %v441_v7 = vmul.f32 %v942_v52, %v942_v52 }
  0xf3   :  { %680 = vst [vmem:[#allocation3 + $0x18] sm:$0xff] %v656_v57   ;;  %v651_v62 = vpack.c.bf16 %v950_v58, %v944_v53  ;;  %684 = vst [vmem:[#allocation3 + $0x38] sm:$0xff] %v676_v59   ;;  %444 = vadd.xlane.f32.xlu0 %v427_v55  ;;  %v671_v63 = vpack.c.bf16 %v954_v60, %v940_v51  ;;  %v431_v3 = vmul.f32 %v950_v58, %v950_v58 }
  0xf4   :  { %460 = vadd.xlane.f32.xlu1 %v435_v61  ;;  %v439_v5 = vmul.f32 %v954_v60, %v954_v60 }
  0xf5   :  { %679 = vst [vmem:[#allocation3 + $0x10] sm:$0xff] %v651_v62   ;;  %683 = vst [vmem:[#allocation3 + $0x30] sm:$0xff] %v671_v63  }
  0xf7   :  { %454 = vadd.xlane.f32.xlu0 %v432_v0 }
  0xf8   :  { %456 = vadd.xlane.f32.xlu1 %v433_v1 }
  0xfb   :  { %450 = vadd.xlane.f32.xlu0 %v430_v2 }
  0xfc   :  { %452 = vadd.xlane.f32.xlu1 %v431_v3 }
  0xff   :  { %466 = vadd.xlane.f32.xlu0 %v438_v4 }
 0x100   :  { %468 = vadd.xlane.f32.xlu1 %v439_v5 }
 0x103   :  { %470 = vadd.xlane.f32.xlu0 %v440_v6 }
 0x104   :  { %472 = vadd.xlane.f32.xlu1 %v441_v7 }
 0x105   :  { %811 = shalt.err (!%p808_p4)
}
 0x106   :  { %s823_s22 = smov 64   ;;  %s824_s23 = smov 4   ;;  %v516_v31 = vld [vmem:[%s1095_s2 + $0x50] sm:$0xff]  ;;  %v506_v47 = vld [vmem:[%s1095_s2] sm:$0xff] }
 0x107   :  { %581 = dma.vmem_to_hbm [thread:$0]  %s576_s20, 1024, %s1096_s3, [#allocation4], %s823_s22, %s823_s22, %s824_s23  }
 0x108   :  { %v508_v37 = vld [vmem:[%s1095_s2 + $0x10] sm:$0xff] }
 0x170   :  { %v463_v8 = vpop.xlane.xlu0 %462  ;;  %v447_v9 = vpop.xlane.xlu1 %446 }
 0x171   :  { %v484_v10 = vmax.f32 %v463_v8, 1e-24  ;;  %v476_v11 = vmax.f32 %v447_v9, 1e-24 }
 0x173   :  { %768 = vrsqrt.f32 %v484_v10 }
 0x174   :  { %770 = vrsqrt.f32 %v476_v11  ;;  %v443_v12 = vpop.xlane.xlu0 %442 }
 0x175   :  { %v474_v13 = vmax.f32 %v443_v12, 1e-24  ;;  %v449_v14 = vpop.xlane.xlu1 %448 }
 0x176   :  { %v477_v15 = vmax.f32 %v449_v14, 1e-24 }
 0x177   :  { %772 = vrsqrt.f32 %v474_v13 }
 0x178   :  { %774 = vrsqrt.f32 %v477_v15  ;;  %v459_v16 = vpop.xlane.xlu0 %458 }
 0x179   :  { %v482_v17 = vmax.f32 %v459_v16, 1e-24  ;;  %v465_v20 = vpop.xlane.xlu1 %464 }
 0x17a   :  { %v485_v21 = vmax.f32 %v465_v20, 1e-24 }
 0x17b   :  { %776 = vrsqrt.f32 %v482_v17 }
 0x17c   :  { %778 = vrsqrt.f32 %v485_v21  ;;  %v445_v23 = vpop.xlane.xlu0 %444 }
 0x17d   :  { %v461_v24 = vpop.xlane.xlu1 %460  ;;  %v475_v25 = vmax.f32 %v445_v23, 1e-24 }
 0x17e   :  { %v483_v26 = vmax.f32 %v461_v24, 1e-24 }
 0x17f   :  { %780 = vrsqrt.f32 %v475_v25 }
 0x180   :  { %v769_v30 = vpop.eup %768  ;;  %782 = vrsqrt.f32 %v483_v26  ;;  %v455_v32 = vpop.xlane.xlu0 %454 }
 0x181   :  { %v771_v33 = vpop.eup %770  ;;  %v532_v34 = vmul.f32 %v769_v30, %v900_v19  ;;  %v480_v38 = vmax.f32 %v455_v32, 1e-24  ;;  %v457_v39 = vpop.xlane.xlu1 %456 }
 0x182   :  { %v524_v40 = vmul.f32 %v771_v33, %v898_v18  ;;  %v481_v41 = vmax.f32 %v457_v39, 1e-24 }
 0x183   :  { %v548_v42 = vadd.f32 %v532_v34, %v516_v31  ;;  %784 = vrsqrt.f32 %v480_v38 }
 0x184   :  { %v773_v43 = vpop.eup %772  ;;  %v540_v46 = vadd.f32 %v524_v40, %v508_v37  ;;  %786 = vrsqrt.f32 %v481_v41  ;;  %v451_v48 = vpop.xlane.xlu0 %450 }
 0x185   :  { %v775_v19 = vpop.eup %774  ;;  %564 = vst [vmem:[%s1097_s4 + $0x50] sm:$0xff] %v548_v42  ;;  %v522_v49 = vmul.f32 %v773_v43, %v902_v22  ;;  %v478_v54 = vmax.f32 %v451_v48, 1e-24  ;;  %v453_v55 = vpop.xlane.xlu1 %452 }
 0x186   :  { %v525_v56 = vmul.f32 %v775_v19, %v908_v27  ;;  %v479_v57 = vmax.f32 %v453_v55, 1e-24 }
 0x187   :  { %v538_v59 = vadd.f32 %v522_v49, %v506_v47  ;;  %788 = vrsqrt.f32 %v478_v54 }
 0x188   :  { %v777_v61 = vpop.eup %776  ;;  %790 = vrsqrt.f32 %v479_v57  ;;  %v467_v63 = vpop.xlane.xlu0 %466 }
 0x189   :  { %v779_v0 = vpop.eup %778  ;;  %v530_v1 = vmul.f32 %v777_v61, %v912_v29  ;;  %v486_v2 = vmax.f32 %v467_v63, 1e-24  ;;  %v469_v3 = vpop.xlane.xlu1 %468 }
 0x18a   :  { %v533_v4 = vmul.f32 %v779_v0, %v910_v28  ;;  %v487_v5 = vmax.f32 %v469_v3, 1e-24 }
 0x18b   :  { %792 = vrsqrt.f32 %v486_v2 }
 0x18c   :  { %v509_v18 = vld [vmem:[%s1095_s2 + $0x18] sm:$0xff]  ;;  %v781_v7 = vpop.eup %780  ;;  %794 = vrsqrt.f32 %v487_v5  ;;  %v471_v9 = vpop.xlane.xlu0 %470 }
 0x18d   :  { %556 = vst [vmem:[%s1097_s4 + $0x10] sm:$0xff] %v540_v46  ;;  %v541_v62 = vadd.f32 %v525_v56, %v509_v18  ;;  %v783_v10 = vpop.eup %782  ;;  %v523_v11 = vmul.f32 %v781_v7, %v920_v35  ;;  %v488_v12 = vmax.f32 %v471_v9, 1e-24  ;;  %v473_v13 = vpop.xlane.xlu1 %472 }
 0x18e   :  { %v531_v14 = vmul.f32 %v783_v10, %v922_v36  ;;  %v489_v15 = vmax.f32 %v473_v13, 1e-24 }
 0x18f   :  { %796 = vrsqrt.f32 %v488_v12 }
 0x190   :  { %v785_v17 = vpop.eup %784  ;;  %798 = vrsqrt.f32 %v489_v15 }
 0x191   :  { %v787_v23 = vpop.eup %786  ;;  %v528_v35 = vmul.f32 %v785_v17, %v930_v44 }
 0x192   :  { %v529_v24 = vmul.f32 %v787_v23, %v938_v50 }
 0x194   :  { %v514_v22 = vld [vmem:[%s1095_s2 + $0x40] sm:$0xff]  ;;  %v789_v26 = vpop.eup %788 }
 0x195   :  { %554 = vst [vmem:[%s1097_s4] sm:$0xff] %v538_v59  ;;  %v546_v6 = vadd.f32 %v530_v1, %v514_v22  ;;  %v791_v32 = vpop.eup %790  ;;  %v526_v44 = vmul.f32 %v789_v26, %v944_v53 }
 0x196   :  { %v527_v50 = vmul.f32 %v791_v32, %v950_v58 }
 0x198   :  { %v793_v37 = vpop.eup %792 }
 0x199   :  { %v795_v40 = vpop.eup %794  ;;  %v534_v53 = vmul.f32 %v793_v37, %v940_v51 }
 0x19a   :  { %v535_v58 = vmul.f32 %v795_v40, %v954_v60 }
 0x19c   :  { %v517_v27 = vld [vmem:[%s1095_s2 + $0x58] sm:$0xff]  ;;  %v797_v43 = vpop.eup %796 }
 0x19d   :  { %557 = vst [vmem:[%s1097_s4 + $0x18] sm:$0xff] %v541_v62  ;;  %v549_v8 = vadd.f32 %v533_v4, %v517_v27  ;;  %v799_v48 = vpop.eup %798  ;;  %v536_v51 = vmul.f32 %v797_v43, %v932_v45 }
 0x19e   :  { %v537_v60 = vmul.f32 %v799_v48, %v942_v52 }
 0x1a4   :  { %v507_v29 = vld [vmem:[%s1095_s2 + $0x8] sm:$0xff] }
 0x1a5   :  { %562 = vst [vmem:[%s1097_s4 + $0x40] sm:$0xff] %v546_v6  ;;  %v539_v16 = vadd.f32 %v523_v11, %v507_v29 }
 0x1ac   :  { %v515_v28 = vld [vmem:[%s1095_s2 + $0x48] sm:$0xff] }
 0x1ad   :  { %565 = vst [vmem:[%s1097_s4 + $0x58] sm:$0xff] %v549_v8  ;;  %v547_v20 = vadd.f32 %v531_v14, %v515_v28 }
 0x1b4   :  { %v512_v21 = vld [vmem:[%s1095_s2 + $0x30] sm:$0xff] }
 0x1b5   :  { %555 = vst [vmem:[%s1097_s4 + $0x8] sm:$0xff] %v539_v16  ;;  %v544_v25 = vadd.f32 %v528_v35, %v512_v21 }
 0x1bc   :  { %v513_v36 = vld [vmem:[%s1095_s2 + $0x38] sm:$0xff] }
 0x1bd   :  { %563 = vst [vmem:[%s1097_s4 + $0x48] sm:$0xff] %v547_v20  ;;  %v545_v30 = vadd.f32 %v529_v24, %v513_v36 }
 0x1c4   :  { %v510_v31 = vld [vmem:[%s1095_s2 + $0x20] sm:$0xff] }
 0x1c5   :  { %560 = vst [vmem:[%s1097_s4 + $0x30] sm:$0xff] %v544_v25  ;;  %v542_v34 = vadd.f32 %v526_v44, %v510_v31 }
 0x1cc   :  { %v511_v33 = vld [vmem:[%s1095_s2 + $0x28] sm:$0xff] }
 0x1cd   :  { %561 = vst [vmem:[%s1097_s4 + $0x38] sm:$0xff] %v545_v30  ;;  %v543_v38 = vadd.f32 %v527_v50, %v511_v33 }
 0x1d4   :  { %v518_v39 = vld [vmem:[%s1095_s2 + $0x60] sm:$0xff] }
 0x1d5   :  { %558 = vst [vmem:[%s1097_s4 + $0x20] sm:$0xff] %v542_v34  ;;  %v550_v42 = vadd.f32 %v534_v53, %v518_v39 }
 0x1dc   :  { %v519_v41 = vld [vmem:[%s1095_s2 + $0x68] sm:$0xff] }
 0x1dd   :  { %559 = vst [vmem:[%s1097_s4 + $0x28] sm:$0xff] %v543_v38  ;;  %v551_v46 = vadd.f32 %v535_v58, %v519_v41 }
 0x1e4   :  { %v520_v47 = vld [vmem:[%s1095_s2 + $0x70] sm:$0xff] }
 0x1e5   :  { %566 = vst [vmem:[%s1097_s4 + $0x60] sm:$0xff] %v550_v42  ;;  %v552_v49 = vadd.f32 %v536_v51, %v520_v47 }
 0x1ec   :  { %v521_v19 = vld [vmem:[%s1095_s2 + $0x78] sm:$0xff] }
 0x1ed   :  { %567 = vst [vmem:[%s1097_s4 + $0x68] sm:$0xff] %v551_v46  ;;  %v553_v18 = vadd.f32 %v537_v60, %v521_v19  ;;  %568 = vst [vmem:[%s1097_s4 + $0x70] sm:$0xff] %v552_v49 }
 0x1ef   :  { %569 = vst [vmem:[%s1097_s4 + $0x78] sm:$0xff] %v553_v18 }
 0x1f0   :  { %820 = dma.done.wait [#allocation4], 1024  }
 0x1f1   :  { %821 = vsyncadd [#allocation4], 4294966272 }
 0x1f2   :  { %589 = vsyncpa [#allocation4], 1 }

// kernel: bunca_forward.18
= control target key start
LH: loop header
LB: loop body
LE: loop exit
PB: predicated region body
PF: predicated region fallthrough
CT: control target
= control target key end

     0   :  { %v2720_v0 = vmov 1   ;;  %v2721_v2 = vmov 0   ;;  %vm4293_vm0 = vcmask 7168   ;;  %v2722_v18 = vmov -1e+30   ;;  %s4287_s2 = inlined_call_operand.vmem [shape: f32[128,2], index: 2, kind: input, shape index: {}]   ;;  %s4288_s1 = inlined_call_operand.vmem [shape: s8[128,128], index: 1, kind: input, shape index: {}]   ;;  %s4289_s3 = inlined_call_operand.vmem [shape: f32[2,128], index: 3, kind: input, shape index: {}]   ;;  %s4290_s0 = inlined_call_operand.vmem [shape: bf16[128,256], index: 0, kind: input, shape index: {}]   ;;  %s4291_s4 = inlined_call_operand.vmem [shape: f32[128,128], index: 4, kind: input, shape index: {}]   ;;  %s4292_s5 = inlined_call_operand.vmem [shape: f32[128,128], index: 5, kind: output, shape index: {}]  }
   0x1   :  { %2509 = vset.pattern.permute.xlu0 %v2720_v0  ;;  %v1022_v1 = vld [vmem:[%s4287_s2 + $0x8] sm:$0xff]  ;;  %2507 = vset.pattern.permute.xlu1 %v2721_v2  ;;  %v160_v3 = vld [vmem:[%s4287_s2 + $0x10] sm:$0xff]  ;;  %v1025_v4 = vld [vmem:[%s4287_s2 + $0x20] sm:$0xff]  ;;  %26 = vst.msk [vmem:[#allocation2] sm:$0xff] %vm4293_vm0, %v2722_v18 }
   0x2   :  { %1045 = vperm.xlu0 %2509, %v1022_v1   ;;  %187 = vperm.xlu1 %2507, %v160_v3   ;;  %v161_v5 = vld [vmem:[%s4287_s2 + $0x18] sm:$0xff]  ;;  %v1027_v6 = vld [vmem:[%s4287_s2 + $0x30] sm:$0xff]  ;;  %v163_v7 = vld [vmem:[%s4287_s2 + $0x28] sm:$0xff]  ;;  %27 = vst.msk [vmem:[#allocation2 + $0x8] sm:$0xff] %vm4293_vm0, %v2722_v18 }
   0x3   :  { %v1029_v8 = vld [vmem:[%s4287_s2 + $0x40] sm:$0xff]  ;;  %v165_v9 = vld [vmem:[%s4287_s2 + $0x38] sm:$0xff]  ;;  %v1031_v10 = vld [vmem:[%s4287_s2 + $0x50] sm:$0xff]  ;;  %28 = vst.msk [vmem:[#allocation2 + $0x10] sm:$0xff] %vm4293_vm0, %v2722_v18 }
   0x4   :  { %v167_v11 = vld [vmem:[%s4287_s2 + $0x48] sm:$0xff]  ;;  %v1033_v12 = vld [vmem:[%s4287_s2 + $0x60] sm:$0xff]  ;;  %v169_v13 = vld [vmem:[%s4287_s2 + $0x58] sm:$0xff]  ;;  %29 = vst.msk [vmem:[#allocation2 + $0x18] sm:$0xff] %vm4293_vm0, %v2722_v18 }
   0x5   :  { %v1035_v14 = vld [vmem:[%s4287_s2 + $0x70] sm:$0xff]  ;;  %v171_v15 = vld [vmem:[%s4287_s2 + $0x68] sm:$0xff]  ;;  %v173_v16 = vld [vmem:[%s4287_s2 + $0x78] sm:$0xff]  ;;  %30 = vst.msk [vmem:[#allocation2 + $0x20] sm:$0xff] %vm4293_vm0, %v2722_v18 }
   0x6   :  { %1060 = vperm.xlu0 %2509, %v1025_v4   ;;  %192 = vperm.xlu1 %2507, %v161_v5   ;;  %v158_v17 = vld [vmem:[%s4287_s2] sm:$0xff]  ;;  %31 = vst.msk [vmem:[#allocation2 + $0x28] sm:$0xff] %vm4293_vm0, %v2722_v18  ;;  %32 = vst.msk [vmem:[#allocation2 + $0x30] sm:$0xff] %vm4293_vm0, %v2722_v18  ;;  %v123_v50 = vld [vmem:[%s4288_s1 + $0x8] sm:$0xff] }
   0x7   :  { %33 = vst.msk [vmem:[#allocation2 + $0x38] sm:$0xff] %vm4293_vm0, %v2722_v18  ;;  %34 = vst.msk [vmem:[#allocation2 + $0x40] sm:$0xff] %vm4293_vm0, %v2722_v18  ;;  %v2855_v33 = vld [vmem:[%s4289_s3] ss:$0 sm:$0xff]  ;;  %v130_v59 = vunpack.c.0.s8 %v123_v50 }
   0x8   :  { %35 = vst.msk [vmem:[#allocation2 + $0x48] sm:$0xff] %vm4293_vm0, %v2722_v18  ;;  %36 = vst.msk [vmem:[#allocation2 + $0x50] sm:$0xff] %vm4293_vm0, %v2722_v18  ;;  %v122_v35 = vld [vmem:[%s4288_s1] sm:$0xff] }
   0x9   :  { %37 = vst.msk [vmem:[#allocation2 + $0x58] sm:$0xff] %vm4293_vm0, %v2722_v18  ;;  %38 = vst.msk [vmem:[#allocation2 + $0x60] sm:$0xff] %vm4293_vm0, %v2722_v18  ;;  %v126_v36 = vunpack.c.0.s8 %v122_v35  ;;  %v128_v41 = vunpack.c.2.s8 %v122_v35  ;;  %v127_v49 = vunpack.c.1.s8 %v122_v35  ;;  %v129_v51 = vunpack.c.3.s8 %v122_v35 }
   0xa   :  { %1070 = vperm.xlu0 %2509, %v1027_v6   ;;  %202 = vperm.xlu1 %2507, %v163_v7   ;;  %39 = vst.msk [vmem:[#allocation2 + $0x68] sm:$0xff] %vm4293_vm0, %v2722_v18  ;;  %40 = vst.msk [vmem:[#allocation2 + $0x70] sm:$0xff] %vm4293_vm0, %v2722_v18  ;;  %vm2908_vm11 = vcmp.gt.s32.totalorder %v130_v59, 0 }
   0xb   :  { %41 = vst.msk [vmem:[#allocation2 + $0x78] sm:$0xff] %vm4293_vm0, %v2722_v18  ;;  %42 = vst.msk [vmem:[#allocation2 + $0x80] sm:$0xff] %vm4293_vm0, %v2722_v18  ;;  %vm2865_vm1 = vcmp.gt.s32.totalorder %v126_v36, 0  ;;  %vm2879_vm4 = vcmp.gt.s32.totalorder %v128_v41, 0  ;;  %vm2888_vm7 = vcmp.gt.s32.totalorder %v127_v49, 0  ;;  %vm2900_vm8 = vcmp.gt.s32.totalorder %v129_v51, 0 }
   0xc   :  { %43 = vst.msk [vmem:[#allocation2 + $0x88] sm:$0xff] %vm4293_vm0, %v2722_v18  ;;  %44 = vst.msk [vmem:[#allocation2 + $0x90] sm:$0xff] %vm4293_vm0, %v2722_v18  ;;  %v2944_v41 = vld [vmem:[%s4288_s1 + $0x18] sm:$0xff] }
   0xd   :  { %45 = vst.msk [vmem:[#allocation2 + $0x98] sm:$0xff] %vm4293_vm0, %v2722_v18  ;;  %46 = vst.msk [vmem:[#allocation2 + $0xa0] sm:$0xff] %vm4293_vm0, %v2722_v18 }
   0xe   :  { %1080 = vperm.xlu0 %2509, %v1029_v8   ;;  %212 = vperm.xlu1 %2507, %v165_v9   ;;  %47 = vst.msk [vmem:[#allocation2 + $0xa8] sm:$0xff] %vm4293_vm0, %v2722_v18  ;;  %48 = vst.msk [vmem:[#allocation2 + $0xb0] sm:$0xff] %vm4293_vm0, %v2722_v18 }
   0xf   :  { %49 = vst.msk [vmem:[#allocation2 + $0xb8] sm:$0xff] %vm4293_vm0, %v2722_v18  ;;  %50 = vst.msk [vmem:[#allocation2 + $0xc0] sm:$0xff] %vm4293_vm0, %v2722_v18 }
  0x10   :  { %51 = vst.msk [vmem:[#allocation2 + $0xc8] sm:$0xff] %vm4293_vm0, %v2722_v18  ;;  %52 = vst.msk [vmem:[#allocation2 + $0xd0] sm:$0xff] %vm4293_vm0, %v2722_v18 }
  0x11   :  { %53 = vst.msk [vmem:[#allocation2 + $0xd8] sm:$0xff] %vm4293_vm0, %v2722_v18  ;;  %54 = vst.msk [vmem:[#allocation2 + $0xe0] sm:$0xff] %vm4293_vm0, %v2722_v18 }
  0x12   :  { %1090 = vperm.xlu0 %2509, %v1031_v10   ;;  %222 = vperm.xlu1 %2507, %v167_v11   ;;  %55 = vst.msk [vmem:[#allocation2 + $0xe8] sm:$0xff] %vm4293_vm0, %v2722_v18  ;;  %56 = vst.msk [vmem:[#allocation2 + $0xf0] sm:$0xff] %vm4293_vm0, %v2722_v18 }
  0x13   :  { %57 = vst.msk [vmem:[#allocation2 + $0xf8] sm:$0xff] %vm4293_vm0, %v2722_v18  ;;  %v4377_v18 = vmov 0 }
  0x16   :  { %1100 = vperm.xlu0 %2509, %v1033_v12   ;;  %232 = vperm.xlu1 %2507, %v169_v13  }
  0x1a   :  { %1110 = vperm.xlu0 %2509, %v1035_v14   ;;  %242 = vperm.xlu1 %2507, %v171_v15  }
  0x1e   :  { %2510 = vset.pattern.permute.xlu0 %v2721_v2  ;;  %252 = vperm.xlu1 %2507, %v173_v16  }
  0x1f   :  { %177 = vperm.xlu0 %2510, %v158_v17  }
  0x22   :  { %2508 = vset.pattern.permute.xlu1 %v2720_v0  ;;  %v131_v0 = vunpack.c.1.s8 %v123_v50 }
  0x23   :  { %182 = vperm.xlu0 %2510, %v1022_v1   ;;  %1040 = vperm.xlu1 %2508, %v158_v17  }
  0x24   :  { %vm2924_vm12 = vcmp.gt.s32.totalorder %v131_v0, 0 }
  0x25   :  { %v4378_v18 = vsel %vm2924_vm12, 4294967295, %v4377_v18 }
  0x27   :  { %197 = vperm.xlu0 %2510, %v1025_v4   ;;  %1050 = vperm.xlu1 %2508, %v160_v3  }
  0x2b   :  { %207 = vperm.xlu0 %2510, %v1027_v6   ;;  %1055 = vperm.xlu1 %2508, %v161_v5  }
  0x2f   :  { %217 = vperm.xlu0 %2510, %v1029_v8   ;;  %1065 = vperm.xlu1 %2508, %v163_v7  }
  0x33   :  { %227 = vperm.xlu0 %2510, %v1031_v10   ;;  %1075 = vperm.xlu1 %2508, %v165_v9   ;;  %v132_v9 = vunpack.c.2.s8 %v123_v50 }
  0x35   :  { %vm2932_vm14 = vcmp.gt.s32.totalorder %v132_v9, 0  ;;  %v4387_v9 = vmov 0 }
  0x37   :  { %237 = vperm.xlu0 %2510, %v1033_v12   ;;  %1085 = vperm.xlu1 %2508, %v167_v11   ;;  %v4375_v11 = vmov 0 }
  0x38   :  { %v4376_v11 = vsel %vm2908_vm11, 4294967295, %v4375_v11 }
  0x3b   :  { %247 = vperm.xlu0 %2510, %v1035_v14   ;;  %1095 = vperm.xlu1 %2508, %v169_v13   ;;  %v124_v13 = vld [vmem:[%s4288_s1 + $0x10] sm:$0xff]  ;;  %v133_v14 = vunpack.c.3.s8 %v123_v50 }
  0x3c   :  { %v134_v35 = vunpack.c.0.s8 %v124_v13  ;;  %v136_v51 = vunpack.c.2.s8 %v124_v13  ;;  %v137_v59 = vunpack.c.3.s8 %v124_v13 }
  0x3f   :  { %1105 = vperm.xlu1 %2508, %v171_v15  }
  0x43   :  { %1115 = vperm.xlu1 %2508, %v173_v16  }
  0x47   :  { %2511 = vset.pattern.permute.xlu1 %v2721_v2 }
  0x7d   :  { %v2834_v19 = vpop.permute.xlu0 %1045  ;;  %v188_v20 = vpop.permute.xlu1 %187 }
  0x7e   :  { %v261_v34 = vadd.f32 %v2855_v33, %v188_v20 }
  0x80   :  { %v293_v42 = vmul.f32 0.2, %v261_v34  ;;  %vm277_vm3 = vcmp.gt.f32.partialorder %v261_v34, 0.0 }
  0x81   :  { %v2836_v21 = vpop.permute.xlu0 %1060  ;;  %v193_v22 = vpop.permute.xlu1 %192 }
  0x82   :  { %v262_v40 = vadd.f32 %v2855_v33, %v193_v22  ;;  %v309_v54 = vsel %vm277_vm3, %v261_v34, %v293_v42  ;;  %v4379_v34 = vmov 0 }
  0x83   :  { %v2898_v2 = vsel %vm2879_vm4, %v309_v54, -1e+30  ;;  %v4380_v34 = vsel %vm2932_vm14, 4294967295, %v4379_v34  ;;  %v138_v54 = vunpack.c.0.s8 %v2944_v41 }
  0x84   :  { %v294_v55 = vmul.f32 0.2, %v262_v40  ;;  %vm278_vm6 = vcmp.gt.f32.partialorder %v262_v40, 0.0 }
  0x85   :  { %v2838_v23 = vpop.permute.xlu0 %1070  ;;  %v203_v24 = vpop.permute.xlu1 %202 }
  0x86   :  { %v264_v56 = vadd.f32 %v2855_v33, %v203_v24  ;;  %v310_v4 = vsel %vm278_vm6, %v262_v40, %v294_v55  ;;  %v135_v40 = vunpack.c.1.s8 %v124_v13  ;;  %vm2958_vm6 = vcmp.gt.s32.totalorder %v134_v35, 0 }
  0x87   :  { %v2922_v17 = vsel %vm2900_vm8, %v310_v4, -1e+30 }
  0x88   :  { %v296_v7 = vmul.f32 0.2, %v264_v56  ;;  %vm280_vm10 = vcmp.gt.f32.partialorder %v264_v56, 0.0 }
  0x89   :  { %v2840_v25 = vpop.permute.xlu0 %1080  ;;  %v213_v26 = vpop.permute.xlu1 %212 }
  0x8a   :  { %v266_v5 = vadd.f32 %v2855_v33, %v213_v26  ;;  %v312_v24 = vsel %vm280_vm10, %v264_v56, %v296_v7  ;;  %v2985_v7 = vld [vmem:[%s4289_s3 + $0x1] ss:$0 sm:$0xff] }
  0x8c   :  { %v298_v26 = vmul.f32 0.2, %v266_v5  ;;  %vm282_vm15 = vcmp.gt.f32.partialorder %v266_v5, 0.0 }
  0x8d   :  { %v2842_v27 = vpop.permute.xlu0 %1090  ;;  %v223_v28 = vpop.permute.xlu1 %222 }
  0x8e   :  { %v268_v15 = vadd.f32 %v2855_v33, %v223_v28  ;;  %v314_v49 = vsel %vm282_vm15, %v266_v5, %v298_v26  ;;  %vm2987_vm15 = vcmp.gt.s32.totalorder %v136_v51, 0  ;;  %v4391_v26 = vmov 0 }
  0x8f   :  { %v4388_v9 = vsel %vm2987_vm15, 4294967295, %v4387_v9 }
  0x91   :  { %v2844_v29 = vpop.permute.xlu0 %1100  ;;  %v2846_v30 = vpop.permute.xlu1 %232 }
  0x92   :  { %v270_v42 = vadd.f32 %v2855_v33, %v2846_v30  ;;  %v4383_v30 = vmov 0 }
  0x93   :  { %v4384_v30 = vsel %vm2958_vm6, 4294967295, %v4383_v30 }
  0x94   :  { %v302_v4 = vmul.f32 0.2, %v270_v42 }
  0x95   :  { %v2848_v31 = vpop.permute.xlu0 %1110  ;;  %v2850_v32 = vpop.permute.xlu1 %242 }
  0x96   :  { %v272_v5 = vadd.f32 %v2855_v33, %v2850_v32  ;;  %v139_v32 = vunpack.c.1.s8 %v2944_v41 }
  0x98   :  { %vm3026_vm0 = vcmp.gt.s32.totalorder %v139_v32, 0 }
  0x99   :  { %v2861_v38 = vpop.permute.xlu1 %252 }
  0x9a   :  { %v178_v37 = vpop.permute.xlu0 %177 }
  0x9b   :  { %v259_v39 = vadd.f32 %v2855_v33, %v178_v37 }
  0x9d   :  { %vm275_vm2 = vcmp.gt.f32.partialorder %v259_v39, 0.0  ;;  %v291_v44 = vmul.f32 0.2, %v259_v39 }
  0x9e   :  { %v183_v45 = vpop.permute.xlu0 %182  ;;  %v2869_v46 = vpop.permute.xlu1 %1040 }
  0x9f   :  { %v260_v47 = vadd.f32 %v2855_v33, %v183_v45  ;;  %v307_v48 = vsel %vm275_vm2, %v259_v39, %v291_v44  ;;  %vm2937_vm2 = vcmp.gt.s32.totalorder %v133_v14, 0  ;;  %v4381_v39 = vmov 0 }
  0xa0   :  { %v2877_v52 = vsel %vm2865_vm1, %v307_v48, -1e+30  ;;  %v4382_v39 = vsel %vm2937_vm2, 4294967295, %v4381_v39  ;;  %v2954_v45 = vsel %vm2924_vm12, %v312_v24, -1e+30  ;;  %v2999_v14 = vadd.f32 %v2985_v7, %v2869_v46 }
  0xa1   :  { %355 = vmax.xlane.f32.xlu0 %v2877_v52  ;;  %vm276_vm5 = vcmp.gt.f32.partialorder %v260_v47, 0.0  ;;  %v292_v57 = vmul.f32 0.2, %v260_v47  ;;  %v3018_v46 = vadd.f32 %v2855_v33, %v2861_v38  ;;  %v141_v38 = vunpack.c.3.s8 %v2944_v41 }
  0xa2   :  { %v198_v58 = vpop.permute.xlu0 %197  ;;  %v2885_v60 = vpop.permute.xlu1 %1050  ;;  %v1154_v51 = vmul.f32 0.2, %v2999_v14 }
  0xa3   :  { %v263_v61 = vadd.f32 %v2855_v33, %v198_v58  ;;  %v308_v63 = vsel %vm276_vm5, %v260_v47, %v292_v57  ;;  %v300_v47 = vmul.f32 0.2, %v268_v15  ;;  %vm284_vm5 = vcmp.gt.f32.partialorder %v268_v15, 0.0 }
  0xa4   :  { %v2894_v1 = vsel %vm2888_vm7, %v308_v63, -1e+30  ;;  %v4385_v58 = vmov 0  ;;  %v2976_v63 = vsel %vm2937_vm2, %v314_v49, -1e+30 }
  0xa5   :  { %357 = vmax.xlane.f32.xlu1 %v2894_v1  ;;  %359 = vmax.xlane.f32.xlu0 %v2898_v2  ;;  %vm279_vm9 = vcmp.gt.f32.partialorder %v263_v61, 0.0  ;;  %v295_v6 = vmul.f32 0.2, %v263_v61  ;;  %v316_v0 = vsel %vm284_vm5, %v268_v15, %v300_v47  ;;  %v140_v15 = vunpack.c.2.s8 %v2944_v41 }
  0xa6   :  { %v208_v8 = vpop.permute.xlu0 %207  ;;  %v2928_v20 = vpop.permute.xlu1 %1055  ;;  %vm3010_vm5 = vcmp.gt.s32.totalorder %v137_v59, 0 }
  0xa7   :  { %v265_v10 = vadd.f32 %v2855_v33, %v208_v8  ;;  %v311_v12 = vsel %vm279_vm9, %v263_v61, %v295_v6  ;;  %vm2966_vm9 = vcmp.gt.s32.totalorder %v135_v40, 0  ;;  %v4392_v26 = vsel %vm3010_vm5, 4294967295, %v4391_v26 }
  0xa8   :  { %v2918_v16 = vsel %vm2908_vm11, %v311_v12, -1e+30  ;;  %v4386_v58 = vsel %vm2966_vm9, 4294967295, %v4385_v58  ;;  %v3008_v24 = vsel %vm2966_vm9, %v316_v0, -1e+30  ;;  %v3024_v40 = vadd.f32 %v2985_v7, %v2834_v19 }
  0xa9   :  { %363 = vmax.xlane.f32.xlu1 %v2918_v16  ;;  %361 = vmax.xlane.f32.xlu0 %v2922_v17  ;;  %vm281_vm13 = vcmp.gt.f32.partialorder %v265_v10, 0.0  ;;  %v297_v22 = vmul.f32 0.2, %v265_v10  ;;  %v1124_v0 = vadd.f32 %v2985_v7, %v2885_v60 }
  0xaa   :  { %v218_v28 = vpop.permute.xlu0 %217  ;;  %v2963_v55 = vpop.permute.xlu1 %1065 }
  0xab   :  { %v267_v36 = vadd.f32 %v2855_v33, %v218_v28  ;;  %v313_v37 = vsel %vm281_vm13, %v265_v10, %v297_v22  ;;  %vm286_vm13 = vcmp.gt.f32.partialorder %v270_v42, 0.0  ;;  %v4389_v10 = vmov 0 }
  0xac   :  { %v2950_v44 = vsel %vm2932_vm14, %v313_v37, -1e+30  ;;  %v318_v28 = vsel %vm286_vm13, %v270_v42, %v302_v4  ;;  %v304_v37 = vmul.f32 0.2, %v272_v5  ;;  %vm288_vm13 = vcmp.gt.f32.partialorder %v272_v5, 0.0 }
  0xad   :  { %367 = vmax.xlane.f32.xlu1 %v2950_v44  ;;  %365 = vmax.xlane.f32.xlu0 %v2954_v45  ;;  %vm283_vm3 = vcmp.gt.f32.partialorder %v267_v36, 0.0  ;;  %v299_v48 = vmul.f32 0.2, %v267_v36 }
  0xae   :  { %v228_v50 = vpop.permute.xlu0 %227  ;;  %v3014_v35 = vpop.permute.xlu1 %1075 }
  0xaf   :  { %v269_v56 = vadd.f32 %v2855_v33, %v228_v50  ;;  %v315_v57 = vsel %vm283_vm3, %v267_v36, %v299_v48  ;;  %vm2991_vm3 = vcmp.gt.s32.totalorder %v138_v54, 0  ;;  %v3034_v50 = vadd.f32 %v2985_v7, %v2928_v20 }
  0xb0   :  { %v2972_v61 = vsel %vm2958_vm6, %v315_v57, -1e+30  ;;  %v4390_v10 = vsel %vm2991_vm3, 4294967295, %v4389_v10  ;;  %v3043_v54 = vsel %vm3010_vm5, %v318_v28, -1e+30  ;;  %v320_v20 = vsel %vm288_vm13, %v272_v5, %v304_v37 }
  0xb1   :  { %371 = vmax.xlane.f32.xlu1 %v2972_v61  ;;  %369 = vmax.xlane.f32.xlu0 %v2976_v63  ;;  %vm285_vm10 = vcmp.gt.f32.partialorder %v269_v56, 0.0  ;;  %v301_v6 = vmul.f32 0.2, %v269_v56  ;;  %v2723_v57 = vmov 0.0   ;;  %vm4395_vm6 = vcmask 7168  }
  0xb2   :  { %v238_v8 = vpop.permute.xlu0 %237  ;;  %58 = vst.msk [vmem:[#allocation3] sm:$0xff] %vm4395_vm6, %v2723_v57  ;;  %v1086_v4 = vpop.permute.xlu1 %1085  ;;  %v1157_v41 = vmul.f32 0.2, %v3034_v50  ;;  %v3103_v60 = vsel %vm3026_vm0, %v320_v20, -1e+30 }
  0xb3   :  { %v271_v12 = vadd.f32 %v2855_v33, %v238_v8  ;;  %v317_v13 = vsel %vm285_vm10, %v269_v56, %v301_v6  ;;  %v306_v56 = vmul.f32 0.2, %v3018_v46  ;;  %v1127_v8 = vadd.f32 %v2985_v7, %v2963_v55 }
  0xb4   :  { %v3004_v22 = vsel %vm2987_vm15, %v317_v13, -1e+30  ;;  %v1155_v13 = vmul.f32 0.2, %v3024_v40 }
  0xb5   :  { %375 = vmax.xlane.f32.xlu1 %v3004_v22  ;;  %373 = vmax.xlane.f32.xlu0 %v3008_v24  ;;  %vm287_vm10 = vcmp.gt.f32.partialorder %v271_v12, 0.0  ;;  %v303_v36 = vmul.f32 0.2, %v271_v12  ;;  %v1159_v37 = vmul.f32 0.2, %v1127_v8 }
  0xb6   :  { %v248_v47 = vpop.permute.xlu0 %247 }
  0xb7   :  { %v273_v48 = vadd.f32 %v2855_v33, %v248_v47  ;;  %v319_v49 = vsel %vm287_vm10, %v271_v12, %v303_v36  ;;  %v1129_v36 = vadd.f32 %v2985_v7, %v3014_v35 }
  0xb8   :  { %v3039_v19 = vsel %vm2991_vm3, %v319_v49, -1e+30  ;;  %vm4396_vm3 = vmmov %vm4395_vm6 }
  0xb9   :  { %379 = vmax.xlane.f32.xlu1 %v3039_v19  ;;  %377 = vmax.xlane.f32.xlu0 %v3043_v54  ;;  %v305_v33 = vmul.f32 0.2, %v273_v48  ;;  %59 = vst.msk [vmem:[#allocation3 + $0x8] sm:$0xff] %vm4396_vm3, %v2723_v57  ;;  %vm4397_vm14 = vmmov %vm4396_vm3 }
  0xba   :  { %60 = vst.msk [vmem:[#allocation3 + $0x10] sm:$0xff] %vm4397_vm14, %v2723_v57  ;;  %vm4398_vm5 = vmmov %vm4396_vm3 }
  0xbb   :  { %61 = vst.msk [vmem:[#allocation3 + $0x18] sm:$0xff] %vm4398_vm5, %v2723_v57  ;;  %vm4399_vm9 = vmmov %vm4396_vm3 }
  0xbc   :  { %62 = vst.msk [vmem:[#allocation3 + $0x20] sm:$0xff] %vm4399_vm9, %v2723_v57  ;;  %vm4400_vm15 = vmmov %vm4396_vm3 }
  0xbd   :  { %63 = vst.msk [vmem:[#allocation3 + $0x28] sm:$0xff] %vm4400_vm15, %v2723_v57  ;;  %vm4401_vm11 = vmmov %vm4396_vm3  ;;  %381 = vmax.xlane.f32.xlu0 %v3103_v60 }
  0xbe   :  { %64 = vst.msk [vmem:[#allocation3 + $0x30] sm:$0xff] %vm4401_vm11, %v2723_v57  ;;  %vm4402_vm10 = vmmov %vm4396_vm3 }
  0xbf   :  { %65 = vst.msk [vmem:[#allocation3 + $0x38] sm:$0xff] %vm4402_vm10, %v2723_v57  ;;  %vm4403_vm13 = vmmov %vm4396_vm3 }
  0xc0   :  { %66 = vst.msk [vmem:[#allocation3 + $0x40] sm:$0xff] %vm4403_vm13, %v2723_v57  ;;  %vm4404_vm2 = vmmov %vm4396_vm3 }
  0xc1   :  { %67 = vst.msk [vmem:[#allocation3 + $0x48] sm:$0xff] %vm4404_vm2, %v2723_v57  ;;  %vm4405_vm12 = vmmov %vm4404_vm2 }
  0xc2   :  { %68 = vst.msk [vmem:[#allocation3 + $0x50] sm:$0xff] %vm4405_vm12, %v2723_v57  ;;  %vm4406_vm6 = vmmov %vm4404_vm2 }
  0xc3   :  { %69 = vst.msk [vmem:[#allocation3 + $0x58] sm:$0xff] %vm4406_vm6, %v2723_v57  ;;  %vm4407_vm3 = vmmov %vm4404_vm2 }
  0xc4   :  { %70 = vst.msk [vmem:[#allocation3 + $0x60] sm:$0xff] %vm4407_vm3, %v2723_v57  ;;  %vm4408_vm14 = vmmov %vm4404_vm2 }
  0xc5   :  { %71 = vst.msk [vmem:[#allocation3 + $0x68] sm:$0xff] %vm4408_vm14, %v2723_v57  ;;  %vm4409_vm5 = vmmov %vm4404_vm2 }
  0xc6   :  { %72 = vst.msk [vmem:[#allocation3 + $0x70] sm:$0xff] %vm4409_vm5, %v2723_v57  ;;  %vm4410_vm9 = vmmov %vm4404_vm2 }
  0xc7   :  { %73 = vst.msk [vmem:[#allocation3 + $0x78] sm:$0xff] %vm4410_vm9, %v2723_v57  ;;  %vm4411_vm15 = vmmov %vm4404_vm2 }
  0xc8   :  { %74 = vst.msk [vmem:[#allocation3 + $0x80] sm:$0xff] %vm4411_vm15, %v2723_v57  ;;  %vm4412_vm11 = vmmov %vm4404_vm2 }
  0xc9   :  { %75 = vst.msk [vmem:[#allocation3 + $0x88] sm:$0xff] %vm4412_vm11, %v2723_v57  ;;  %vm4413_vm10 = vmmov %vm4404_vm2 }
  0xca   :  { %76 = vst.msk [vmem:[#allocation3 + $0x90] sm:$0xff] %vm4413_vm10, %v2723_v57  ;;  %vm4414_vm13 = vmmov %vm4404_vm2 }
  0xcb   :  { %77 = vst.msk [vmem:[#allocation3 + $0x98] sm:$0xff] %vm4414_vm13, %v2723_v57  ;;  %vm4415_vm12 = vmmov %vm4404_vm2 }
  0xcc   :  { %78 = vst.msk [vmem:[#allocation3 + $0xa0] sm:$0xff] %vm4404_vm2, %v2723_v57  ;;  %vm4416_vm6 = vmmov %vm4404_vm2 }
  0xcd   :  { %79 = vst.msk [vmem:[#allocation3 + $0xa8] sm:$0xff] %vm4415_vm12, %v2723_v57  ;;  %vm4417_vm3 = vmmov %vm4404_vm2  ;;  %vm3083_vm12 = vcmp.gt.s32.totalorder %v140_v15, 0  ;;  %v1156_v15 = vmul.f32 0.2, %v1124_v0 }
  0xce   :  { %80 = vst.msk [vmem:[#allocation3 + $0xb0] sm:$0xff] %vm4416_vm6, %v2723_v57  ;;  %vm4418_vm14 = vmmov %vm4404_vm2  ;;  %vm290_vm6 = vcmp.gt.f32.partialorder %v3018_v46, 0.0 }
  0xcf   :  { %81 = vst.msk [vmem:[#allocation3 + $0xb8] sm:$0xff] %vm4417_vm3, %v2723_v57  ;;  %vm4419_vm5 = vmmov %vm4404_vm2  ;;  %vm4427_vm3 = vcmp.gt.f32.partialorder %v273_v48, 0.0  ;;  %v322_v55 = vsel %vm290_vm6, %v3018_v46, %v306_v56  ;;  %v1096_v46 = vpop.permute.xlu1 %1095  ;;  %vm4432_vm6 = vnez %v4378_v18 }
  0xd0   :  { %82 = vst.msk [vmem:[#allocation3 + $0xc0] sm:$0xff] %vm4418_vm14, %v2723_v57  ;;  %vm4420_vm9 = vmmov %vm4404_vm2  ;;  %v321_v5 = vsel %vm4427_vm3, %v273_v48, %v305_v33  ;;  %vm4428_vm14 = vcmp.gt.f32.partialorder %v2999_v14, 0.0  ;;  %v1161_v33 = vmul.f32 0.2, %v1129_v36 }
  0xd1   :  { %83 = vst.msk [vmem:[#allocation3 + $0xc8] sm:$0xff] %vm4419_vm5, %v2723_v57  ;;  %vm4421_vm15 = vmmov %vm4404_vm2  ;;  %v1170_v6 = vsel %vm4428_vm14, %v2999_v14, %v1154_v51  ;;  %v3099_v32 = vsel %vm3083_vm12, %v321_v5, -1e+30  ;;  %vm1141_vm5 = vcmp.gt.f32.partialorder %v3034_v50, 0.0  ;;  %v1131_v51 = vadd.f32 %v2985_v7, %v1086_v4 }
  0xd2   :  { %84 = vst.msk [vmem:[#allocation3 + $0xd0] sm:$0xff] %vm4420_vm9, %v2723_v57  ;;  %vm4422_vm11 = vmmov %vm4404_vm2  ;;  %383 = vmax.xlane.f32.xlu1 %v3099_v32  ;;  %vm3108_vm9 = vcmp.gt.s32.totalorder %v141_v38, 0  ;;  %v3117_v14 = vsel %vm2865_vm1, %v1170_v6, -1e+30  ;;  %v1173_v28 = vsel %vm1141_vm5, %v3034_v50, %v1157_v41  ;;  %v1126_v38 = vadd.f32 %v2985_v7, %v2836_v21 }
  0xd3   :  { %85 = vst.msk [vmem:[#allocation3 + $0xd8] sm:$0xff] %vm4421_vm15, %v2723_v57  ;;  %vm4423_vm10 = vmmov %vm4404_vm2  ;;  %vm1139_vm15 = vcmp.gt.f32.partialorder %v3024_v40, 0.0  ;;  %v3124_v47 = vsel %vm3108_vm9, %v322_v55, -1e+30  ;;  %v3133_v35 = vsel %vm2900_vm8, %v1173_v28, -1e+30  ;;  %v1128_v21 = vadd.f32 %v2985_v7, %v2838_v23 }
  0xd4   :  { %86 = vst.msk [vmem:[#allocation3 + $0xe0] sm:$0xff] %vm4422_vm11, %v2723_v57  ;;  %vm4424_vm13 = vmmov %vm4404_vm2  ;;  %vm1140_vm11 = vcmp.gt.f32.partialorder %v1124_v0, 0.0  ;;  %385 = vmax.xlane.f32.xlu0 %v3124_v47  ;;  %v1171_v48 = vsel %vm1139_vm15, %v3024_v40, %v1155_v13  ;;  %v1158_v40 = vmul.f32 0.2, %v1126_v38  ;;  %v1133_v5 = vadd.f32 %v2985_v7, %v1096_v46 }
  0xd5   :  { %87 = vst.msk [vmem:[#allocation3 + $0xe8] sm:$0xff] %vm4423_vm10, %v2723_v57  ;;  %vm1143_vm10 = vcmp.gt.f32.partialorder %v1127_v8, 0.0  ;;  %4431 = vst [vmem:[#allocation5_spill] sm:$0xff] %v3133_v35  ;;  %v1172_v49 = vsel %vm1140_vm11, %v1124_v0, %v1156_v15  ;;  %v3138_v20 = vsel %vm2888_vm7, %v1171_v48, -1e+30  ;;  %v1106_v0 = vpop.permute.xlu1 %1105  ;;  %vm1147_vm3 = vcmp.gt.f32.partialorder %v1131_v51, 0.0 }
  0xd6   :  { %88 = vst.msk [vmem:[#allocation3 + $0xf0] sm:$0xff] %vm4424_vm13, %v2723_v57  ;;  %1219 = vmax.xlane.f32.xlu1 %v3117_v14  ;;  %v1175_v50 = vsel %vm1143_vm10, %v1127_v8, %v1159_v37  ;;  %vm1145_vm13 = vcmp.gt.f32.partialorder %v1129_v36, 0.0  ;;  %v3146_v56 = vsel %vm2879_vm4, %v1172_v49, -1e+30  ;;  %v1163_v6 = vmul.f32 0.2, %v1131_v51 }
  0xd7   :  { %89 = vst.msk [vmem:[#allocation3 + $0xf8] sm:$0xff] %vm4404_vm2, %v2723_v57  ;;  %vm1142_vm2 = vcmp.gt.f32.partialorder %v1126_v38, 0.0  ;;  %v3150_v57 = vsel %vm4432_vm6, %v1175_v50, -1e+30  ;;  %v1177_v4 = vsel %vm1145_vm13, %v1129_v36, %v1161_v33  ;;  %v1130_v23 = vadd.f32 %v2985_v7, %v2840_v25 }
  0xd8   :  { %1221 = vmax.xlane.f32.xlu0 %v3138_v20  ;;  %4433 = vst [vmem:[#allocation6_spill] sm:$0xff] %v3150_v57  ;;  %v1174_v8 = vsel %vm1142_vm2, %v1126_v38, %v1158_v40  ;;  %v1160_v41 = vmul.f32 0.2, %v1128_v21  ;;  %vm1144_vm14 = vcmp.gt.f32.partialorder %v1128_v21, 0.0  ;;  %vm4434_vm5 = vnez %v4382_v39 }
  0xd9   :  { %v3159_v55 = vsel %vm4434_vm5, %v1177_v4, -1e+30  ;;  %v1179_v13 = vsel %vm1147_vm3, %v1131_v51, %v1163_v6  ;;  %v1135_v15 = vadd.f32 %v2985_v7, %v1106_v0  ;;  %v1165_v28 = vmul.f32 0.2, %v1133_v5  ;;  %v1116_v25 = vpop.permute.xlu1 %1115 }
  0xda   :  { %1225 = vmax.xlane.f32.xlu1 %v3133_v35  ;;  %4435 = vst [vmem:[#allocation7_spill] sm:$0xff] %v3159_v55  ;;  %vm4436_vm15 = vnez %v4376_v11  ;;  %vm1149_vm11 = vcmp.gt.f32.partialorder %v1133_v5, 0.0  ;;  %v1132_v37 = vadd.f32 %v2985_v7, %v2842_v27  ;;  %v1176_v46 = vsel %vm1144_vm14, %v1128_v21, %v1160_v41  ;;  %v2519_v35 = vld [vmem:[%s4290_s0] ss:$8 sps:$4 sm:$0xff]  }
  0xdb   :  { %v3164_v36 = vsel %vm4436_vm15, %v1174_v8, -1e+30  ;;  %v1162_v38 = vmul.f32 0.2, %v1130_v23  ;;  %vm1146_vm10 = vcmp.gt.f32.partialorder %v1130_v23, 0.0  ;;  %vm4437_vm13 = vnez %v4386_v58 }
  0xdc   :  { %1223 = vmax.xlane.f32.xlu0 %v3146_v56  ;;  %v3172_v48 = vsel %vm4437_vm13, %v1179_v13, -1e+30  ;;  %v1181_v49 = vsel %vm1149_vm11, %v1133_v5, %v1165_v28  ;;  %v1137_v50 = vadd.f32 %v2985_v7, %v1116_v25  ;;  %v1167_v51 = vmul.f32 0.2, %v1135_v15 }
  0xdd   :  { %4438 = vst [vmem:[#allocation8_spill] sm:$0xff] %v3172_v48  ;;  %vm4439_vm2 = vnez %v4380_v34  ;;  %vm1151_vm3 = vcmp.gt.f32.partialorder %v1135_v15, 0.0  ;;  %v1134_v27 = vadd.f32 %v2985_v7, %v2844_v29  ;;  %v1178_v21 = vsel %vm1146_vm10, %v1130_v23, %v1162_v38  ;;  %v2512_v38 = vld [vmem:[%s4290_s0 + $0x70] ss:$8 sps:$4 sm:$0xff]  }
  0xde   :  { %1229 = vmax.xlane.f32.xlu1 %v3150_v57  ;;  %v3177_v33 = vsel %vm4439_vm2, %v1176_v46, -1e+30  ;;  %v1164_v40 = vmul.f32 0.2, %v1132_v37  ;;  %vm1148_vm14 = vcmp.gt.f32.partialorder %v1132_v37, 0.0  ;;  %vm4441_vm11 = vnez %v4392_v26  ;;  %2439 = vmatprep.subr.bf16.mxu0 %v2512_v38  ;;  %v3285_v57 = vld [vmem:[#allocation2 + $0x48] sm:$0xff] }
  0xdf   :  { %4440 = vst [vmem:[#allocation9_spill] sm:$0xff] %v3177_v33  ;;  %v3185_v0 = vsel %vm4441_vm11, %v1181_v49, -1e+30  ;;  %v1183_v4 = vsel %vm1151_vm3, %v1135_v15, %v1167_v51  ;;  %v1169_v5 = vmul.f32 0.2, %v1137_v50  ;;  %vm4443_vm13 = vnez %v4384_v30  ;;  %2440 = vmatpush3.bf16.msra.mxu0 %v2512_v38  ;;  %v3223_v49 = vld [vmem:[#allocation2] sm:$0xff] }
  0xe0   :  { %1227 = vmax.xlane.f32.xlu0 %v3164_v36  ;;  %4442 = vst [vmem:[#allocation10_spill] sm:$0xff] %v3185_v0  ;;  %v3189_v6 = vsel %vm4443_vm13, %v1178_v21, -1e+30  ;;  %vm1153_vm5 = vcmp.gt.f32.partialorder %v1137_v50, 0.0  ;;  %v1136_v29 = vadd.f32 %v2985_v7, %v2848_v31  ;;  %v1180_v23 = vsel %vm1148_vm14, %v1132_v37, %v1164_v40  ;;  %v340_v21 = vld [vmem:[#allocation2 + $0x8] sm:$0xff]  ;;  %v3231_v40 = vld [vmem:[#allocation2 + $0x10] sm:$0xff] }
  0xe1   :  { %4444 = vst [vmem:[#allocation11_spill] sm:$0xff] %v3189_v6  ;;  %v1166_v8 = vmul.f32 0.2, %v1134_v27  ;;  %vm1150_vm10 = vcmp.gt.f32.partialorder %v1134_v27, 0.0  ;;  %v3197_v41 = vsel %vm3026_vm0, %v1183_v4, -1e+30  ;;  %v1185_v13 = vsel %vm1153_vm5, %v1137_v50, %v1169_v5 }
  0xe2   :  { %1233 = vmax.xlane.f32.xlu1 %v3159_v55  ;;  %4445 = vst [vmem:[#allocation12_spill] sm:$0xff] %v3197_v41  ;;  %vm4446_vm3 = vnez %v4388_v9  ;;  %v1168_v31 = vmul.f32 0.2, %v1136_v29  ;;  %vm1152_vm14 = vcmp.gt.f32.partialorder %v1136_v29, 0.0  ;;  %v3207_v7 = vsel %vm3108_vm9, %v1185_v13, -1e+30 }
  0xe3   :  { %v3201_v15 = vsel %vm4446_vm3, %v1180_v23, -1e+30  ;;  %v1182_v28 = vsel %vm1150_vm10, %v1134_v27, %v1166_v8  ;;  %4448 = vst [vmem:[#allocation14_spill] sm:$0xff] %v3207_v7  ;;  %vm4449_vm11 = vnez %v4390_v10  ;;  %v2513_v50 = vld [vmem:[%s4290_s0 + $0x60] ss:$8 sps:$4 sm:$0xff]   ;;  %vm4452_vm5 = vcmask 7168  }
  0xe4   :  { %1231 = vmax.xlane.f32.xlu0 %v3177_v33  ;;  %4447 = vst [vmem:[#allocation13_spill] sm:$0xff] %v3201_v15  ;;  %v3211_v25 = vsel %vm4449_vm11, %v1182_v28, -1e+30  ;;  %v1184_v37 = vsel %vm1152_vm14, %v1136_v29, %v1168_v31  ;;  %2441 = vmatprep.subr.bf16.mxu0 %v2513_v50  ;;  %v2514_v4 = vld [vmem:[%s4290_s0 + $0x50] ss:$8 sps:$4 sm:$0xff]   ;;  %v343_v13 = vld [vmem:[#allocation2 + $0x20] sm:$0xff]  ;;  %vm4453_vm10 = vmmov %vm4452_vm5 }
  0xe5   :  { %4450 = vst [vmem:[#allocation15_spill] sm:$0xff] %v3211_v25  ;;  %v3217_v46 = vsel %vm3083_vm12, %v1184_v37, -1e+30  ;;  %2442 = vmatpush3.bf16.msra.mxu0 %v2513_v50  ;;  %v3242_v28 = vld [vmem:[#allocation2 + $0x18] sm:$0xff]  ;;  %v2515_v31 = vld [vmem:[%s4290_s0 + $0x40] ss:$8 sps:$4 sm:$0xff]   ;;  %vm4454_vm14 = vmmov %vm4452_vm5 }
  0xe6   :  { %1237 = vmax.xlane.f32.xlu1 %v3172_v48  ;;  %4451 = vst [vmem:[#allocation16_spill] sm:$0xff] %v3217_v46  ;;  %2443 = vmatprep.subr.bf16.mxu0 %v2514_v4  ;;  %v2517_v48 = vld [vmem:[%s4290_s0 + $0x20] ss:$8 sps:$4 sm:$0xff]  }
  0xe7   :  { %v3317_v33 = vld [vmem:[#allocation2 + $0x68] sm:$0xff] }
  0xe8   :  { %1235 = vmax.xlane.f32.xlu0 %v3189_v6  ;;  %v2518_v6 = vld [vmem:[%s4290_s0 + $0x10] ss:$8 sps:$4 sm:$0xff]  }
  0xe9   :  { %2444 = vmatpush3.bf16.msra.mxu0 %v2514_v4  ;;  %v345_v4 = vld [vmem:[#allocation2 + $0x30] sm:$0xff]  ;;  %v4525_v62 = vld [vmem:[#allocation12_spill] sm:$0xff] }
  0xea   :  { %1241 = vmax.xlane.f32.xlu1 %v3185_v0  ;;  %2445 = vmatprep.subr.bf16.mxu0 %v2515_v31  ;;  %v3266_v0 = vld [vmem:[#allocation2 + $0x40] sm:$0xff]  ;;  %v4528_v3 = vld [vmem:[#allocation14_spill] sm:$0xff] }
  0xec   :  { %1239 = vmax.xlane.f32.xlu0 %v3201_v15  ;;  %v3283_v15 = vld [vmem:[#allocation2 + $0x50] sm:$0xff] }
  0xed   :  { %2446 = vmatpush3.bf16.msra.mxu0 %v2515_v31 }
  0xee   :  { %1245 = vmax.xlane.f32.xlu1 %v3197_v41 }
  0xf0   :  { %1243 = vmax.xlane.f32.xlu0 %v3211_v25 }
  0xf2   :  { %1249 = vmax.xlane.f32.xlu1 %v3207_v7 }
  0xf4   :  { %1247 = vmax.xlane.f32.xlu0 %v3217_v46  ;;  %v3268_v46 = vld [vmem:[#allocation2 + $0x38] sm:$0xff] }
 0x12a   :  { %v356_v51 = vpop.xlane.xlu0 %355 }
 0x12b   :  { %v3229_v27 = vmax.f32 %v3223_v49, %v356_v51 }
 0x12d   :  { %1005 = vst.msk [vmem:[#allocation2] sm:$0xff] %vm4452_vm5, %v3229_v27  ;;  %453 = vperm.xlu1 %2511, %v3229_v27  }
 0x12e   :  { %v358_v5 = vpop.xlane.xlu1 %357  ;;  %v360_v29 = vpop.xlane.xlu0 %359 }
 0x12f   :  { %v388_v23 = vmax.f32 %v340_v21, %v358_v5  ;;  %v3240_v8 = vmax.f32 %v3231_v40, %v360_v29  ;;  %v3254_v5 = vld [vmem:[#allocation2 + $0x28] sm:$0xff]  ;;  %v2516_v29 = vld [vmem:[%s4290_s0 + $0x30] ss:$8 sps:$4 sm:$0xff]  }
 0x130   :  { %2447 = vmatprep.subr.bf16.mxu0 %v2516_v29 }
 0x131   :  { %1006 = vst.msk [vmem:[#allocation2 + $0x8] sm:$0xff] %vm4453_vm10, %v388_v23  ;;  %458 = vperm.xlu0 %2510, %v388_v23   ;;  %463 = vperm.xlu1 %2511, %v3240_v8   ;;  %vm4455_vm10 = vmmov %vm4452_vm5 }
 0x132   :  { %1007 = vst.msk [vmem:[#allocation2 + $0x10] sm:$0xff] %vm4454_vm14, %v3240_v8  ;;  %v364_v37 = vpop.xlane.xlu1 %363  ;;  %v362_v38 = vpop.xlane.xlu0 %361  ;;  %2448 = vmatpush3.bf16.msra.mxu0 %v2516_v29  ;;  %vm4456_vm14 = vmmov %vm4452_vm5 }
 0x133   :  { %v391_v50 = vmax.f32 %v343_v13, %v364_v37  ;;  %v3252_v51 = vmax.f32 %v3242_v28, %v362_v38  ;;  %v404_v38 = vsub.f32 %v340_v21, %v388_v23  ;;  %2449 = vmatprep.subr.bf16.mxu0 %v2517_v48 }
 0x135   :  { %1009 = vst.msk [vmem:[#allocation2 + $0x20] sm:$0xff] %vm4452_vm5, %v391_v50  ;;  %473 = vperm.xlu0 %2510, %v391_v50   ;;  %468 = vperm.xlu1 %2511, %v3252_v51   ;;  %v421_v29 = vmul.f32 1.442695, %v404_v38 }
 0x136   :  { %1008 = vst.msk [vmem:[#allocation2 + $0x18] sm:$0xff] %vm4455_vm10, %v3252_v51  ;;  %v368_v37 = vpop.xlane.xlu1 %367  ;;  %v366_v7 = vpop.xlane.xlu0 %365  ;;  %2450 = vmatpush3.bf16.msra.mxu0 %v2517_v48  ;;  %vm4457_vm10 = vmmov %vm4452_vm5 }
 0x137   :  { %v393_v31 = vmax.f32 %v345_v4, %v368_v37  ;;  %v3264_v41 = vmax.f32 %v3254_v5, %v366_v7  ;;  %v403_v7 = vsub.f32 %v3223_v49, %v3229_v27  ;;  %v407_v37 = vsub.f32 %v343_v13, %v391_v50  ;;  %2451 = vmatprep.subr.bf16.mxu0 %v2518_v6 }
 0x138   :  { %v405_v49 = vsub.f32 %v3231_v40, %v3240_v8  ;;  %2528 = vpow2.f32 %v421_v29  ;;  %v351_v40 = vld [vmem:[#allocation2 + $0x60] sm:$0xff]  ;;  %v3300_v8 = vld [vmem:[#allocation2 + $0x58] sm:$0xff] }
 0x139   :  { %1011 = vst.msk [vmem:[#allocation2 + $0x30] sm:$0xff] %vm4456_vm14, %v393_v31  ;;  %483 = vperm.xlu0 %2510, %v393_v31   ;;  %478 = vperm.xlu1 %2511, %v3264_v41   ;;  %vm4458_vm14 = vmmov %vm4452_vm5  ;;  %v419_v48 = vmul.f32 1.442695, %v403_v7  ;;  %v409_v27 = vsub.f32 %v345_v4, %v393_v31  ;;  %v427_v38 = vmul.f32 1.442695, %v407_v37 }
 0x13a   :  { %1010 = vst.msk [vmem:[#allocation2 + $0x28] sm:$0xff] %vm4452_vm5, %v3264_v41  ;;  %v372_v21 = vpop.xlane.xlu1 %371  ;;  %v370_v23 = vpop.xlane.xlu0 %369  ;;  %2452 = vmatpush3.bf16.msra.mxu0 %v2518_v6  ;;  %v423_v7 = vmul.f32 1.442695, %v405_v49  ;;  %v406_v6 = vsub.f32 %v3242_v28, %v3252_v51 }
 0x13b   :  { %v395_v25 = vmax.f32 %v3266_v0, %v372_v21  ;;  %v3281_v55 = vmax.f32 %v3268_v46, %v370_v23  ;;  %2530 = vpow2.f32 %v419_v48  ;;  %v431_v4 = vmul.f32 1.442695, %v409_v27  ;;  %2453 = vmatprep.subr.bf16.mxu0 %v2519_v35 }
 0x13c   :  { %2532 = vpow2.f32 %v427_v38  ;;  %v425_v28 = vmul.f32 1.442695, %v406_v6 }
 0x13d   :  { %1013 = vst.msk [vmem:[#allocation2 + $0x40] sm:$0xff] %vm4457_vm10, %v395_v25  ;;  %493 = vperm.xlu0 %2510, %v395_v25   ;;  %488 = vperm.xlu1 %2511, %v3281_v55   ;;  %vm4459_vm10 = vmmov %vm4452_vm5  ;;  %v411_v37 = vsub.f32 %v3266_v0, %v395_v25  ;;  %2534 = vpow2.f32 %v423_v7  ;;  %v408_v0 = vsub.f32 %v3254_v5, %v3264_v41  ;;  %v3330_v7 = vld [vmem:[#allocation2 + $0x78] sm:$0xff] }
 0x13e   :  { %1012 = vst.msk [vmem:[#allocation2 + $0x38] sm:$0xff] %vm4458_vm14, %v3281_v55  ;;  %v376_v13 = vpop.xlane.xlu1 %375  ;;  %v374_v50 = vpop.xlane.xlu0 %373  ;;  %2454 = vmatpush3.bf16.msra.mxu0 %v2519_v35  ;;  %vm4460_vm14 = vmmov %vm4452_vm5  ;;  %2536 = vpow2.f32 %v431_v4  ;;  %v410_v6 = vsub.f32 %v3268_v46, %v3281_v55  ;;  %v3346_v46 = vld [vmem:[#allocation2 + $0x88] sm:$0xff] }
 0x13f   :  { %v397_v21 = vmax.f32 %v3283_v15, %v376_v13  ;;  %v3298_v23 = vmax.f32 %v3285_v57, %v374_v50  ;;  %v3315_v50 = vld [vmem:[#allocation2 + $0x70] sm:$0xff]  ;;  %v435_v51 = vmul.f32 1.442695, %v411_v37  ;;  %2538 = vpow2.f32 %v425_v28  ;;  %4464 = vst [vmem:[#allocation18_spill] sm:$0xff] %v3346_v46 }
 0x140   :  { %v429_v41 = vmul.f32 1.442695, %v408_v0 }
 0x141   :  { %1015 = vst.msk [vmem:[#allocation2 + $0x50] sm:$0xff] %vm4452_vm5, %v397_v21  ;;  %503 = vperm.xlu0 %2510, %v397_v21   ;;  %498 = vperm.xlu1 %2511, %v3298_v23   ;;  %v413_v48 = vsub.f32 %v3283_v15, %v397_v21  ;;  %2540 = vpow2.f32 %v435_v51 }
 0x142   :  { %1014 = vst.msk [vmem:[#allocation2 + $0x48] sm:$0xff] %vm4459_vm10, %v3298_v23  ;;  %v380_v31 = vpop.xlane.xlu1 %379  ;;  %v378_v29 = vpop.xlane.xlu0 %377  ;;  %vm4461_vm10 = vmmov %vm4452_vm5  ;;  %2542 = vpow2.f32 %v429_v41  ;;  %v3369_v41 = vld [vmem:[#allocation2 + $0x90] sm:$0xff] }
 0x143   :  { %v399_v49 = vmax.f32 %v351_v40, %v380_v31  ;;  %v3313_v13 = vmax.f32 %v3300_v8, %v378_v29  ;;  %v3332_v31 = vld [vmem:[#allocation2 + $0x80] sm:$0xff]  ;;  %v439_v4 = vmul.f32 1.442695, %v413_v48 }
 0x145   :  { %1017 = vst.msk [vmem:[#allocation2 + $0x60] sm:$0xff] %vm4460_vm14, %v399_v49  ;;  %513 = vperm.xlu0 %2510, %v399_v49   ;;  %508 = vperm.xlu1 %2511, %v3313_v13   ;;  %vm4462_vm14 = vmmov %vm4452_vm5  ;;  %v415_v15 = vsub.f32 %v351_v40, %v399_v49  ;;  %v3344_v55 = vpop.eup %2528  ;;  %v412_v49 = vsub.f32 %v3285_v57, %v3298_v23  ;;  %2544 = vpow2.f32 %v439_v4 }
 0x146   :  { %1016 = vst.msk [vmem:[#allocation2 + $0x58] sm:$0xff] %vm4452_vm5, %v3313_v13  ;;  %v382_v35 = vpop.xlane.xlu0 %381  ;;  %4463 = vst [vmem:[#allocation17_spill] sm:$0xff] %v3344_v55 }
 0x147   :  { %v400_v38 = vmax.f32 %v3317_v33, %v382_v35  ;;  %v433_v35 = vmul.f32 1.442695, %v410_v6  ;;  %v443_v28 = vmul.f32 1.442695, %v415_v15  ;;  %v414_v15 = vsub.f32 %v3300_v8, %v3313_v13 }
 0x148   :  { %v3358_v48 = vpop.eup %2530 }
 0x149   :  { %1018 = vst.msk [vmem:[#allocation2 + $0x68] sm:$0xff] %vm4462_vm14, %v400_v38  ;;  %518 = vperm.xlu1 %2511, %v400_v38   ;;  %4466 = vst [vmem:[#allocation19_spill] sm:$0xff] %v3358_v48  ;;  %v416_v6 = vsub.f32 %v3317_v33, %v400_v38  ;;  %v3367_v40 = vpop.eup %2532  ;;  %2546 = vpow2.f32 %v433_v35  ;;  %v437_v38 = vmul.f32 1.442695, %v412_v49  ;;  %v3398_v49 = vld [vmem:[#allocation2 + $0xb8] sm:$0xff] }
 0x14a   :  { %4467 = vst [vmem:[#allocation20_spill] sm:$0xff] %v3367_v40  ;;  %vm4469_vm14 = vmmov %vm4452_vm5  ;;  %v3383_v23 = vpop.eup %2534  ;;  %2548 = vpow2.f32 %v443_v28 }
 0x14b   :  { %4470 = vst [vmem:[#allocation22_spill] sm:$0xff] %v3383_v23  ;;  %4473 = vst [vmem:[#allocation25_spill] sm:$0xff] %v3398_v49  ;;  %2550 = vpow2.f32 %v437_v38  ;;  %v3424_v38 = vld [vmem:[#allocation2 + $0xc8] sm:$0xff] }
 0x14c   :  { %4479 = vst [vmem:[#allocation29_spill] sm:$0xff] %v3424_v38 }
 0x15b   :  { %v384_v25 = vpop.xlane.xlu1 %383 }
 0x15c   :  { %v3327_v27 = vmax.f32 %v3315_v50, %v384_v25  ;;  %v3348_v25 = vld [vmem:[#allocation2 + $0x98] sm:$0xff] }
 0x15d   :  { %v386_v5 = vpop.xlane.xlu0 %385 }
 0x15e   :  { %1019 = vst.msk [vmem:[#allocation2 + $0x70] sm:$0xff] %vm4461_vm10, %v3327_v27  ;;  %523 = vperm.xlu0 %2510, %v3327_v27   ;;  %v402_v29 = vmax.f32 %v3330_v7, %v386_v5  ;;  %vm4465_vm10 = vmmov %vm4452_vm5 }
 0x15f   :  { %v1220_v21 = vpop.xlane.xlu1 %1219 }
 0x160   :  { %v3342_v37 = vmax.f32 %v3332_v31, %v1220_v21  ;;  %1020 = vst.msk [vmem:[#allocation2 + $0x78] sm:$0xff] %vm4452_vm5, %v402_v29  ;;  %528 = vperm.xlu1 %2511, %v402_v29   ;;  %v418_v57 = vsub.f32 %v3330_v7, %v402_v29  ;;  %v441_v7 = vmul.f32 1.442695, %v414_v15  ;;  %v417_v29 = vsub.f32 %v3315_v50, %v3327_v27  ;;  %v3448_v27 = vld [vmem:[#allocation2 + $0xd8] sm:$0xff] }
 0x161   :  { %v1222_v0 = vpop.xlane.xlu0 %1221  ;;  %4484 = vst [vmem:[#allocation33_spill] sm:$0xff] %v3448_v27 }
 0x162   :  { %715 = vperm.xlu0 %2510, %v3344_v55   ;;  %1870 = vst.msk [vmem:[#allocation2 + $0x80] sm:$0xff] %vm4465_vm10, %v3342_v37  ;;  %v3362_v5 = vmax.f32 %v3346_v46, %v1222_v0  ;;  %v3371_v55 = vld [vmem:[#allocation2 + $0xa8] sm:$0xff]  ;;  %v3387_v0 = vpop.eup %2536  ;;  %vm4474_vm10 = vmmov %vm4452_vm5 }
 0x163   :  { %v1226_v51 = vpop.xlane.xlu1 %1225  ;;  %4468 = vst [vmem:[#allocation21_spill] sm:$0xff] %v3371_v55  ;;  %4471 = vst [vmem:[#allocation23_spill] sm:$0xff] %v3387_v0 }
 0x164   :  { %v3365_v21 = vmax.f32 %v3348_v25, %v1226_v51  ;;  %1871 = vst.msk [vmem:[#allocation2 + $0x88] sm:$0xff] %vm4469_vm14, %v3362_v5  ;;  %710 = vperm.xlu1 %2511, %v3358_v48   ;;  %v445_v51 = vmul.f32 1.442695, %v416_v6  ;;  %v3396_v48 = vld [vmem:[#allocation2 + $0xa0] sm:$0xff]  ;;  %vm4475_vm14 = vmmov %vm4452_vm5 }
 0x165   :  { %v1224_v4 = vpop.xlane.xlu0 %1223  ;;  %4472 = vst [vmem:[#allocation24_spill] sm:$0xff] %v3396_v48 }
 0x166   :  { %730 = vperm.xlu0 %2510, %v3367_v40   ;;  %1873 = vst.msk [vmem:[#allocation2 + $0x98] sm:$0xff] %vm4452_vm5, %v3365_v21  ;;  %v3391_v40 = vmax.f32 %v3369_v41, %v1224_v4  ;;  %v3412_v4 = vpop.eup %2538  ;;  %2552 = vpow2.f32 %v445_v51  ;;  %v4537_v10 = vsub.f32 %v3348_v25, %v3365_v21 }
 0x167   :  { %v1230_v35 = vpop.xlane.xlu1 %1229  ;;  %4476 = vst [vmem:[#allocation26_spill] sm:$0xff] %v3412_v4  ;;  %v3420_v13 = vpop.eup %2540  ;;  %2554 = vpow2.f32 %v441_v7 }
 0x168   :  { %v3394_v33 = vmax.f32 %v3371_v55, %v1230_v35  ;;  %1872 = vst.msk [vmem:[#allocation2 + $0x90] sm:$0xff] %vm4474_vm10, %v3391_v40  ;;  %720 = vperm.xlu1 %2511, %v3383_v23   ;;  %v449_v35 = vmul.f32 1.442695, %v418_v57  ;;  %4477 = vst [vmem:[#allocation27_spill] sm:$0xff] %v3420_v13  ;;  %v3422_v23 = vld [vmem:[#allocation2 + $0xb0] sm:$0xff]  ;;  %v3436_v51 = vpop.eup %2542 }
 0x169   :  { %v1228_v28 = vpop.xlane.xlu0 %1227  ;;  %4478 = vst [vmem:[#allocation28_spill] sm:$0xff] %v3422_v23  ;;  %vm4480_vm10 = vmmov %vm4452_vm5  ;;  %v1289_v42 = vmul.f32 1.442695, %v4537_v10 }
 0x16a   :  { %740 = vperm.xlu0 %2510, %v3387_v0   ;;  %1875 = vst.msk [vmem:[#allocation2 + $0xa8] sm:$0xff] %vm4475_vm14, %v3394_v33  ;;  %v3415_v8 = vmax.f32 %v3396_v48, %v1228_v28  ;;  %4481 = vst [vmem:[#allocation30_spill] sm:$0xff] %v3436_v51  ;;  %v447_v28 = vmul.f32 1.442695, %v417_v29  ;;  %2556 = vpow2.f32 %v449_v35 }
 0x16b   :  { %v1234_v6 = vpop.xlane.xlu1 %1233  ;;  %vm4485_vm14 = vmmov %vm4452_vm5 }
 0x16c   :  { %v3418_v0 = vmax.f32 %v3398_v49, %v1234_v6  ;;  %1874 = vst.msk [vmem:[#allocation2 + $0xa0] sm:$0xff] %vm4452_vm5, %v3415_v8  ;;  %725 = vperm.xlu1 %2511, %v3412_v4   ;;  %v3446_v4 = vld [vmem:[#allocation2 + $0xc0] sm:$0xff]  ;;  %2558 = vpow2.f32 %v447_v28  ;;  %v4542_v12 = vld [vmem:[#allocation24_spill] sm:$0xff] }
 0x16d   :  { %v1232_v57 = vpop.xlane.xlu0 %1231  ;;  %4483 = vst [vmem:[#allocation32_spill] sm:$0xff] %v3446_v4  ;;  %v4543_v59 = vsub.f32 %v4542_v12, %v3415_v8 }
 0x16e   :  { %750 = vperm.xlu0 %2510, %v3420_v13   ;;  %1877 = vst.msk [vmem:[#allocation2 + $0xb8] sm:$0xff] %vm4480_vm10, %v3418_v0  ;;  %v3439_v6 = vmax.f32 %v3422_v23, %v1232_v57  ;;  %v3444_v13 = vpop.eup %2544  ;;  %v3472_v23 = vld [vmem:[#allocation2 + $0xe8] sm:$0xff]  ;;  %vm4490_vm10 = vmmov %vm4452_vm5 }
 0x16f   :  { %v1238_v15 = vpop.xlane.xlu1 %1237  ;;  %4482 = vst [vmem:[#allocation31_spill] sm:$0xff] %v3444_v13  ;;  %v3460_v35 = vpop.eup %2546  ;;  %4489 = vst [vmem:[#allocation37_spill] sm:$0xff] %v3472_v23 }
 0x170   :  { %v3442_v50 = vmax.f32 %v3424_v38, %v1238_v15  ;;  %1876 = vst.msk [vmem:[#allocation2 + $0xb0] sm:$0xff] %vm4485_vm14, %v3439_v6  ;;  %735 = vperm.xlu1 %2511, %v3436_v51   ;;  %4486 = vst [vmem:[#allocation34_spill] sm:$0xff] %v3460_v35  ;;  %v3462_v49 = vpop.eup %2548  ;;  %v3470_v51 = vld [vmem:[#allocation2 + $0xd0] sm:$0xff] }
 0x171   :  { %v1236_v57 = vpop.xlane.xlu0 %1235  ;;  %4487 = vst [vmem:[#allocation35_spill] sm:$0xff] %v3462_v49  ;;  %4488 = vst [vmem:[#allocation36_spill] sm:$0xff] %v3470_v51  ;;  %v3484_v38 = vpop.eup %2550 }
 0x172   :  { %760 = vperm.xlu0 %2510, %v3444_v13   ;;  %1879 = vst.msk [vmem:[#allocation2 + $0xc8] sm:$0xff] %vm4452_vm5, %v3442_v50  ;;  %v3465_v7 = vmax.f32 %v3446_v4, %v1236_v57  ;;  %vm4491_vm14 = vmmov %vm4452_vm5 }
 0x173   :  { %v1242_v15 = vpop.xlane.xlu1 %1241  ;;  %4492 = vst [vmem:[#allocation38_spill] sm:$0xff] %v3484_v38  ;;  %v3492_v4 = vpop.eup %2552 }
 0x174   :  { %v3468_v13 = vmax.f32 %v3448_v27, %v1242_v15  ;;  %1878 = vst.msk [vmem:[#allocation2 + $0xc0] sm:$0xff] %vm4490_vm10, %v3465_v7  ;;  %745 = vperm.xlu1 %2511, %v3460_v35   ;;  %4495 = vst [vmem:[#allocation41_spill] sm:$0xff] %v3492_v4  ;;  %v3496_v35 = vld [vmem:[#allocation2 + $0xf8] sm:$0xff]  ;;  %v3508_v55 = vpop.eup %2554 }
 0x175   :  { %v1240_v57 = vpop.xlane.xlu0 %1239  ;;  %4497 = vst [vmem:[#allocation43_spill] sm:$0xff] %v3496_v35  ;;  %vm4498_vm10 = vmmov %vm4452_vm5 }
 0x176   :  { %770 = vperm.xlu0 %2510, %v3462_v49   ;;  %1881 = vst.msk [vmem:[#allocation2 + $0xd8] sm:$0xff] %vm4491_vm14, %v3468_v13  ;;  %v3487_v48 = vmax.f32 %v3470_v51, %v1240_v57  ;;  %v3494_v49 = vld [vmem:[#allocation2 + $0xe0] sm:$0xff]  ;;  %4499 = vst [vmem:[#allocation44_spill] sm:$0xff] %v3508_v55  ;;  %v2520_v57 = vld [vmem:[%s4290_s0 + $0x74] ss:$8 sps:$4 sm:$0xff]  }
 0x177   :  { %v1246_v15 = vpop.xlane.xlu1 %1245  ;;  %4496 = vst [vmem:[#allocation42_spill] sm:$0xff] %v3494_v49  ;;  %v3516_v51 = vpop.eup %2556  ;;  %vm4504_vm14 = vmmov %vm4452_vm5  ;;  %2471 = vmatprep.subr.bf16.mxu1 %v2520_v57 }
 0x178   :  { %4493 = vst [vmem:[#allocation39_spill] sm:$0xff] %v3487_v48  ;;  %v3490_v29 = vmax.f32 %v3472_v23, %v1246_v15  ;;  %1880 = vst.msk [vmem:[#allocation2 + $0xd0] sm:$0xff] %vm4452_vm5, %v3487_v48  ;;  %755 = vperm.xlu1 %2511, %v3484_v38   ;;  %2472 = vmatpush3.bf16.msra.mxu1 %v2520_v57  ;;  %v2522_v57 = vld [vmem:[%s4290_s0 + $0x54] ss:$8 sps:$4 sm:$0xff]  }
 0x179   :  { %v1244_v15 = vpop.xlane.xlu0 %1243  ;;  %4502 = vst [vmem:[#allocation47_spill] sm:$0xff] %v3516_v51  ;;  %v3536_v38 = vpop.eup %2558 }
 0x17a   :  { %4494 = vst [vmem:[#allocation40_spill] sm:$0xff] %v3490_v29  ;;  %775 = vperm.xlu0 %2510, %v3492_v4   ;;  %1883 = vst.msk [vmem:[#allocation2 + $0xe8] sm:$0xff] %vm4498_vm10, %v3490_v29  ;;  %v3511_v46 = vmax.f32 %v3494_v49, %v1244_v15  ;;  %v3518_v4 = vld [vmem:[#allocation2 + $0xf0] sm:$0xff] }
 0x17b   :  { %v1250_v27 = vpop.xlane.xlu1 %1249  ;;  %4503 = vst [vmem:[#allocation48_spill] sm:$0xff] %v3518_v4  ;;  %4506 = vst [vmem:[#allocation50_spill] sm:$0xff] %v3536_v38 }
 0x17c   :  { %4500 = vst [vmem:[#allocation45_spill] sm:$0xff] %v3511_v46  ;;  %v3514_v28 = vmax.f32 %v3496_v35, %v1250_v27  ;;  %1882 = vst.msk [vmem:[#allocation2 + $0xe0] sm:$0xff] %vm4504_vm14, %v3511_v46  ;;  %765 = vperm.xlu1 %2511, %v3508_v55   ;;  %v2521_v55 = vld [vmem:[%s4290_s0 + $0x64] ss:$8 sps:$4 sm:$0xff]  }
 0x17d   :  { %v1248_v15 = vpop.xlane.xlu0 %1247  ;;  %vm4507_vm10 = vmmov %vm4452_vm5  ;;  %2473 = vmatprep.subr.bf16.mxu1 %v2521_v55 }
 0x17e   :  { %4501 = vst [vmem:[#allocation46_spill] sm:$0xff] %v3514_v28  ;;  %785 = vperm.xlu0 %2510, %v3516_v51   ;;  %1885 = vst.msk [vmem:[#allocation2 + $0xf8] sm:$0xff] %vm4452_vm5, %v3514_v28  ;;  %v3534_v23 = vmax.f32 %v3518_v4, %v1248_v15  ;;  %2474 = vmatpush3.bf16.msra.mxu1 %v2521_v55  ;;  %v2523_v15 = vld [vmem:[%s4290_s0 + $0x44] ss:$8 sps:$4 sm:$0xff]   ;;  %v2524_v55 = vld [vmem:[%s4290_s0 + $0x34] ss:$8 sps:$4 sm:$0xff]  }
 0x17f   :  { %2475 = vmatprep.subr.bf16.mxu1 %v2522_v57  ;;  %vm4359_vm14 = vmpackc.low %vm2888_vm7, %vm2865_vm1 }
 0x180   :  { %4505 = vst [vmem:[#allocation49_spill] sm:$0xff] %v3534_v23  ;;  %1884 = vst.msk [vmem:[#allocation2 + $0xf0] sm:$0xff] %vm4507_vm10, %v3534_v23  ;;  %780 = vperm.xlu1 %2511, %v3536_v38  }
 0x181   :  { %vm4358_vm5 = vmpackc.low %vm2900_vm8, %vm2879_vm4 }
 0x182   :  { %1327 = vperm.xlu0 %2510, %v3391_v40   ;;  %2476 = vmatpush3.bf16.msra.mxu1 %v2522_v57  ;;  %v2525_v57 = vld [vmem:[%s4290_s0 + $0x24] ss:$8 sps:$4 sm:$0xff]   ;;  %vm4360_vm10 = vmpackc.low %vm4432_vm6, %vm4436_vm15 }
 0x183   :  { %2477 = vmatprep.subr.bf16.mxu1 %v2523_v15 }
 0x184   :  { %1317 = vperm.xlu1 %2511, %v3342_v37  }
 0x186   :  { %1337 = vperm.xlu0 %2510, %v3415_v8   ;;  %2478 = vmatpush3.bf16.msra.mxu1 %v2523_v15  ;;  %v2526_v15 = vld [vmem:[%s4290_s0 + $0x14] ss:$8 sps:$4 sm:$0xff]  }
 0x187   :  { %2479 = vmatprep.subr.bf16.mxu1 %v2524_v55 }
 0x188   :  { %1322 = vperm.xlu1 %2511, %v3362_v5  }
 0x18a   :  { %1347 = vperm.xlu0 %2510, %v3439_v6   ;;  %2480 = vmatpush3.bf16.msra.mxu1 %v2524_v55  ;;  %v2527_v55 = vld [vmem:[%s4290_s0 + $0x4] ss:$8 sps:$4 sm:$0xff]  }
 0x18b   :  { %2481 = vmatprep.subr.bf16.mxu1 %v2525_v57 }
 0x18c   :  { %1332 = vperm.xlu1 %2511, %v3365_v21  }
 0x18e   :  { %1357 = vperm.xlu0 %2510, %v3465_v7   ;;  %2482 = vmatpush3.bf16.msra.mxu1 %v2525_v57 }
 0x18f   :  { %2483 = vmatprep.subr.bf16.mxu1 %v2526_v15 }
 0x190   :  { %1342 = vperm.xlu1 %2511, %v3394_v33  }
 0x192   :  { %1367 = vperm.xlu0 %2510, %v3487_v48   ;;  %2484 = vmatpush3.bf16.msra.mxu1 %v2526_v15 }
 0x193   :  { %2485 = vmatprep.subr.bf16.mxu1 %v2527_v55 }
 0x194   :  { %1352 = vperm.xlu1 %2511, %v3418_v0  }
 0x196   :  { %1377 = vperm.xlu0 %2510, %v3511_v46   ;;  %2486 = vmatpush3.bf16.msra.mxu1 %v2527_v55 }
 0x198   :  { %1362 = vperm.xlu1 %2511, %v3442_v50  }
 0x19a   :  { %1387 = vperm.xlu0 %2510, %v3534_v23  }
 0x19c   :  { %1372 = vperm.xlu1 %2511, %v3468_v13  }
 0x1a0   :  { %1382 = vperm.xlu1 %2511, %v3490_v29  }
 0x1a4   :  { %1392 = vperm.xlu1 %2511, %v3514_v28  }
 0x1a8   :  { %v454_v57 = vpop.permute.xlu1 %453 }
 0x1a9   :  { %v531_v51 = vsub.f32 %v2877_v52, %v454_v57 }
 0x1ab   :  { %v547_v15 = vmul.f32 1.442695, %v531_v51 }
 0x1ac   :  { %v464_v27 = vpop.permute.xlu1 %463  ;;  %v459_v38 = vpop.permute.xlu0 %458 }
 0x1ad   :  { %2560 = vpow2.f32 %v547_v15  ;;  %v533_v4 = vsub.f32 %v2898_v2, %v464_v27  ;;  %v532_v35 = vsub.f32 %v2894_v1, %v459_v38 }
 0x1af   :  { %v551_v23 = vmul.f32 1.442695, %v533_v4  ;;  %v549_v46 = vmul.f32 1.442695, %v532_v35 }
 0x1b0   :  { %v469_v55 = vpop.permute.xlu1 %468  ;;  %v474_v49 = vpop.permute.xlu0 %473 }
 0x1b1   :  { %2562 = vpow2.f32 %v551_v23  ;;  %v534_v29 = vsub.f32 %v2922_v17, %v469_v55  ;;  %v535_v28 = vsub.f32 %v2918_v16, %v474_v49 }
 0x1b2   :  { %2564 = vpow2.f32 %v549_v46 }
 0x1b3   :  { %v553_v48 = vmul.f32 1.442695, %v534_v29  ;;  %v555_v52 = vmul.f32 1.442695, %v535_v28 }
 0x1b4   :  { %v479_v51 = vpop.permute.xlu1 %478  ;;  %v484_v57 = vpop.permute.xlu0 %483 }
 0x1b5   :  { %2566 = vpow2.f32 %v553_v48  ;;  %v536_v15 = vsub.f32 %v2954_v45, %v479_v51  ;;  %v537_v2 = vsub.f32 %v2950_v44, %v484_v57 }
 0x1b6   :  { %2568 = vpow2.f32 %v555_v52 }
 0x1b7   :  { %v557_v1 = vmul.f32 1.442695, %v536_v15  ;;  %v559_v4 = vmul.f32 1.442695, %v537_v2 }
 0x1b8   :  { %v489_v38 = vpop.permute.xlu1 %488  ;;  %v494_v35 = vpop.permute.xlu0 %493 }
 0x1b9   :  { %2570 = vpow2.f32 %v557_v1  ;;  %v538_v17 = vsub.f32 %v2976_v63, %v489_v38  ;;  %v539_v16 = vsub.f32 %v2972_v61, %v494_v35 }
 0x1ba   :  { %v2561_v46 = vpop.eup %2560  ;;  %2572 = vpow2.f32 %v559_v4 }
 0x1bb   :  { %v561_v23 = vmul.f32 1.442695, %v538_v17  ;;  %v563_v49 = vmul.f32 1.442695, %v539_v16  ;;  %v579_v48 = vsel %vm2865_vm1, %v2561_v46, 0.0 }
 0x1bc   :  { %v499_v45 = vpop.permute.xlu1 %498  ;;  %627 = vadd.xlane.f32.xlu0 %v579_v48  ;;  %v504_v44 = vpop.permute.xlu0 %503 }
 0x1bd   :  { %2574 = vpow2.f32 %v561_v23  ;;  %v540_v29 = vsub.f32 %v3008_v24, %v499_v45  ;;  %v541_v28 = vsub.f32 %v3004_v22, %v504_v44 }
 0x1be   :  { %v2563_v27 = vpop.eup %2562  ;;  %2576 = vpow2.f32 %v563_v49 }
 0x1bf   :  { %v2565_v63 = vpop.eup %2564  ;;  %v565_v55 = vmul.f32 1.442695, %v540_v29  ;;  %v567_v61 = vmul.f32 1.442695, %v541_v28  ;;  %v581_v52 = vsel %vm2879_vm4, %v2563_v27, 0.0 }
 0x1c0   :  { %v509_v51 = vpop.permute.xlu1 %508  ;;  %631 = vadd.xlane.f32.xlu0 %v581_v52  ;;  %v580_v24 = vsel %vm2888_vm7, %v2565_v63, 0.0  ;;  %v514_v57 = vpop.permute.xlu0 %513  ;;  %v2351_v22 = vpack.c.bf16 %v2565_v63, %v2561_v46 }
 0x1c1   :  { %2578 = vpow2.f32 %v565_v55  ;;  %v542_v15 = vsub.f32 %v3043_v54, %v509_v51  ;;  %v543_v2 = vsub.f32 %v3039_v19, %v514_v57 }
 0x1c2   :  { %v2567_v1 = vpop.eup %2566  ;;  %2580 = vpow2.f32 %v567_v61  ;;  %2455 = vmatprep.mubr.msk.bf16.mxu0 %vm4359_vm14, %v2351_v22 }
 0x1c3   :  { %v2569_v4 = vpop.eup %2568  ;;  %v569_v38 = vmul.f32 1.442695, %v542_v15  ;;  %v571_v35 = vmul.f32 1.442695, %v543_v2  ;;  %v582_v54 = vsel %vm2900_vm8, %v2567_v1, 0.0  ;;  %v2354_v19 = vpack.c.bf16 %v2567_v1, %v2563_v27 }
 0x1c4   :  { %v519_v17 = vpop.permute.xlu1 %518  ;;  %633 = vadd.xlane.f32.xlu0 %v582_v54  ;;  %v583_v16 = vsel %vm4436_vm15, %v2569_v4, 0.0 }
 0x1c5   :  { %2582 = vpow2.f32 %v569_v38  ;;  %v544_v23 = vsub.f32 %v3103_v60, %v519_v17  ;;  %2456 = vmatmul.mubr.msk.bf16.vlgmr.msra.gmra.mxu0 %vm4358_vm5, %v2354_v19  ;;  %vm4508_vm5 = vnez %v4382_v39 }
 0x1c6   :  { %v2571_v48 = vpop.eup %2570  ;;  %2584 = vpow2.f32 %v571_v35  ;;  %vm4362_vm14 = vmpackc.low %vm4508_vm5, %vm4439_vm2 }
 0x1c7   :  { %v2573_v45 = vpop.eup %2572  ;;  %v573_v44 = vmul.f32 1.442695, %v544_v23  ;;  %v584_v60 = vsel %vm4432_vm6, %v2571_v48, 0.0 }
 0x1c8   :  { %629 = vadd.xlane.f32.xlu1 %v580_v24  ;;  %637 = vadd.xlane.f32.xlu0 %v584_v60  ;;  %v585_v27 = vsel %vm4439_vm2, %v2573_v45, 0.0 }
 0x1c9   :  { %2586 = vpow2.f32 %v573_v44 }
 0x1ca   :  { %v2575_v61 = vpop.eup %2574 }
 0x1cb   :  { %v2577_v52 = vpop.eup %2576  ;;  %v586_v24 = vsel %vm4508_vm5, %v2575_v61, 0.0 }
 0x1cc   :  { %635 = vadd.xlane.f32.xlu1 %v583_v16  ;;  %641 = vadd.xlane.f32.xlu0 %v586_v24  ;;  %v587_v22 = vsel %vm4443_vm13, %v2577_v52, 0.0 }
 0x1ce   :  { %v2579_v2 = vpop.eup %2578 }
 0x1cf   :  { %v2581_v1 = vpop.eup %2580  ;;  %v2363_v38 = vpack.c.bf16 %v2579_v2, %v2577_v52 }
 0x1d0   :  { %639 = vadd.xlane.f32.xlu1 %v585_v27  ;;  %v589_v54 = vsel %vm4446_vm3, %v2581_v1, 0.0 }
 0x1d2   :  { %v2583_v17 = vpop.eup %2582 }
 0x1d3   :  { %v2585_v16 = vpop.eup %2584  ;;  %v2366_v23 = vpack.c.bf16 %v2583_v17, %v2581_v1 }
 0x1d4   :  { %643 = vadd.xlane.f32.xlu1 %v587_v22 }
 0x1d6   :  { %v2587_v44 = vpop.eup %2586 }
 0x1d7   :  { %v592_v60 = vsel %vm3026_vm0, %v2587_v44, 0.0 }
 0x1d8   :  { %647 = vadd.xlane.f32.xlu1 %v589_v54 }
 0x1d9   :  { %v524_v46 = vpop.permute.xlu0 %523 }
 0x1da   :  { %v545_v49 = vsub.f32 %v3099_v32, %v524_v46  ;;  %v2357_v32 = vpack.c.bf16 %v2571_v48, %v2569_v4  ;;  %v591_v48 = vsel %vm4449_vm11, %v2585_v16, 0.0 }
 0x1db   :  { %v529_v28 = vpop.permute.xlu1 %528 }
 0x1dc   :  { %v575_v29 = vmul.f32 1.442695, %v545_v49  ;;  %v546_v55 = vsub.f32 %v3124_v47, %v529_v28  ;;  %2459 = vmatprep.mubr.msk.bf16.mxu0 %vm4360_vm10, %v2357_v32  ;;  %v2360_v47 = vpack.c.bf16 %v2575_v61, %v2573_v45  ;;  %vm4509_vm10 = vnez %v4386_v58  ;;  %651 = vadd.xlane.f32.xlu1 %v591_v48 }
 0x1dd   :  { %v3631_v63 = vpop.permute.xlu0 %715  ;;  %vm4364_vm6 = vmpackc.low %vm4509_vm10, %vm4443_vm13  ;;  %v588_v4 = vsel %vm4509_vm10, %v2579_v2, 0.0  ;;  %v2369_v32 = vpack.c.bf16 %v2587_v44, %v2585_v16  ;;  %v4534_v58 = vsub.f32 %v3332_v31, %v3342_v37 }
 0x1de   :  { %2588 = vpow2.f32 %v575_v29  ;;  %v577_v51 = vmul.f32 1.442695, %v546_v55  ;;  %2460 = vmatmul.mubr.msk.bf16.gmra.mxu0 %vm4362_vm14, %v2360_v47  ;;  %645 = vadd.xlane.f32.xlu0 %v588_v4  ;;  %vm4510_vm14 = vnez %v4392_v26  ;;  %v4535_v26 = vsub.f32 %v3369_v41, %v3391_v40 }
 0x1df   :  { %v3645_v57 = vpop.permute.xlu1 %710  ;;  %2463 = vmatprep.mubr.msk.bf16.mxu0 %vm4364_vm6, %v2363_v38  ;;  %vm4365_vm5 = vmpackc.low %vm4510_vm14, %vm4446_vm3  ;;  %v590_v46 = vsel %vm4510_vm14, %v2583_v17, 0.0 }
 0x1e0   :  { %2590 = vpow2.f32 %v577_v51  ;;  %vm2368_vm6 = vmpackc.low %vm3026_vm0, %vm4449_vm11  ;;  %v1287_v31 = vmul.f32 1.442695, %v4535_v26 }
 0x1e1   :  { %v3649_v15 = vpop.permute.xlu0 %730 }
 0x1e2   :  { %649 = vadd.xlane.f32.xlu0 %v590_v46 }
 0x1e3   :  { %v3662_v35 = vpop.permute.xlu1 %720 }
 0x1e5   :  { %v3666_v19 = vpop.permute.xlu0 %740 }
 0x1e6   :  { %2464 = vmatmul.mubr.msk.bf16.gmra.mxu0 %vm4365_vm5, %v2366_v23  ;;  %653 = vadd.xlane.f32.xlu0 %v592_v60  ;;  %vm4366_vm5 = vmpackc.low %vm3108_vm9, %vm3083_vm12 }
 0x1e7   :  { %v3679_v49 = vpop.permute.xlu1 %725  ;;  %2467 = vmatprep.mubr.msk.bf16.mxu0 %vm2368_vm6, %v2369_v32 }
 0x1e9   :  { %v3683_v45 = vpop.permute.xlu0 %750 }
 0x1eb   :  { %v2589_v29 = vpop.eup %2588  ;;  %v3696_v28 = vpop.permute.xlu1 %735 }
 0x1ec   :  { %v593_v27 = vsel %vm3083_vm12, %v2589_v29, 0.0 }
 0x1ed   :  { %v3700_v55 = vpop.permute.xlu0 %760  ;;  %655 = vadd.xlane.f32.xlu1 %v593_v27  ;;  %v2591_v61 = vpop.eup %2590 }
 0x1ee   :  { %v594_v52 = vsel %vm3108_vm9, %v2591_v61, 0.0  ;;  %v2372_v51 = vpack.c.bf16 %v2591_v61, %v2589_v29 }
 0x1ef   :  { %v3713_v24 = vpop.permute.xlu1 %745  ;;  %657 = vadd.xlane.f32.xlu0 %v594_v52  ;;  %v4514_v52 = vld [vmem:[#allocation9_spill] sm:$0xff] }
 0x1f0   :  { %2468 = vmatmul.mubr.msk.bf16.gmra.mxu0 %vm4366_vm5, %v2372_v51  ;;  %vm4524_vm5 = vmpackc.low %vm2888_vm7, %vm2865_vm1 }
 0x1f1   :  { %v3715_v47 = vpop.permute.xlu0 %770 }
 0x1f3   :  { %v3722_v22 = vpop.permute.xlu1 %755 }
 0x1f5   :  { %v3724_v2 = vpop.permute.xlu0 %775 }
 0x1f7   :  { %v3726_v1 = vpop.permute.xlu1 %765 }
 0x1f8   :  { %4511 = vst [vmem:[#allocation51_spill] sm:$0xff] %v3726_v1 }
 0x1f9   :  { %v3728_v4 = vpop.permute.xlu0 %785 }
 0x1fa   :  { %4512 = vst [vmem:[#allocation52_spill] sm:$0xff] %v3728_v4 }
 0x1fb   :  { %v3730_v38 = vpop.permute.xlu1 %780 }
 0x1fc   :  { %4513 = vst [vmem:[#allocation53_spill] sm:$0xff] %v3730_v38 }
 0x1fd   :  { %v1328_v54 = vpop.permute.xlu0 %1327 }
 0x1fe   :  { %v1397_v17 = vsub.f32 %v3146_v56, %v1328_v54  ;;  %v4515_v54 = vld [vmem:[#allocation5_spill] sm:$0xff] }
 0x1ff   :  { %v1318_v16 = vpop.permute.xlu1 %1317 }
 0x200   :  { %v1395_v23 = vsub.f32 %v3117_v14, %v1318_v16  ;;  %v1415_v48 = vmul.f32 1.442695, %v1397_v17 }
 0x201   :  { %v1338_v46 = vpop.permute.xlu0 %1337 }
 0x202   :  { %v1399_v44 = vsub.f32 %v3164_v36, %v1338_v46  ;;  %v1411_v29 = vmul.f32 1.442695, %v1395_v23  ;;  %v4516_v36 = vld [vmem:[#allocation11_spill] sm:$0xff] }
 0x203   :  { %v1323_v60 = vpop.permute.xlu1 %1322 }
 0x204   :  { %2592 = vpow2.f32 %v1411_v29  ;;  %v1396_v27 = vsub.f32 %v3138_v20, %v1323_v60  ;;  %v1419_v61 = vmul.f32 1.442695, %v1399_v44  ;;  %v4517_v29 = vld [vmem:[#allocation6_spill] sm:$0xff] }
 0x205   :  { %v1348_v32 = vpop.permute.xlu0 %1347  ;;  %2594 = vpow2.f32 %v1415_v48  ;;  %v4518_v48 = vld [vmem:[#allocation13_spill] sm:$0xff] }
 0x206   :  { %v1401_v51 = vsub.f32 %v4514_v52, %v1348_v32  ;;  %v1413_v38 = vmul.f32 1.442695, %v1396_v27 }
 0x207   :  { %v1333_v4 = vpop.permute.xlu1 %1332 }
 0x208   :  { %2596 = vpow2.f32 %v1413_v38  ;;  %v1398_v1 = vsub.f32 %v4515_v54, %v1333_v4  ;;  %v1423_v14 = vmul.f32 1.442695, %v1401_v51  ;;  %v4519_v38 = vld [vmem:[#allocation7_spill] sm:$0xff] }
 0x209   :  { %v1358_v56 = vpop.permute.xlu0 %1357  ;;  %2598 = vpow2.f32 %v1419_v61 }
 0x20a   :  { %v1417_v17 = vmul.f32 1.442695, %v1398_v1  ;;  %v1403_v16 = vsub.f32 %v4516_v36, %v1358_v56  ;;  %v4520_v1 = vld [vmem:[#allocation15_spill] sm:$0xff] }
 0x20b   :  { %v1343_v46 = vpop.permute.xlu1 %1342 }
 0x20c   :  { %2600 = vpow2.f32 %v1417_v17  ;;  %v1400_v20 = vsub.f32 %v4517_v29, %v1343_v46  ;;  %v1427_v60 = vmul.f32 1.442695, %v1403_v16  ;;  %v4521_v16 = vld [vmem:[#allocation8_spill] sm:$0xff] }
 0x20d   :  { %v1368_v23 = vpop.permute.xlu0 %1367  ;;  %2602 = vpow2.f32 %v1423_v14 }
 0x20e   :  { %v1405_v44 = vsub.f32 %v4518_v48, %v1368_v23  ;;  %v1421_v32 = vmul.f32 1.442695, %v1400_v20 }
 0x20f   :  { %v1353_v27 = vpop.permute.xlu1 %1352 }
 0x210   :  { %2604 = vpow2.f32 %v1421_v32  ;;  %v1402_v4 = vsub.f32 %v4519_v38, %v1353_v27  ;;  %v1431_v51 = vmul.f32 1.442695, %v1405_v44  ;;  %v4522_v27 = vld [vmem:[#allocation16_spill] sm:$0xff] }
 0x211   :  { %v1378_v52 = vpop.permute.xlu0 %1377  ;;  %v2593_v61 = vpop.eup %2592  ;;  %2606 = vpow2.f32 %v1427_v60 }
 0x212   :  { %v1407_v54 = vsub.f32 %v4520_v1, %v1378_v52  ;;  %v2595_v56 = vpop.eup %2594  ;;  %v1425_v36 = vmul.f32 1.442695, %v1402_v4  ;;  %v1443_v17 = vsel %vm2865_vm1, %v2593_v61, 0.0  ;;  %v4523_v1 = vld [vmem:[#allocation10_spill] sm:$0xff]  ;;  %vm4526_vm1 = vmpackc.low %vm2900_vm8, %vm2879_vm4 }
 0x213   :  { %v1363_v14 = vpop.permute.xlu1 %1362  ;;  %1492 = vadd.xlane.f32.xlu0 %v1443_v17  ;;  %v1445_v48 = vsel %vm2879_vm4, %v2595_v56, 0.0 }
 0x214   :  { %2608 = vpow2.f32 %v1425_v36  ;;  %v1404_v23 = vsub.f32 %v4521_v16, %v1363_v14  ;;  %v1435_v20 = vmul.f32 1.442695, %v1407_v54 }
 0x215   :  { %v1388_v46 = vpop.permute.xlu0 %1387  ;;  %v2597_v29 = vpop.eup %2596  ;;  %2610 = vpow2.f32 %v1431_v51 }
 0x216   :  { %v2599_v44 = vpop.eup %2598  ;;  %v1429_v32 = vmul.f32 1.442695, %v1404_v23  ;;  %v1409_v60 = vsub.f32 %v4522_v27, %v1388_v46  ;;  %v1444_v52 = vsel %vm2888_vm7, %v2597_v29, 0.0  ;;  %v2384_v38 = vpack.c.bf16 %v2597_v29, %v2593_v61 }
 0x217   :  { %v1373_v4 = vpop.permute.xlu1 %1372  ;;  %1494 = vadd.xlane.f32.xlu1 %v1444_v52  ;;  %1496 = vadd.xlane.f32.xlu0 %v1445_v48  ;;  %v1447_v54 = vsel %vm4436_vm15, %v2599_v44, 0.0  ;;  %vm4527_vm7 = vnez %v4378_v18 }
 0x218   :  { %2612 = vpow2.f32 %v1429_v32  ;;  %v1406_v36 = vsub.f32 %v4523_v1, %v1373_v4  ;;  %2487 = vmatprep.mubr.msk.bf16.mxu1 %vm4524_vm5, %v2384_v38  ;;  %v1439_v14 = vmul.f32 1.442695, %v1409_v60  ;;  %vm4529_vm4 = vmpackc.low %vm4527_vm7, %vm4436_vm15 }
 0x219   :  { %v2601_v51 = vpop.eup %2600  ;;  %2614 = vpow2.f32 %v1435_v20  ;;  %vm4532_vm15 = vmpackc.low %vm4509_vm10, %vm4443_vm13 }
 0x21a   :  { %v2603_v17 = vpop.eup %2602  ;;  %v1433_v61 = vmul.f32 1.442695, %v1406_v36  ;;  %v1446_v46 = vsel %vm2900_vm8, %v2601_v51, 0.0  ;;  %v2387_v16 = vpack.c.bf16 %v2601_v51, %v2595_v56  ;;  %vm4530_vm8 = vnez %v4382_v39 }
 0x21b   :  { %v1383_v23 = vpop.permute.xlu1 %1382  ;;  %1498 = vadd.xlane.f32.xlu0 %v1446_v46  ;;  %1500 = vadd.xlane.f32.xlu1 %v1447_v54  ;;  %v1449_v20 = vsel %vm4439_vm2, %v2603_v17, 0.0  ;;  %vm4531_vm5 = vmpackc.low %vm4530_vm8, %vm4439_vm2 }
 0x21c   :  { %2616 = vpow2.f32 %v1433_v61  ;;  %v1408_v43 = vsub.f32 %v4525_v62, %v1383_v23  ;;  %2488 = vmatmul.mubr.msk.bf16.vlgmr.msra.gmra.mxu1 %vm4526_vm1, %v2387_v16  ;;  %vm4533_vm2 = vmpackc.low %vm4510_vm14, %vm4446_vm3  ;;  %v1283_v16 = vmul.f32 1.442695, %v4534_v58 }
 0x21d   :  { %v2605_v29 = vpop.eup %2604  ;;  %2618 = vpow2.f32 %v1439_v14 }
 0x21e   :  { %v1437_v48 = vmul.f32 1.442695, %v1408_v43  ;;  %v1448_v56 = vsel %vm4527_vm7, %v2605_v29, 0.0  ;;  %v2390_v32 = vpack.c.bf16 %v2605_v29, %v2599_v44  ;;  %v2607_v27 = vpop.eup %2606 }
 0x21f   :  { %v1393_v60 = vpop.permute.xlu1 %1392  ;;  %1502 = vadd.xlane.f32.xlu0 %v1448_v56  ;;  %1504 = vadd.xlane.f32.xlu1 %v1449_v20  ;;  %v1451_v44 = vsel %vm4443_vm13, %v2607_v27, 0.0  ;;  %vm4536_vm13 = vmpackc.low %vm3108_vm9, %vm3083_vm12  ;;  %v4538_v20 = vld [vmem:[#allocation18_spill] sm:$0xff] }
 0x220   :  { %2620 = vpow2.f32 %v1437_v48  ;;  %v1410_v52 = vsub.f32 %v4528_v3, %v1393_v60  ;;  %2491 = vmatprep.mubr.msk.bf16.mxu1 %vm4529_vm4, %v2390_v32  ;;  %v4539_v40 = vsub.f32 %v4538_v20, %v3362_v5  ;;  %v4540_v48 = vld [vmem:[#allocation21_spill] sm:$0xff]  ;;  %v4546_v5 = vld [vmem:[#allocation28_spill] sm:$0xff] }
 0x221   :  { %v2609_v53 = vpop.eup %2608  ;;  %v4541_v56 = vsub.f32 %v4540_v48, %v3394_v33  ;;  %v4544_v60 = vld [vmem:[#allocation25_spill] sm:$0xff] }
 0x222   :  { %v2611_v38 = vpop.eup %2610  ;;  %v1441_v4 = vmul.f32 1.442695, %v1410_v52  ;;  %v1450_v1 = vsel %vm4530_vm8, %v2609_v53, 0.0  ;;  %v2393_v36 = vpack.c.bf16 %v2609_v53, %v2603_v17  ;;  %v1285_v41 = vmul.f32 1.442695, %v4539_v40  ;;  %v4548_v33 = vld [vmem:[#allocation29_spill] sm:$0xff] }
 0x223   :  { %1506 = vadd.xlane.f32.xlu0 %v1450_v1  ;;  %1508 = vadd.xlane.f32.xlu1 %v1451_v44  ;;  %v1453_v54 = vsel %vm4446_vm3, %v2611_v38, 0.0  ;;  %v1293_v32 = vmul.f32 1.442695, %v4541_v56  ;;  %v4545_v3 = vsub.f32 %v4544_v60, %v3418_v0  ;;  %v4547_v52 = vsub.f32 %v4546_v5, %v3439_v6  ;;  %v4550_v1 = vld [vmem:[#allocation32_spill] sm:$0xff]  ;;  %v595_v48 = vld [vmem:[#allocation3] sm:$0xff]  ;;  %v597_v60 = vld [vmem:[#allocation3 + $0x10] sm:$0xff] }
 0x224   :  { %2622 = vpow2.f32 %v1441_v4  ;;  %2492 = vmatmul.mubr.msk.bf16.gmra.mxu1 %vm4531_vm5, %v2393_v36  ;;  %v4551_v0 = vsub.f32 %v4550_v1, %v3465_v7  ;;  %v4552_v36 = vld [vmem:[#allocation33_spill] sm:$0xff] }
 0x225   :  { %v2613_v11 = vpop.eup %2612  ;;  %2624 = vpow2.f32 %v1283_v16  ;;  %v1297_v25 = vmul.f32 1.442695, %v4545_v3  ;;  %v1295_v53 = vmul.f32 1.442695, %v4547_v52  ;;  %v4553_v6 = vsub.f32 %v4552_v36, %v3468_v13  ;;  %v4557_v7 = vld [vmem:[#allocation37_spill] sm:$0xff]  ;;  %v4571_v52 = vld [vmem:[#allocation22_spill] sm:$0xff] }
 0x226   :  { %v2615_v18 = vpop.eup %2614  ;;  %v1452_v51 = vsel %vm4509_vm10, %v2613_v11, 0.0  ;;  %v2396_v14 = vpack.c.bf16 %v2613_v11, %v2607_v27  ;;  %2626 = vpow2.f32 %v1287_v31  ;;  %v1291_v27 = vmul.f32 1.442695, %v4543_v59 }
 0x227   :  { %1510 = vadd.xlane.f32.xlu0 %v1452_v51  ;;  %1512 = vadd.xlane.f32.xlu1 %v1453_v54  ;;  %v1455_v17 = vsel %vm4449_vm11, %v2615_v18, 0.0  ;;  %2628 = vpow2.f32 %v1289_v42  ;;  %v1299_v44 = vmul.f32 1.442695, %v4551_v0  ;;  %v1305_v11 = vmul.f32 1.442695, %v4553_v6  ;;  %v4554_v51 = vld [vmem:[#allocation36_spill] sm:$0xff] }
 0x228   :  { %2495 = vmatprep.mubr.msk.bf16.mxu1 %vm4532_vm15, %v2396_v14  ;;  %2630 = vpow2.f32 %v1285_v41  ;;  %v598_v0 = vld [vmem:[#allocation3 + $0x18] sm:$0xff]  ;;  %v599_v6 = vld [vmem:[#allocation3 + $0x20] sm:$0xff] }
 0x229   :  { %v2617_v34 = vpop.eup %2616  ;;  %2632 = vpow2.f32 %v1293_v32  ;;  %v4569_v32 = vld [vmem:[#allocation19_spill] sm:$0xff] }
 0x22a   :  { %v1454_v39 = vsel %vm4510_vm14, %v2617_v34, 0.0  ;;  %v2399_v61 = vpack.c.bf16 %v2617_v34, %v2611_v38  ;;  %v2619_v46 = vpop.eup %2618  ;;  %2634 = vpow2.f32 %v1291_v27  ;;  %v4549_v38 = vsub.f32 %v4548_v33, %v3442_v50  ;;  %v4555_v50 = vld [vmem:[#allocation39_spill] sm:$0xff] }
 0x22b   :  { %1514 = vadd.xlane.f32.xlu0 %v1454_v39  ;;  %1516 = vadd.xlane.f32.xlu1 %v1455_v17  ;;  %v1457_v62 = vsel %vm3083_vm12, %v2619_v46, 0.0  ;;  %2636 = vpow2.f32 %v1297_v25  ;;  %v4556_v54 = vsub.f32 %v4554_v51, %v4555_v50  ;;  %v4558_v39 = vld [vmem:[#allocation40_spill] sm:$0xff]  ;;  %v611_v12 = vmul.f32 %v4569_v32, %v595_v48  ;;  %v596_v25 = vld [vmem:[#allocation3 + $0x8] sm:$0xff] }
 0x22c   :  { %2496 = vmatmul.mubr.msk.bf16.gmra.mxu1 %vm4533_vm2, %v2399_v61  ;;  %v1301_v8 = vmul.f32 1.442695, %v4549_v38  ;;  %2638 = vpow2.f32 %v1295_v53  ;;  %v4559_v17 = vsub.f32 %v4557_v7, %v4558_v39  ;;  %v613_v53 = vmul.f32 %v4571_v52, %v597_v60  ;;  %v4572_v38 = vld [vmem:[#allocation17_spill] sm:$0xff]  ;;  %v4574_v50 = vld [vmem:[#allocation26_spill] sm:$0xff]  ;;  %v4576_v7 = vld [vmem:[#allocation20_spill] sm:$0xff] }
 0x22d   :  { %v2621_v30 = vpop.eup %2620  ;;  %v1303_v14 = vmul.f32 1.442695, %v4556_v54  ;;  %v614_v54 = vmul.f32 %v4574_v50, %v598_v0  ;;  %v615_v39 = vmul.f32 %v4576_v7, %v599_v6  ;;  %v4582_v52 = vld [vmem:[#allocation34_spill] sm:$0xff] }
 0x22e   :  { %v1456_v23 = vsel %vm3026_vm0, %v2621_v30, 0.0  ;;  %v2402_v43 = vpack.c.bf16 %v2621_v30, %v2615_v18  ;;  %2640 = vpow2.f32 %v1301_v8  ;;  %v1309_v61 = vmul.f32 1.442695, %v4559_v17  ;;  %v4561_v30 = vld [vmem:[#allocation45_spill] sm:$0xff] }
 0x22f   :  { %1518 = vadd.xlane.f32.xlu0 %v1456_v23  ;;  %1520 = vadd.xlane.f32.xlu1 %v1457_v62  ;;  %2642 = vpow2.f32 %v1299_v44  ;;  %v4563_v62 = vld [vmem:[#allocation43_spill] sm:$0xff]  ;;  %vm4570_vm0 = vcmask 7168   ;;  %v612_v8 = vmul.f32 %v4572_v38, %v596_v25 }
 0x230   :  { %2499 = vmatprep.mubr.msk.bf16.mxu1 %vm2368_vm6, %v2402_v43  ;;  %2644 = vpow2.f32 %v1305_v11  ;;  %v4564_v43 = vld [vmem:[#allocation46_spill] sm:$0xff]  ;;  %vm4573_vm12 = vmmov %vm4570_vm0 }
 0x231   :  { %v2623_v9 = vpop.eup %2622  ;;  %2646 = vpow2.f32 %v1303_v14  ;;  %vm4577_vm6 = vmmov %vm4570_vm0 }
 0x232   :  { %v1458_v37 = vsel %vm3108_vm9, %v2623_v9, 0.0  ;;  %v2405_v29 = vpack.c.bf16 %v2623_v9, %v2619_v46  ;;  %v3841_v21 = vpop.eup %2624  ;;  %v4560_v46 = vld [vmem:[#allocation42_spill] sm:$0xff]  ;;  %2648 = vpow2.f32 %v1309_v61  ;;  %v4565_v9 = vsub.f32 %v4563_v62, %v4564_v43  ;;  %vm4575_vm9 = vmmov %vm4570_vm0 }
 0x233   :  { %1522 = vadd.xlane.f32.xlu0 %v1458_v37  ;;  %v3850_v4 = vpop.eup %2626  ;;  %v4562_v58 = vsub.f32 %v4560_v46, %v4561_v30  ;;  %v4566_v37 = vld [vmem:[#allocation48_spill] sm:$0xff]  ;;  %v600_v61 = vld [vmem:[#allocation3 + $0x28] sm:$0xff]  ;;  %vm4579_vm11 = vmmov %vm4570_vm0 }
 0x234   :  { %2500 = vmatmul.mubr.msk.bf16.gmra.mxu1 %vm4536_vm13, %v2405_v29  ;;  %v3859_v18 = vpop.eup %2628  ;;  %v1313_v26 = vmul.f32 1.442695, %v4565_v9  ;;  %v4567_v29 = vld [vmem:[#allocation49_spill] sm:$0xff]  ;;  %v4578_v9 = vld [vmem:[#allocation30_spill] sm:$0xff]  ;;  %vm4581_vm3 = vmmov %vm4570_vm0 }
 0x235   :  { %v3864_v34 = vpop.eup %2630  ;;  %v1307_v16 = vmul.f32 1.442695, %v4562_v58  ;;  %v4568_v10 = vsub.f32 %v4566_v37, %v4567_v29  ;;  %v601_v58 = vld [vmem:[#allocation3 + $0x30] sm:$0xff]  ;;  %vm4583_vm14 = vmmov %vm4570_vm0 }
 0x236   :  { %v3871_v13 = vpop.eup %2632  ;;  %v4580_v37 = vld [vmem:[#allocation23_spill] sm:$0xff]  ;;  %vm4585_vm10 = vmmov %vm4570_vm0 }
 0x237   :  { %v3876_v23 = vpop.eup %2634  ;;  %2650 = vpow2.f32 %v1307_v16  ;;  %v1311_v42 = vmul.f32 1.442695, %v4568_v10  ;;  %v617_v29 = vmul.f32 %v4580_v37, %v601_v58  ;;  %vm4587_vm1 = vmmov %vm4570_vm0 }
 0x238   :  { %v3883_v31 = vpop.eup %2636  ;;  %2652 = vpow2.f32 %v1313_v26  ;;  %v616_v26 = vmul.f32 %v4578_v9, %v600_v61  ;;  %vm4589_vm7 = vmmov %vm4570_vm0 }
 0x239   :  { %v3888_v20 = vpop.eup %2638  ;;  %2654 = vpow2.f32 %v1311_v42  ;;  %v602_v42 = vld [vmem:[#allocation3 + $0x38] sm:$0xff]  ;;  %vm4591_vm4 = vmmov %vm4570_vm0 }
 0x23a   :  { %vm4593_vm8 = vmmov %vm4570_vm0 }
 0x23b   :  { %v3892_v40 = vpop.eup %2640  ;;  %vm4595_vm5 = vmmov %vm4570_vm0 }
 0x23c   :  { %v3894_v41 = vpop.eup %2642  ;;  %vm4597_vm15 = vmmov %vm4570_vm0 }
 0x23d   :  { %v3898_v56 = vpop.eup %2644  ;;  %vm4599_vm2 = vmmov %vm4570_vm0 }
 0x23e   :  { %v3901_v59 = vpop.eup %2646  ;;  %vm4600_vm13 = vmmov %vm4570_vm0 }
 0x23f   :  { %v3905_v5 = vpop.eup %2648 }
 0x240   :  { %1575 = vperm.xlu1 %2511, %v3841_v21  }
 0x244   :  { %1585 = vperm.xlu1 %2511, %v3850_v4   ;;  %v3909_v33 = vpop.eup %2650 }
 0x245   :  { %v628_v27 = vpop.xlane.xlu0 %627  ;;  %v3914_v51 = vpop.eup %2652 }
 0x246   :  { %v659_v3 = vadd.f32 %v628_v27, %v611_v12  ;;  %v3918_v14 = vpop.eup %2654  ;;  %v603_v12 = vld [vmem:[#allocation3 + $0x40] sm:$0xff] }
 0x248   :  { %1590 = vperm.xlu1 %2511, %v3859_v18   ;;  %676 = vst.msk [vmem:[#allocation3] sm:$0xff] %vm4570_vm0, %v659_v3 }
 0x249   :  { %1580 = vperm.xlu0 %2510, %v3864_v34   ;;  %v632_v1 = vpop.xlane.xlu0 %631 }
 0x24a   :  { %v661_v36 = vadd.f32 %v632_v1, %v613_v53  ;;  %v618_v53 = vmul.f32 %v4582_v52, %v602_v42 }
 0x24c   :  { %1600 = vperm.xlu1 %2511, %v3871_v13   ;;  %678 = vst.msk [vmem:[#allocation3 + $0x10] sm:$0xff] %vm4573_vm12, %v661_v36  ;;  %vm4601_vm12 = vmmov %vm4570_vm0 }
 0x24d   :  { %1595 = vperm.xlu0 %2510, %v3876_v23   ;;  %v634_v17 = vpop.xlane.xlu0 %633 }
 0x24e   :  { %v662_v30 = vadd.f32 %v634_v17, %v614_v54  ;;  %v4586_v17 = vld [vmem:[#allocation38_spill] sm:$0xff] }
 0x24f   :  { %v1905_v16 = vld [vmem:[#allocation3] sm:$0xff] }
 0x250   :  { %1610 = vperm.xlu1 %2511, %v3883_v31   ;;  %v1921_v43 = vadd.f32 1e-16, %v1905_v16  ;;  %679 = vst.msk [vmem:[#allocation3 + $0x18] sm:$0xff] %vm4577_vm6, %v662_v30  ;;  %v4588_v30 = vld [vmem:[#allocation31_spill] sm:$0xff]  ;;  %vm4603_vm6 = vmmov %vm4570_vm0 }
 0x251   :  { %1605 = vperm.xlu0 %2510, %v3888_v20   ;;  %v630_v44 = vpop.xlane.xlu1 %629  ;;  %v638_v10 = vpop.xlane.xlu0 %637 }
 0x252   :  { %v660_v11 = vadd.f32 %v630_v44, %v612_v8  ;;  %2656 = vrcp.f32 %v1921_v43  ;;  %v664_v32 = vadd.f32 %v638_v10, %v616_v26  ;;  %v4584_v8 = vld [vmem:[#allocation27_spill] sm:$0xff]  ;;  %v604_v44 = vld [vmem:[#allocation3 + $0x48] sm:$0xff]  ;;  %v607_v26 = vld [vmem:[#allocation3 + $0x60] sm:$0xff] }
 0x253   :  { %v1907_v27 = vld [vmem:[#allocation3 + $0x10] sm:$0xff]  ;;  %v619_v1 = vmul.f32 %v4584_v8, %v603_v12  ;;  %v620_v61 = vmul.f32 %v4586_v17, %v604_v44  ;;  %v610_v17 = vld [vmem:[#allocation3 + $0x78] sm:$0xff] }
 0x254   :  { %1620 = vperm.xlu1 %2511, %v3892_v40   ;;  %677 = vst.msk [vmem:[#allocation3 + $0x8] sm:$0xff] %vm4575_vm9, %v660_v11  ;;  %v1923_v25 = vadd.f32 1e-16, %v1907_v27  ;;  %v605_v11 = vld [vmem:[#allocation3 + $0x50] sm:$0xff]  ;;  %vm4602_vm9 = vmmov %vm4570_vm0 }
 0x255   :  { %1615 = vperm.xlu0 %2510, %v3894_v41   ;;  %v636_v46 = vpop.xlane.xlu1 %635  ;;  %681 = vst.msk [vmem:[#allocation3 + $0x28] sm:$0xff] %vm4581_vm3, %v664_v32  ;;  %v642_v0 = vpop.xlane.xlu0 %641  ;;  %v621_v58 = vmul.f32 %v4588_v30, %v605_v11  ;;  %v4592_v27 = vld [vmem:[#allocation35_spill] sm:$0xff]  ;;  %vm4605_vm3 = vmmov %vm4570_vm0 }
 0x256   :  { %v663_v62 = vadd.f32 %v636_v46, %v615_v39  ;;  %2658 = vrcp.f32 %v1923_v25  ;;  %v666_v6 = vadd.f32 %v642_v0, %v618_v53  ;;  %v608_v25 = vld [vmem:[#allocation3 + $0x68] sm:$0xff] }
 0x257   :  { %v1908_v50 = vld [vmem:[#allocation3 + $0x18] sm:$0xff] }
 0x258   :  { %1630 = vperm.xlu1 %2511, %v3898_v56   ;;  %680 = vst.msk [vmem:[#allocation3 + $0x20] sm:$0xff] %vm4579_vm11, %v663_v62  ;;  %v1924_v39 = vadd.f32 1e-16, %v1908_v50  ;;  %v606_v62 = vld [vmem:[#allocation3 + $0x58] sm:$0xff]  ;;  %vm4604_vm11 = vmmov %vm4570_vm0 }
 0x259   :  { %1625 = vperm.xlu0 %2510, %v3901_v59   ;;  %v640_v48 = vpop.xlane.xlu1 %639  ;;  %683 = vst.msk [vmem:[#allocation3 + $0x38] sm:$0xff] %vm4585_vm10, %v666_v6  ;;  %v4594_v6 = vld [vmem:[#allocation41_spill] sm:$0xff]  ;;  %vm4607_vm10 = vmmov %vm4570_vm0 }
 0x25a   :  { %v665_v60 = vadd.f32 %v640_v48, %v617_v29  ;;  %v4590_v48 = vld [vmem:[#allocation44_spill] sm:$0xff]  ;;  %v624_v11 = vmul.f32 %v4594_v6, %v608_v25 }
 0x25b   :  { %v1906_v3 = vld [vmem:[#allocation3 + $0x8] sm:$0xff]  ;;  %v622_v32 = vmul.f32 %v4590_v48, %v606_v62 }
 0x25c   :  { %1640 = vperm.xlu1 %2511, %v3905_v5   ;;  %v1922_v38 = vadd.f32 1e-16, %v1906_v3  ;;  %682 = vst.msk [vmem:[#allocation3 + $0x30] sm:$0xff] %vm4583_vm14, %v665_v60  ;;  %v1910_v37 = vld [vmem:[#allocation3 + $0x28] sm:$0xff]  ;;  %v623_v60 = vmul.f32 %v4592_v27, %v607_v26  ;;  %v4598_v26 = vld [vmem:[#allocation47_spill] sm:$0xff]  ;;  %vm4606_vm14 = vmmov %vm4570_vm0 }
 0x25d   :  { %1635 = vperm.xlu0 %2510, %v3909_v33   ;;  %v644_v36 = vpop.xlane.xlu1 %643  ;;  %v1926_v42 = vadd.f32 1e-16, %v1910_v37  ;;  %v626_v37 = vmul.f32 %v4598_v26, %v610_v17 }
 0x25e   :  { %2660 = vrcp.f32 %v1922_v38  ;;  %v667_v54 = vadd.f32 %v644_v36, %v619_v1  ;;  %v609_v38 = vld [vmem:[#allocation3 + $0x70] sm:$0xff] }
 0x25f   :  { %v1909_v7 = vld [vmem:[#allocation3 + $0x20] sm:$0xff]  ;;  %2662 = vrcp.f32 %v1924_v39  ;;  %v2657_v8 = vpop.eup %2656 }
 0x260   :  { %1650 = vperm.xlu1 %2511, %v3914_v51   ;;  %v1925_v46 = vadd.f32 1e-16, %v1909_v7  ;;  %684 = vst.msk [vmem:[#allocation3 + $0x40] sm:$0xff] %vm4587_vm1, %v667_v54  ;;  %v1912_v1 = vld [vmem:[#allocation3 + $0x38] sm:$0xff]  ;;  %v4596_v54 = vld [vmem:[#allocation50_spill] sm:$0xff]  ;;  %vm4608_vm1 = vmmov %vm4570_vm0 }
 0x261   :  { %1645 = vperm.xlu0 %2510, %v3918_v14   ;;  %v648_v43 = vpop.xlane.xlu1 %647  ;;  %v1928_v36 = vadd.f32 1e-16, %v1912_v1  ;;  %v625_v7 = vmul.f32 %v4596_v54, %v609_v38 }
 0x262   :  { %2664 = vrcp.f32 %v1925_v46  ;;  %v669_v29 = vadd.f32 %v648_v43, %v621_v58 }
 0x263   :  { %v1911_v10 = vld [vmem:[#allocation3 + $0x30] sm:$0xff]  ;;  %2666 = vrcp.f32 %v1926_v42  ;;  %v2659_v30 = vpop.eup %2658 }
 0x264   :  { %v1927_v12 = vadd.f32 1e-16, %v1911_v10  ;;  %686 = vst.msk [vmem:[#allocation3 + $0x50] sm:$0xff] %vm4591_vm4, %v669_v29  ;;  %vm4610_vm4 = vmmov %vm4570_vm0 }
 0x265   :  { %v652_v52 = vpop.xlane.xlu1 %651  ;;  %1971 = vperm.xlu0 %2510, %v2657_v8  }
 0x266   :  { %2668 = vrcp.f32 %v1927_v12  ;;  %v671_v0 = vadd.f32 %v652_v52, %v623_v60 }
 0x267   :  { %v646_v16 = vpop.xlane.xlu0 %645  ;;  %v1913_v44 = vld [vmem:[#allocation3 + $0x40] sm:$0xff]  ;;  %2670 = vrcp.f32 %v1928_v36 }
 0x268   :  { %v668_v9 = vadd.f32 %v646_v16, %v620_v61  ;;  %v1929_v50 = vadd.f32 1e-16, %v1913_v44  ;;  %688 = vst.msk [vmem:[#allocation3 + $0x60] sm:$0xff] %vm4595_vm5, %v671_v0  ;;  %vm4612_vm5 = vmmov %vm4570_vm0 }
 0x269   :  { %1981 = vperm.xlu0 %2510, %v2659_v30  }
 0x26a   :  { %685 = vst.msk [vmem:[#allocation3 + $0x48] sm:$0xff] %vm4589_vm7, %v668_v9  ;;  %2672 = vrcp.f32 %v1929_v50  ;;  %vm4609_vm7 = vmmov %vm4570_vm0 }
 0x26b   :  { %v650_v3 = vpop.xlane.xlu0 %649  ;;  %v2661_v62 = vpop.eup %2660  ;;  %v1915_v43 = vld [vmem:[#allocation3 + $0x50] sm:$0xff] }
 0x26c   :  { %v670_v53 = vadd.f32 %v650_v3, %v622_v32  ;;  %v1931_v29 = vadd.f32 1e-16, %v1915_v43  ;;  %1976 = vperm.xlu1 %2511, %v2661_v62   ;;  %v2663_v48 = vpop.eup %2662  ;;  %v1462_v62 = vld [vmem:[#allocation3 + $0x90] sm:$0xff] }
 0x26d   :  { %v1478_v26 = vmul.f32 %v3850_v4, %v1462_v62 }
 0x26e   :  { %687 = vst.msk [vmem:[#allocation3 + $0x58] sm:$0xff] %vm4593_vm8, %v670_v53  ;;  %vm4611_vm8 = vmmov %vm4570_vm0 }
 0x26f   :  { %v654_v39 = vpop.xlane.xlu0 %653  ;;  %v2665_v12 = vpop.eup %2664  ;;  %v1917_v27 = vld [vmem:[#allocation3 + $0x60] sm:$0xff] }
 0x270   :  { %v672_v46 = vadd.f32 %v654_v39, %v624_v11  ;;  %v1933_v3 = vadd.f32 1e-16, %v1917_v27  ;;  %1991 = vperm.xlu0 %2510, %v2665_v12   ;;  %1986 = vperm.xlu1 %2511, %v2663_v48   ;;  %v2667_v25 = vpop.eup %2666 }
 0x271   :  { %v1914_v58 = vld [vmem:[#allocation3 + $0x48] sm:$0xff] }
 0x272   :  { %v1930_v9 = vadd.f32 1e-16, %v1914_v58  ;;  %689 = vst.msk [vmem:[#allocation3 + $0x68] sm:$0xff] %vm4597_vm15, %v672_v46  ;;  %v1460_v46 = vld [vmem:[#allocation3 + $0x80] sm:$0xff]  ;;  %vm4613_vm15 = vmmov %vm4570_vm0 }
 0x273   :  { %v2669_v53 = vpop.eup %2668  ;;  %v1476_v30 = vmul.f32 %v3841_v21, %v1460_v46 }
 0x274   :  { %2674 = vrcp.f32 %v1930_v9  ;;  %2001 = vperm.xlu0 %2510, %v2669_v53   ;;  %1996 = vperm.xlu1 %2511, %v2667_v25   ;;  %v2671_v0 = vpop.eup %2670 }
 0x275   :  { %2676 = vrcp.f32 %v1931_v29  ;;  %v1916_v32 = vld [vmem:[#allocation3 + $0x58] sm:$0xff] }
 0x276   :  { %v656_v61 = vpop.xlane.xlu1 %655  ;;  %v1932_v60 = vadd.f32 1e-16, %v1916_v32 }
 0x277   :  { %v673_v16 = vadd.f32 %v656_v61, %v625_v7  ;;  %v2673_v36 = vpop.eup %2672 }
 0x278   :  { %v658_v10 = vpop.xlane.xlu0 %657  ;;  %2678 = vrcp.f32 %v1932_v60  ;;  %2011 = vperm.xlu0 %2510, %v2673_v36   ;;  %2006 = vperm.xlu1 %2511, %v2671_v0   ;;  %v1468_v0 = vld [vmem:[#allocation3 + $0xc0] sm:$0xff] }
 0x279   :  { %690 = vst.msk [vmem:[#allocation3 + $0x70] sm:$0xff] %vm4599_vm2, %v673_v16  ;;  %v674_v42 = vadd.f32 %v658_v10, %v626_v37  ;;  %2680 = vrcp.f32 %v1933_v3  ;;  %v1918_v52 = vld [vmem:[#allocation3 + $0x68] sm:$0xff]  ;;  %v1464_v10 = vld [vmem:[#allocation3 + $0xa0] sm:$0xff]  ;;  %v1466_v3 = vld [vmem:[#allocation3 + $0xb0] sm:$0xff] }
 0x27a   :  { %v1934_v8 = vadd.f32 1e-16, %v1918_v52  ;;  %v1461_v16 = vld [vmem:[#allocation3 + $0x88] sm:$0xff]  ;;  %v1480_v21 = vmul.f32 %v3876_v23, %v1464_v10  ;;  %vm4614_vm2 = vmmov %vm4570_vm0 }
 0x27b   :  { %691 = vst.msk [vmem:[#allocation3 + $0x78] sm:$0xff] %vm4600_vm13, %v674_v42  ;;  %v1477_v9 = vmul.f32 %v3864_v34, %v1461_v16  ;;  %v1463_v42 = vld [vmem:[#allocation3 + $0x98] sm:$0xff]  ;;  %v1465_v34 = vld [vmem:[#allocation3 + $0xa8] sm:$0xff]  ;;  %vm4615_vm13 = vmmov %vm4570_vm0 }
 0x27c   :  { %2682 = vrcp.f32 %v1934_v8  ;;  %v1479_v12 = vmul.f32 %v3859_v18, %v1463_v42  ;;  %v1481_v8 = vmul.f32 %v3871_v13, %v1465_v34  ;;  %v1467_v18 = vld [vmem:[#allocation3 + $0xb8] sm:$0xff]  ;;  %v1473_v34 = vld [vmem:[#allocation3 + $0xe8] sm:$0xff] }
 0x280   :  { %v1919_v38 = vld [vmem:[#allocation3 + $0x70] sm:$0xff] }
 0x281   :  { %v1935_v1 = vadd.f32 1e-16, %v1919_v38  ;;  %v2675_v11 = vpop.eup %2674  ;;  %v1482_v38 = vmul.f32 %v3888_v20, %v1466_v3  ;;  %v1483_v20 = vmul.f32 %v3883_v31, %v1467_v18  ;;  %v1474_v3 = vld [vmem:[#allocation3 + $0xf0] sm:$0xff]  ;;  %v1475_v18 = vld [vmem:[#allocation3 + $0xf8] sm:$0xff] }
 0x282   :  { %v1920_v44 = vld [vmem:[#allocation3 + $0x78] sm:$0xff]  ;;  %v2677_v50 = vpop.eup %2676  ;;  %2016 = vperm.xlu1 %2511, %v2675_v11  }
 0x283   :  { %2684 = vrcp.f32 %v1935_v1  ;;  %v1936_v6 = vadd.f32 1e-16, %v1920_v44  ;;  %2021 = vperm.xlu0 %2510, %v2677_v50  }
 0x285   :  { %2686 = vrcp.f32 %v1936_v6  ;;  %v2679_v54 = vpop.eup %2678 }
 0x286   :  { %v2681_v7 = vpop.eup %2680  ;;  %2026 = vperm.xlu1 %2511, %v2679_v54  }
 0x287   :  { %2031 = vperm.xlu0 %2510, %v2681_v7   ;;  %v1484_v7 = vmul.f32 %v3894_v41, %v1468_v0 }
 0x289   :  { %v2683_v39 = vpop.eup %2682 }
 0x28a   :  { %2036 = vperm.xlu1 %2511, %v2683_v39  }
 0x290   :  { %v2685_v17 = vpop.eup %2684 }
 0x291   :  { %2041 = vperm.xlu0 %2510, %v2685_v17   ;;  %v1470_v17 = vld [vmem:[#allocation3 + $0xd0] sm:$0xff] }
 0x292   :  { %v2687_v61 = vpop.eup %2686  ;;  %v1486_v41 = vmul.f32 %v3901_v59, %v1470_v17 }
 0x293   :  { %2046 = vperm.xlu1 %2511, %v2687_v61   ;;  %v1469_v61 = vld [vmem:[#allocation3 + $0xc8] sm:$0xff] }
 0x294   :  { %v1485_v31 = vmul.f32 %v3892_v40, %v1469_v61 }
 0x29c   :  { %v1493_v58 = vpop.xlane.xlu0 %1492 }
 0x29d   :  { %v1524_v43 = vadd.f32 %v1493_v58, %v1476_v30 }
 0x29f   :  { %1540 = vst.msk [vmem:[#allocation3 + $0x80] sm:$0xff] %vm4570_vm0, %v1524_v43 }
 0x2a0   :  { %v1495_v37 = vpop.xlane.xlu1 %1494  ;;  %v1497_v29 = vpop.xlane.xlu0 %1496 }
 0x2a1   :  { %v1525_v48 = vadd.f32 %v1495_v37, %v1477_v9  ;;  %v1526_v32 = vadd.f32 %v1497_v29, %v1478_v26  ;;  %v1472_v37 = vld [vmem:[#allocation3 + $0xe0] sm:$0xff]  ;;  %v1471_v29 = vld [vmem:[#allocation3 + $0xd8] sm:$0xff] }
 0x2a2   :  { %v1488_v59 = vmul.f32 %v3909_v33, %v1472_v37  ;;  %v1487_v40 = vmul.f32 %v3898_v56, %v1471_v29  ;;  %v1490_v56 = vmul.f32 %v3918_v14, %v1474_v3  ;;  %v1489_v33 = vmul.f32 %v3905_v5, %v1473_v34 }
 0x2a3   :  { %1541 = vst.msk [vmem:[#allocation3 + $0x88] sm:$0xff] %vm4601_vm12, %v1525_v48  ;;  %v1491_v5 = vmul.f32 %v3914_v51, %v1475_v18 }
 0x2a4   :  { %1542 = vst.msk [vmem:[#allocation3 + $0x90] sm:$0xff] %vm4602_vm9, %v1526_v32  ;;  %v1501_v27 = vpop.xlane.xlu1 %1500  ;;  %v1499_v60 = vpop.xlane.xlu0 %1498 }
 0x2a5   :  { %v1528_v25 = vadd.f32 %v1501_v27, %v1480_v21  ;;  %v1527_v4 = vadd.f32 %v1499_v60, %v1479_v12 }
 0x2a6   :  { %v2081_v52 = vld [vmem:[#allocation3 + $0x80] sm:$0xff] }
 0x2a7   :  { %v2097_v53 = vadd.f32 1e-16, %v2081_v52  ;;  %1544 = vst.msk [vmem:[#allocation3 + $0xa0] sm:$0xff] %vm4603_vm6, %v1528_v25 }
 0x2a8   :  { %1543 = vst.msk [vmem:[#allocation3 + $0x98] sm:$0xff] %vm4604_vm11, %v1527_v4  ;;  %v1505_v1 = vpop.xlane.xlu1 %1504  ;;  %v1503_v23 = vpop.xlane.xlu0 %1502 }
 0x2a9   :  { %2688 = vrcp.f32 %v2097_v53  ;;  %v1530_v44 = vadd.f32 %v1505_v1, %v1482_v38  ;;  %v1529_v36 = vadd.f32 %v1503_v23, %v1481_v8 }
 0x2aa   :  { %v2082_v6 = vld [vmem:[#allocation3 + $0x88] sm:$0xff] }
 0x2ab   :  { %v2083_v11 = vld [vmem:[#allocation3 + $0x90] sm:$0xff]  ;;  %v2098_v50 = vadd.f32 1e-16, %v2082_v6  ;;  %1546 = vst.msk [vmem:[#allocation3 + $0xb0] sm:$0xff] %vm4605_vm3, %v1530_v44 }
 0x2ac   :  { %v2099_v54 = vadd.f32 1e-16, %v2083_v11  ;;  %1545 = vst.msk [vmem:[#allocation3 + $0xa8] sm:$0xff] %vm4606_vm14, %v1529_v36  ;;  %v1509_v13 = vpop.xlane.xlu1 %1508  ;;  %v1507_v39 = vpop.xlane.xlu0 %1506 }
 0x2ad   :  { %2690 = vrcp.f32 %v2098_v50  ;;  %v1532_v46 = vadd.f32 %v1509_v13, %v1484_v7  ;;  %v1531_v30 = vadd.f32 %v1507_v39, %v1483_v20 }
 0x2ae   :  { %2692 = vrcp.f32 %v2099_v54  ;;  %v2085_v58 = vld [vmem:[#allocation3 + $0xa0] sm:$0xff] }
 0x2af   :  { %v2084_v16 = vld [vmem:[#allocation3 + $0x98] sm:$0xff]  ;;  %v2101_v62 = vadd.f32 1e-16, %v2085_v58  ;;  %1548 = vst.msk [vmem:[#allocation3 + $0xc0] sm:$0xff] %vm4607_vm10, %v1532_v46 }
 0x2b0   :  { %v2100_v43 = vadd.f32 1e-16, %v2084_v16  ;;  %1547 = vst.msk [vmem:[#allocation3 + $0xb8] sm:$0xff] %vm4608_vm1, %v1531_v30  ;;  %v1513_v9 = vpop.xlane.xlu1 %1512  ;;  %v1511_v26 = vpop.xlane.xlu0 %1510 }
 0x2b1   :  { %2694 = vrcp.f32 %v2101_v62  ;;  %v1534_v10 = vadd.f32 %v1513_v9, %v1486_v41  ;;  %v1533_v42 = vadd.f32 %v1511_v26, %v1485_v31 }
 0x2b2   :  { %2696 = vrcp.f32 %v2100_v43  ;;  %v2087_v48 = vld [vmem:[#allocation3 + $0xb0] sm:$0xff] }
 0x2b3   :  { %v2086_v32 = vld [vmem:[#allocation3 + $0xa8] sm:$0xff]  ;;  %v2103_v21 = vadd.f32 1e-16, %v2087_v48  ;;  %1550 = vst.msk [vmem:[#allocation3 + $0xd0] sm:$0xff] %vm4609_vm7, %v1534_v10 }
 0x2b4   :  { %v2102_v12 = vadd.f32 1e-16, %v2086_v32  ;;  %1549 = vst.msk [vmem:[#allocation3 + $0xc8] sm:$0xff] %vm4610_vm4, %v1533_v42  ;;  %v1517_v27 = vpop.xlane.xlu1 %1516  ;;  %v1515_v60 = vpop.xlane.xlu0 %1514 }
 0x2b5   :  { %2698 = vrcp.f32 %v2103_v21  ;;  %v1536_v25 = vadd.f32 %v1517_v27, %v1488_v59  ;;  %v1535_v4 = vadd.f32 %v1515_v60, %v1487_v40 }
 0x2b6   :  { %v2689_v52 = vpop.eup %2688  ;;  %2700 = vrcp.f32 %v2102_v12  ;;  %v2089_v53 = vld [vmem:[#allocation3 + $0xc0] sm:$0xff] }
 0x2b7   :  { %v2088_v38 = vld [vmem:[#allocation3 + $0xb8] sm:$0xff]  ;;  %v2105_v8 = vadd.f32 1e-16, %v2089_v53  ;;  %1552 = vst.msk [vmem:[#allocation3 + $0xe0] sm:$0xff] %vm4611_vm8, %v1536_v25  ;;  %2147 = vperm.xlu0 %2510, %v2689_v52  }
 0x2b8   :  { %v2104_v1 = vadd.f32 1e-16, %v2088_v38  ;;  %1551 = vst.msk [vmem:[#allocation3 + $0xd8] sm:$0xff] %vm4612_vm5, %v1535_v4  ;;  %v1521_v23 = vpop.xlane.xlu1 %1520  ;;  %v1519_v0 = vpop.xlane.xlu0 %1518 }
 0x2b9   :  { %2702 = vrcp.f32 %v2105_v8  ;;  %v1538_v44 = vadd.f32 %v1521_v23, %v1490_v56  ;;  %v1537_v36 = vadd.f32 %v1519_v0, %v1489_v33 }
 0x2ba   :  { %v2691_v6 = vpop.eup %2690  ;;  %2704 = vrcp.f32 %v2104_v1  ;;  %v2091_v11 = vld [vmem:[#allocation3 + $0xd0] sm:$0xff]  ;;  %v4002_v1 = vpop.f32.mrf.mxu0 }
 0x2bb   :  { %v2090_v50 = vld [vmem:[#allocation3 + $0xc8] sm:$0xff]  ;;  %v2693_v54 = vpop.eup %2692  ;;  %v2107_v7 = vadd.f32 1e-16, %v2091_v11  ;;  %1554 = vst.msk [vmem:[#allocation3 + $0xf0] sm:$0xff] %vm4613_vm15, %v1538_v44  ;;  %2152 = vperm.xlu1 %2511, %v2691_v6  }
 0x2bc   :  { %v2106_v20 = vadd.f32 1e-16, %v2090_v50  ;;  %1553 = vst.msk [vmem:[#allocation3 + $0xe8] sm:$0xff] %vm4614_vm2, %v1537_v36  ;;  %2157 = vperm.xlu0 %2510, %v2693_v54   ;;  %v1523_v14 = vpop.xlane.xlu0 %1522  ;;  %v3980_v59 = vpop.permute.xlu1 %1575 }
 0x2bd   :  { %2706 = vrcp.f32 %v2107_v7  ;;  %v1539_v13 = vadd.f32 %v1523_v14, %v1491_v5  ;;  %v910_v33 = vpop.f32.mrf.mxu0 }
 0x2be   :  { %v2695_v39 = vpop.eup %2694  ;;  %2708 = vrcp.f32 %v2106_v20  ;;  %v2093_v17 = vld [vmem:[#allocation3 + $0xe0] sm:$0xff] }
 0x2bf   :  { %v2092_v61 = vld [vmem:[#allocation3 + $0xd8] sm:$0xff]  ;;  %v2697_v46 = vpop.eup %2696  ;;  %v2109_v30 = vadd.f32 1e-16, %v2093_v17  ;;  %1555 = vst.msk [vmem:[#allocation3 + $0xf8] sm:$0xff] %vm4615_vm13, %v1539_v13  ;;  %v2458_v0 = vpop.f32.mrf.mxu0 }
 0x2c0   :  { %v2108_v58 = vadd.f32 1e-16, %v2092_v61  ;;  %2167 = vperm.xlu0 %2510, %v2695_v39   ;;  %2162 = vperm.xlu1 %2511, %v2697_v46   ;;  %v3982_v27 = vpop.permute.xlu1 %1585 }
 0x2c1   :  { %2710 = vrcp.f32 %v2109_v30  ;;  %v913_v36 = vpop.f32.mrf.mxu0 }
 0x2c2   :  { %v2699_v16 = vpop.eup %2698  ;;  %2712 = vrcp.f32 %v2108_v58  ;;  %v2095_v62 = vld [vmem:[#allocation3 + $0xf0] sm:$0xff] }
 0x2c3   :  { %v2094_v51 = vld [vmem:[#allocation3 + $0xe8] sm:$0xff]  ;;  %v2701_v43 = vpop.eup %2700  ;;  %v2111_v41 = vadd.f32 1e-16, %v2095_v62  ;;  %v2461_v50 = vpop.f32.mrf.mxu0 }
 0x2c4   :  { %v2110_v31 = vadd.f32 1e-16, %v2094_v51  ;;  %2177 = vperm.xlu0 %2510, %v2699_v16   ;;  %2172 = vperm.xlu1 %2511, %v2701_v43   ;;  %v3984_v60 = vpop.permute.xlu0 %1580  ;;  %v3986_v3 = vpop.permute.xlu1 %1590 }
 0x2c5   :  { %2714 = vrcp.f32 %v2111_v41  ;;  %v926_v7 = vpop.f32.mrf.mxu0 }
 0x2c6   :  { %v2703_v9 = vpop.eup %2702  ;;  %2716 = vrcp.f32 %v2110_v31  ;;  %v2096_v26 = vld [vmem:[#allocation3 + $0xf8] sm:$0xff] }
 0x2c7   :  { %v2705_v37 = vpop.eup %2704  ;;  %v2112_v29 = vadd.f32 1e-16, %v2096_v26  ;;  %v2462_v5 = vpop.f32.mrf.mxu0 }
 0x2c8   :  { %2187 = vperm.xlu0 %2510, %v2703_v9   ;;  %2182 = vperm.xlu1 %2511, %v2705_v37   ;;  %v3988_v34 = vpop.permute.xlu0 %1595  ;;  %v3990_v25 = vpop.permute.xlu1 %1600 }
 0x2c9   :  { %2718 = vrcp.f32 %v2112_v29  ;;  %v929_v17 = vpop.f32.mrf.mxu0 }
 0x2ca   :  { %v2707_v10 = vpop.eup %2706 }
 0x2cb   :  { %v2709_v42 = vpop.eup %2708  ;;  %v2465_v30 = vpop.f32.mrf.mxu0 }
 0x2cc   :  { %2197 = vperm.xlu0 %2510, %v2707_v10   ;;  %2192 = vperm.xlu1 %2511, %v2709_v42   ;;  %v3992_v4 = vpop.permute.xlu0 %1605  ;;  %v3994_v52 = vpop.permute.xlu1 %1610 }
 0x2cd   :  { %v942_v62 = vpop.f32.mrf.mxu0 }
 0x2ce   :  { %v2711_v48 = vpop.eup %2710 }
 0x2cf   :  { %v2713_v32 = vpop.eup %2712  ;;  %v2466_v31 = vpop.f32.mrf.mxu0 }
 0x2d0   :  { %2207 = vperm.xlu0 %2510, %v2711_v48   ;;  %2202 = vperm.xlu1 %2511, %v2713_v32   ;;  %v3996_v53 = vpop.permute.xlu0 %1615  ;;  %v3998_v38 = vpop.permute.xlu1 %1620 }
 0x2d1   :  { %4616 = vst [vmem:[#allocation9_spill] sm:$0xff] %v3996_v53  ;;  %4617 = vst [vmem:[#allocation5_spill] sm:$0xff] %v3998_v38  ;;  %v945_v37 = vpop.f32.mrf.mxu0 }
 0x2d2   :  { %v2715_v21 = vpop.eup %2714 }
 0x2d3   :  { %v2717_v12 = vpop.eup %2716  ;;  %v2469_v42 = vpop.f32.mrf.mxu0 }
 0x2d4   :  { %2217 = vperm.xlu0 %2510, %v2715_v21   ;;  %2212 = vperm.xlu1 %2511, %v2717_v12   ;;  %v4000_v8 = vpop.permute.xlu0 %1625  ;;  %v4004_v56 = vpop.permute.xlu1 %1630 }
 0x2d5   :  { %4618 = vst [vmem:[#allocation11_spill] sm:$0xff] %v4000_v8  ;;  %4619 = vst [vmem:[#allocation6_spill] sm:$0xff] %v4004_v56  ;;  %v958_v12 = vpop.f32.mrf.mxu0  ;;  %v798_v56 = vmul.f32 0.0, %v3700_v55 }
 0x2d6   :  { %v2719_v40 = vpop.eup %2718 }
 0x2d8   :  { %2222 = vperm.xlu1 %2511, %v2719_v40   ;;  %v4006_v23 = vpop.permute.xlu0 %1635  ;;  %v4008_v18 = vpop.permute.xlu1 %1640 }
 0x2d9   :  { %4620 = vst [vmem:[#allocation13_spill] sm:$0xff] %v4006_v23  ;;  %4621 = vst [vmem:[#allocation7_spill] sm:$0xff] %v4008_v18  ;;  %v792_v18 = vmul.f32 0.0, %v3649_v15  ;;  %v790_v23 = vmul.f32 0.0, %v3662_v35  ;;  %v795_v15 = vmul.f32 0.0, %v3713_v24  ;;  %v800_v35 = vmul.f32 0.0, %v3715_v47 }
 0x2dc   :  { %v4010_v44 = vpop.permute.xlu0 %1645  ;;  %v4012_v6 = vpop.permute.xlu1 %1650 }
 0x2dd   :  { %4622 = vst [vmem:[#allocation15_spill] sm:$0xff] %v4010_v44  ;;  %4623 = vst [vmem:[#allocation8_spill] sm:$0xff] %v4012_v6  ;;  %v4020_v14 = vpop.f32.mrf.mxu1  ;;  %v789_v6 = vmul.f32 0.0, %v3631_v63  ;;  %v788_v44 = vmul.f32 0.0, %v3645_v57  ;;  %v1889_v57 = vld [vmem:[%s4291_s4] sm:$0xff] }
 0x2de   :  { %v2289_v47 = vmul.f32 1.5, %v1889_v57  ;;  %v1657_v57 = vmul.f32 0.0, %v3988_v34 }
 0x2df   :  { %v1775_v61 = vpop.f32.mrf.mxu1  ;;  %v973_v24 = vadd.f32 %v910_v33, %v788_v44  ;;  %v974_v38 = vadd.f32 %v913_v36, %v789_v6  ;;  %v1892_v6 = vld [vmem:[%s4291_s4 + $0x18] sm:$0xff] }
 0x2e0   :  { %v4014_v11 = vpop.permute.xlu0 %1971 }
 0x2e1   :  { %v4028_v58 = vpop.f32.mrf.mxu1  ;;  %v2049_v44 = vmul.f32 %v4014_v11, %v973_v24  ;;  %v1655_v11 = vmul.f32 0.0, %v3982_v27  ;;  %v1895_v27 = vld [vmem:[%s4291_s4 + $0x30] sm:$0xff] }
 0x2e3   :  { %v4032_v51 = vpop.f32.mrf.mxu1 }
 0x2e4   :  { %v4018_v20 = vpop.permute.xlu0 %1981 }
 0x2e5   :  { %v4038_v9 = vpop.f32.mrf.mxu1 }
 0x2e6   :  { %4628 = vst [vmem:[#allocation18_spill] sm:$0xff] %v4038_v9 }
 0x2e7   :  { %v4016_v54 = vpop.permute.xlu1 %1976  ;;  %v4042_v29 = vpop.f32.mrf.mxu1 }
 0x2e8   :  { %v1842_v24 = vadd.f32 %v4042_v29, %v1657_v57 }
 0x2e9   :  { %v4046_v48 = vpop.f32.mrf.mxu1 }
 0x2ea   :  { %4631 = vst [vmem:[#allocation25_spill] sm:$0xff] %v4046_v48  ;;  %v1653_v48 = vmul.f32 0.0, %v3980_v59 }
 0x2eb   :  { %v4022_v13 = vpop.permute.xlu1 %1986  ;;  %v4024_v39 = vpop.permute.xlu0 %1991 }
 0x2ec   :  { %v4052_v40 = vpop.f32.mrf.mxu1 }
 0x2ee   :  { %v4067_v63 = vpop.f32.mrf.mxu1 }
 0x2ef   :  { %v4026_v46 = vpop.permute.xlu1 %1996  ;;  %v4030_v16 = vpop.permute.xlu0 %2001  ;;  %4636 = vst [vmem:[#allocation36_spill] sm:$0xff] %v4067_v63  ;;  %v4640_v63 = vld [vmem:[#allocation53_spill] sm:$0xff] }
 0x2f0   :  { %4624 = vst [vmem:[#allocation16_spill] sm:$0xff] %v4026_v46  ;;  %4625 = vst [vmem:[#allocation10_spill] sm:$0xff] %v4030_v16  ;;  %v802_v8 = vmul.f32 0.0, %v4640_v63  ;;  %v975_v16 = vadd.f32 %v4002_v1, %v790_v23  ;;  %v4087_v9 = vpop.f32.mrf.mxu1  ;;  %v4093_v63 = vadd.f32 %v2465_v30, %v798_v56  ;;  %v1890_v23 = vld [vmem:[%s4291_s4 + $0x8] sm:$0xff]  ;;  %v1891_v56 = vld [vmem:[%s4291_s4 + $0x10] sm:$0xff] }
 0x2f3   :  { %v4034_v43 = vpop.permute.xlu1 %2006  ;;  %v4036_v41 = vpop.permute.xlu0 %2011 }
 0x2f4   :  { %4626 = vst [vmem:[#allocation12_spill] sm:$0xff] %v4034_v43  ;;  %4627 = vst [vmem:[#allocation14_spill] sm:$0xff] %v4036_v41  ;;  %v791_v41 = vmul.f32 0.0, %v3679_v49  ;;  %v4065_v43 = vpop.f32.mrf.mxu0  ;;  %v801_v49 = vmul.f32 0.0, %v3724_v2  ;;  %v977_v2 = vadd.f32 %v926_v7, %v792_v18  ;;  %v1654_v18 = vmul.f32 0.0, %v3984_v60 }
 0x2f5   :  { %4635 = vst [vmem:[#allocation33_spill] sm:$0xff] %v4065_v43  ;;  %v4119_v60 = vadd.f32 %v958_v12, %v800_v35 }
 0x2f6   :  { %v976_v53 = vadd.f32 %v2458_v0, %v791_v41  ;;  %v961_v46 = vpop.f32.mrf.mxu0  ;;  %v1894_v41 = vld [vmem:[%s4291_s4 + $0x28] sm:$0xff] }
 0x2fd   :  { %v4040_v26 = vpop.permute.xlu1 %2016 }
 0x2fe   :  { %4629 = vst [vmem:[#allocation21_spill] sm:$0xff] %v4040_v26  ;;  %v4044_v10 = vpop.permute.xlu0 %2021 }
 0x2ff   :  { %4630 = vst [vmem:[#allocation24_spill] sm:$0xff] %v4044_v10  ;;  %v794_v10 = vmul.f32 0.0, %v3666_v19  ;;  %v797_v19 = vmul.f32 0.0, %v3722_v22 }
 0x301   :  { %v4048_v32 = vpop.permute.xlu1 %2026  ;;  %v4085_v22 = vadd.f32 %v2461_v50, %v794_v10  ;;  %v1893_v50 = vld [vmem:[%s4291_s4 + $0x20] sm:$0xff]  ;;  %v4115_v7 = vadd.f32 %v945_v37, %v797_v19  ;;  %v4129_v37 = vpop.f32.mrf.mxu1  ;;  %v2291_v10 = vmul.f32 1.5, %v1891_v56  ;;  %v4145_v19 = vmul.f32 1.5, %v1894_v41 }
 0x302   :  { %4632 = vst [vmem:[#allocation28_spill] sm:$0xff] %v4048_v32  ;;  %v4050_v21 = vpop.permute.xlu0 %2031  ;;  %v796_v32 = vmul.f32 0.0, %v3683_v45 }
 0x303   :  { %4633 = vst [vmem:[#allocation29_spill] sm:$0xff] %v4050_v21  ;;  %v793_v21 = vmul.f32 0.0, %v3696_v28  ;;  %v4638_v28 = vld [vmem:[#allocation51_spill] sm:$0xff]  ;;  %v1810_v34 = vpop.f32.mrf.mxu1 }
 0x304   :  { %v799_v55 = vmul.f32 0.0, %v4638_v28  ;;  %v4089_v28 = vadd.f32 %v2462_v5, %v795_v15  ;;  %v4095_v59 = vadd.f32 %v942_v62, %v796_v32  ;;  %v4117_v5 = vadd.f32 %v2469_v42, %v802_v8 }
 0x305   :  { %v4059_v26 = vpop.permute.xlu1 %2036  ;;  %v2290_v62 = vmul.f32 1.5, %v1890_v23  ;;  %v4131_v42 = vmul.f32 1.5, %v1892_v6  ;;  %v2051_v15 = vmul.f32 %v4018_v20, %v975_v16  ;;  %v1898_v16 = vld [vmem:[%s4291_s4 + $0x48] sm:$0xff]  ;;  %v2052_v23 = vmul.f32 %v4022_v13, %v976_v53 }
 0x306   :  { %4634 = vst [vmem:[#allocation32_spill] sm:$0xff] %v4059_v26  ;;  %v4639_v26 = vld [vmem:[#allocation52_spill] sm:$0xff]  ;;  %v4102_v0 = vadd.f32 %v2466_v31, %v799_v55  ;;  %v1840_v31 = vadd.f32 %v4020_v14, %v1655_v11  ;;  %v1899_v11 = vld [vmem:[%s4291_s4 + $0x50] sm:$0xff]  ;;  %v4172_v13 = vmul.f32 1.5, %v1898_v16 }
 0x307   :  { %v4080_v43 = vmul.f32 0.0, %v4639_v26  ;;  %v4091_v26 = vadd.f32 %v929_v17, %v793_v21  ;;  %v4122_v17 = vadd.f32 %v961_v46, %v801_v49  ;;  %v1656_v46 = vmul.f32 0.0, %v3986_v3  ;;  %v1896_v14 = vld [vmem:[%s4291_s4 + $0x38] sm:$0xff]  ;;  %v1897_v3 = vld [vmem:[%s4291_s4 + $0x40] sm:$0xff] }
 0x308   :  { %v4155_v20 = vmul.f32 1.5, %v1896_v14  ;;  %v4161_v56 = vmul.f32 1.5, %v1897_v3  ;;  %v4644_v3 = vld [vmem:[#allocation9_spill] sm:$0xff] }
 0x309   :  { %v1841_v55 = vadd.f32 %v4028_v58, %v1656_v46  ;;  %v2053_v58 = vmul.f32 %v4024_v39, %v977_v2 }
 0x30c   :  { %v4076_v45 = vpop.permute.xlu0 %2041 }
 0x30d   :  { %4637 = vst [vmem:[#allocation39_spill] sm:$0xff] %v4076_v45  ;;  %v1838_v45 = vadd.f32 %v1775_v61, %v1653_v48  ;;  %v1839_v61 = vadd.f32 %v4032_v51, %v1654_v18  ;;  %v4133_v48 = vmul.f32 1.5, %v1893_v50  ;;  %v2050_v51 = vmul.f32 %v4016_v54, %v974_v38 }
 0x30e   :  { %v4097_v1 = vpop.permute.xlu1 %2046  ;;  %v1658_v38 = vmul.f32 0.0, %v3990_v25 }
 0x310   :  { %v1843_v39 = vadd.f32 %v4052_v40, %v1658_v38  ;;  %v4643_v40 = vld [vmem:[#allocation5_spill] sm:$0xff]  ;;  %v1661_v38 = vmul.f32 0.0, %v4644_v3 }
 0x311   :  { %v4654_v3 = vld [vmem:[#allocation13_spill] sm:$0xff] }
 0x332   :  { %v2148_v33 = vpop.permute.xlu0 %2147 }
 0x333   :  { %v2225_v36 = vmul.f32 %v2148_v33, %v1838_v45  ;;  %v4151_v45 = vmul.f32 1.5, %v1895_v27 }
 0x335   :  { %v2241_v30 = vadd.f32 %v2225_v36, %v2049_v44 }
 0x336   :  { %v2153_v8 = vpop.permute.xlu1 %2152 }
 0x337   :  { %v2257_v32 = vmul.f32 0.5, %v2241_v30  ;;  %v2226_v21 = vmul.f32 %v2153_v8, %v1839_v61  ;;  %v2158_v12 = vpop.permute.xlu0 %2157  ;;  %v1660_v61 = vmul.f32 0.0, %v3994_v52  ;;  %v1659_v30 = vmul.f32 0.0, %v3992_v4  ;;  %v4641_v8 = vld [vmem:[#allocation18_spill] sm:$0xff]  ;;  %v4642_v52 = vld [vmem:[#allocation16_spill] sm:$0xff] }
 0x338   :  { %v2227_v35 = vmul.f32 %v2158_v12, %v1840_v31  ;;  %v2054_v46 = vmul.f32 %v4642_v52, %v4091_v26  ;;  %v4652_v52 = vld [vmem:[#allocation21_spill] sm:$0xff] }
 0x339   :  { %v2273_v54 = vmul.f32 0.5, %v2257_v32  ;;  %v2242_v49 = vadd.f32 %v2226_v21, %v2050_v51  ;;  %v1844_v27 = vadd.f32 %v4641_v8, %v1659_v30  ;;  %v4180_v21 = vmul.f32 1.5, %v1899_v11  ;;  %v4649_v30 = vld [vmem:[#allocation6_spill] sm:$0xff] }
 0x33a   :  { %v2243_v33 = vadd.f32 %v2227_v35, %v2051_v15  ;;  %v1662_v35 = vmul.f32 0.0, %v4643_v40 }
 0x33b   :  { %v2305_v18 = vadd.f32 %v2289_v47, %v2273_v54  ;;  %v2258_v25 = vmul.f32 0.5, %v2242_v49  ;;  %v2163_v44 = vpop.permute.xlu1 %2162  ;;  %v2168_v36 = vpop.permute.xlu0 %2167  ;;  %v4645_v54 = vld [vmem:[#allocation10_spill] sm:$0xff] }
 0x33c   :  { %v2259_v6 = vmul.f32 0.5, %v2243_v33  ;;  %v2228_v29 = vmul.f32 %v2163_v44, %v1841_v55  ;;  %v2229_v50 = vmul.f32 %v2168_v36, %v1842_v24  ;;  %v4175_v47 = vpop.f32.mrf.mxu1  ;;  %v2055_v49 = vmul.f32 %v4645_v54, %v4085_v22  ;;  %v4648_v22 = vld [vmem:[#allocation12_spill] sm:$0xff] }
 0x33d   :  { %2321 = vst [vmem:[%s4292_s5] sm:$0xff] %v2305_v18  ;;  %v2274_v53 = vmul.f32 0.5, %v2258_v25  ;;  %v1846_v25 = vadd.f32 %v4087_v9, %v1661_v38  ;;  %v2056_v44 = vmul.f32 %v4648_v22, %v4089_v28  ;;  %v4651_v9 = vld [vmem:[#allocation36_spill] sm:$0xff]  ;;  %v1665_v38 = vmul.f32 0.0, %v4654_v3 }
 0x33e   :  { %v2275_v2 = vmul.f32 0.5, %v2259_v6  ;;  %v2244_v41 = vadd.f32 %v2228_v29, %v2052_v23  ;;  %v2245_v31 = vadd.f32 %v2229_v50, %v2053_v58  ;;  %v1823_v24 = vpop.f32.mrf.mxu1  ;;  %v4647_v23 = vld [vmem:[#allocation11_spill] sm:$0xff] }
 0x33f   :  { %v2306_v4 = vadd.f32 %v2290_v62, %v2274_v53  ;;  %v2173_v51 = vpop.permute.xlu1 %2172  ;;  %v2178_v32 = vpop.permute.xlu0 %2177  ;;  %v4646_v62 = vld [vmem:[#allocation25_spill] sm:$0xff]  ;;  %v1663_v18 = vmul.f32 0.0, %v4647_v23  ;;  %v1664_v53 = vmul.f32 0.0, %v4649_v30  ;;  %v4656_v23 = vld [vmem:[#allocation28_spill] sm:$0xff] }
 0x340   :  { %v2307_v12 = vadd.f32 %v2291_v10, %v2275_v2  ;;  %v2260_v14 = vmul.f32 0.5, %v2244_v41  ;;  %v2261_v57 = vmul.f32 0.5, %v2245_v31  ;;  %v2230_v15 = vmul.f32 %v2173_v51, %v1843_v39  ;;  %v4650_v39 = vld [vmem:[#allocation14_spill] sm:$0xff]  ;;  %v4203_v28 = vpop.f32.mrf.mxu1 }
 0x341   :  { %2322 = vst [vmem:[%s4292_s5 + $0x8] sm:$0xff] %v2306_v4  ;;  %v2231_v26 = vmul.f32 %v2178_v32, %v1844_v27  ;;  %v1845_v55 = vadd.f32 %v4646_v62, %v1660_v61  ;;  %v2057_v2 = vmul.f32 %v4650_v39, %v4095_v59  ;;  %v1848_v8 = vadd.f32 %v4651_v9, %v1663_v18  ;;  %v1900_v59 = vld [vmem:[%s4291_s4 + $0x58] sm:$0xff] }
 0x342   :  { %2323 = vst [vmem:[%s4292_s5 + $0x10] sm:$0xff] %v2307_v12  ;;  %v2276_v10 = vmul.f32 0.5, %v2260_v14  ;;  %v2277_v33 = vmul.f32 0.5, %v2261_v57  ;;  %v2246_v16 = vadd.f32 %v2230_v15, %v2054_v46  ;;  %v1847_v27 = vadd.f32 %v1810_v34, %v1662_v35  ;;  %v4653_v34 = vld [vmem:[#allocation24_spill] sm:$0xff]  ;;  %v1826_v62 = vpop.f32.mrf.mxu1 }
 0x343   :  { %v2247_v36 = vadd.f32 %v2231_v26, %v2055_v49  ;;  %v2183_v58 = vpop.permute.xlu1 %2182  ;;  %v2188_v6 = vpop.permute.xlu0 %2187  ;;  %v2058_v46 = vmul.f32 %v4652_v52, %v4115_v7  ;;  %v2059_v4 = vmul.f32 %v4653_v34, %v4093_v63  ;;  %v2300_v26 = vmul.f32 1.5, %v1900_v59  ;;  %v1902_v52 = vld [vmem:[%s4291_s4 + $0x68] sm:$0xff] }
 0x344   :  { %v2308_v29 = vadd.f32 %v4131_v42, %v2276_v10  ;;  %v2309_v50 = vadd.f32 %v4133_v48, %v2277_v33  ;;  %v2262_v11 = vmul.f32 0.5, %v2246_v16  ;;  %v2232_v61 = vmul.f32 %v2183_v58, %v1845_v55 }
 0x345   :  { %v2263_v41 = vmul.f32 0.5, %v2247_v36  ;;  %v2233_v31 = vmul.f32 %v2188_v6, %v1846_v25  ;;  %v1849_v7 = vadd.f32 %v4129_v37, %v1664_v53  ;;  %v1850_v16 = vadd.f32 %v1823_v24, %v1665_v38  ;;  %v4657_v6 = vld [vmem:[#allocation15_spill] sm:$0xff] }
 0x346   :  { %2324 = vst [vmem:[%s4292_s5 + $0x18] sm:$0xff] %v2308_v29  ;;  %2325 = vst [vmem:[%s4292_s5 + $0x20] sm:$0xff] %v2309_v50  ;;  %v2278_v42 = vmul.f32 0.5, %v2262_v11  ;;  %v2248_v48 = vadd.f32 %v2232_v61, %v2056_v44  ;;  %v2060_v18 = vmul.f32 %v4656_v23, %v4102_v0  ;;  %v1667_v29 = vmul.f32 0.0, %v4657_v6  ;;  %v4658_v50 = vld [vmem:[#allocation29_spill] sm:$0xff] }
 0x347   :  { %v2279_v51 = vmul.f32 0.5, %v2263_v41  ;;  %v2249_v32 = vadd.f32 %v2233_v31, %v2057_v2  ;;  %v2193_v12 = vpop.permute.xlu1 %2192  ;;  %v2198_v14 = vpop.permute.xlu0 %2197  ;;  %v2061_v24 = vmul.f32 %v4658_v50, %v4119_v60  ;;  %v4659_v2 = vld [vmem:[#allocation8_spill] sm:$0xff] }
 0x348   :  { %v2310_v57 = vadd.f32 %v4145_v19, %v2278_v42  ;;  %v2264_v15 = vmul.f32 0.5, %v2248_v48  ;;  %v2234_v40 = vmul.f32 %v2193_v12, %v1847_v27  ;;  %v2235_v35 = vmul.f32 %v2198_v14, %v1848_v8  ;;  %v4655_v19 = vld [vmem:[#allocation7_spill] sm:$0xff]  ;;  %v4660_v60 = vld [vmem:[#allocation32_spill] sm:$0xff] }
 0x349   :  { %v2311_v54 = vadd.f32 %v4151_v45, %v2279_v51  ;;  %v2265_v49 = vmul.f32 0.5, %v2249_v32  ;;  %v1666_v33 = vmul.f32 0.0, %v4655_v19  ;;  %v1668_v41 = vmul.f32 0.0, %v4659_v2  ;;  %v4662_v32 = vld [vmem:[#allocation33_spill] sm:$0xff] }
 0x34a   :  { %2326 = vst [vmem:[%s4292_s5 + $0x28] sm:$0xff] %v2310_v57  ;;  %v2280_v63 = vmul.f32 0.5, %v2264_v15  ;;  %v2250_v55 = vadd.f32 %v2234_v40, %v2058_v46  ;;  %v2251_v10 = vadd.f32 %v2235_v35, %v2059_v4  ;;  %v1852_v31 = vadd.f32 %v4175_v47, %v1667_v29  ;;  %v4661_v46 = vld [vmem:[#allocation39_spill] sm:$0xff] }
 0x34b   :  { %2327 = vst [vmem:[%s4292_s5 + $0x30] sm:$0xff] %v2311_v54  ;;  %v2281_v45 = vmul.f32 0.5, %v2265_v49  ;;  %v2203_v37 = vpop.permute.xlu1 %2202  ;;  %v2208_v25 = vpop.permute.xlu0 %2207  ;;  %v1851_v61 = vadd.f32 %v1826_v62, %v1666_v33  ;;  %v988_v12 = vadd.f32 %v4662_v32, %v4080_v43  ;;  %v1853_v14 = vadd.f32 %v4203_v28, %v1668_v41  ;;  %v1904_v62 = vld [vmem:[%s4291_s4 + $0x78] sm:$0xff] }
 0x34c   :  { %v2312_v22 = vadd.f32 %v4155_v20, %v2280_v63  ;;  %v2266_v44 = vmul.f32 0.5, %v2250_v55  ;;  %v2267_v36 = vmul.f32 0.5, %v2251_v10  ;;  %v2236_v58 = vmul.f32 %v2203_v37, %v1849_v7  ;;  %v1901_v20 = vld [vmem:[%s4291_s4 + $0x60] sm:$0xff] }
 0x34d   :  { %v2313_v11 = vadd.f32 %v4161_v56, %v2281_v45  ;;  %v2237_v0 = vmul.f32 %v2208_v25, %v1850_v16  ;;  %v2062_v56 = vmul.f32 %v4660_v60, %v4122_v17  ;;  %v2063_v17 = vmul.f32 %v4661_v46, %v4117_v5  ;;  %v1903_v5 = vld [vmem:[%s4291_s4 + $0x70] sm:$0xff] }
 0x34e   :  { %2328 = vst [vmem:[%s4292_s5 + $0x38] sm:$0xff] %v2312_v22  ;;  %v2282_v30 = vmul.f32 0.5, %v2266_v44  ;;  %v2283_v53 = vmul.f32 0.5, %v2267_v36  ;;  %v2252_v39 = vadd.f32 %v2236_v58, %v2060_v18  ;;  %v2301_v34 = vmul.f32 1.5, %v1901_v20 }
 0x34f   :  { %2329 = vst [vmem:[%s4292_s5 + $0x40] sm:$0xff] %v2313_v11  ;;  %v2253_v9 = vadd.f32 %v2237_v0, %v2061_v24  ;;  %v2213_v8 = vpop.permute.xlu1 %2212  ;;  %v2218_v27 = vpop.permute.xlu0 %2217  ;;  %v2302_v15 = vmul.f32 1.5, %v1902_v52  ;;  %v2064_v28 = vmul.f32 %v4097_v1, %v988_v12  ;;  %v2303_v49 = vmul.f32 1.5, %v1903_v5 }
 0x350   :  { %v2314_v42 = vadd.f32 %v4172_v13, %v2282_v30  ;;  %v2315_v48 = vadd.f32 %v4180_v21, %v2283_v53  ;;  %v2268_v59 = vmul.f32 0.5, %v2252_v39  ;;  %v2238_v47 = vmul.f32 %v2213_v8, %v1851_v61 }
 0x351   :  { %v2269_v4 = vmul.f32 0.5, %v2253_v9  ;;  %v2239_v51 = vmul.f32 %v2218_v27, %v1852_v31  ;;  %v2304_v10 = vmul.f32 1.5, %v1904_v62 }
 0x352   :  { %2330 = vst [vmem:[%s4292_s5 + $0x48] sm:$0xff] %v2314_v42  ;;  %2331 = vst [vmem:[%s4292_s5 + $0x50] sm:$0xff] %v2315_v48  ;;  %v2284_v13 = vmul.f32 0.5, %v2268_v59  ;;  %v2254_v21 = vadd.f32 %v2238_v47, %v2062_v56 }
 0x353   :  { %v2285_v57 = vmul.f32 0.5, %v2269_v4  ;;  %v2255_v40 = vadd.f32 %v2239_v51, %v2063_v17  ;;  %v2223_v43 = vpop.permute.xlu1 %2222 }
 0x354   :  { %v2316_v35 = vadd.f32 %v2300_v26, %v2284_v13  ;;  %v2270_v3 = vmul.f32 0.5, %v2254_v21  ;;  %v2240_v38 = vmul.f32 %v2223_v43, %v1853_v14 }
 0x355   :  { %v2317_v54 = vadd.f32 %v2301_v34, %v2285_v57  ;;  %v2271_v7 = vmul.f32 0.5, %v2255_v40 }
 0x356   :  { %2332 = vst [vmem:[%s4292_s5 + $0x58] sm:$0xff] %v2316_v35  ;;  %v2286_v63 = vmul.f32 0.5, %v2270_v3  ;;  %v2256_v55 = vadd.f32 %v2240_v38, %v2064_v28 }
 0x357   :  { %2333 = vst [vmem:[%s4292_s5 + $0x60] sm:$0xff] %v2317_v54  ;;  %v2287_v1 = vmul.f32 0.5, %v2271_v7 }
 0x358   :  { %v2318_v26 = vadd.f32 %v2302_v15, %v2286_v63  ;;  %v2272_v19 = vmul.f32 0.5, %v2256_v55 }
 0x359   :  { %v2319_v33 = vadd.f32 %v2303_v49, %v2287_v1 }
 0x35a   :  { %2334 = vst [vmem:[%s4292_s5 + $0x68] sm:$0xff] %v2318_v26  ;;  %v2288_v16 = vmul.f32 0.5, %v2272_v19 }
 0x35b   :  { %2335 = vst [vmem:[%s4292_s5 + $0x70] sm:$0xff] %v2319_v33 }
 0x35c   :  { %v2320_v23 = vadd.f32 %v2304_v10, %v2288_v16 }
 0x35e   :  { %2336 = vst [vmem:[%s4292_s5 + $0x78] sm:$0xff] %v2320_v23 }

// kernel: bunca_forward.33
= control target key start
LH: loop header
LB: loop body
LE: loop exit
PB: predicated region body
PF: predicated region fallthrough
CT: control target
= control target key end

     0   :  { %vm26_vm0 = vcmask 7168   ;;  %v170_v6 = vmov 0.0   ;;  %vm171_vm1 = vmmov 0   ;;  %v109_v24 = vlaneseq  ;;  %s207_s2 = inlined_call_operand.vmem [shape: f32[8,128], index: 2, kind: input, shape index: {}, may-alias: {0,1,2}]   ;;  %s208_s1 = inlined_call_operand.vmem [shape: f32[8,128], index: 1, kind: input, shape index: {}, may-alias: {0,1,2}]   ;;  %s209_s0 = inlined_call_operand.vmem [shape: f32[8,128], index: 0, kind: input, shape index: {}, may-alias: {0,1,2}]   ;;  %s210_s3 = inlined_call_operand.vmem [shape: f32[8,1], index: 3, kind: output, shape index: {}]  }
   0x1   :  { %v28_v0 = vld [vmem:[%s207_s2] sm:$0xff]  ;;  %27 = vst.msk [vmem:[#allocation3] sm:$0xff] %vm26_vm0, %v170_v6  ;;  %153 = vmatprep.subr.mxu0 %v170_v6  ;;  %155 = vmatprep.mubr.msk.f32.mxu0 %vm171_vm1, %v170_v6  ;;  %vm119_vm3 = vcmask 64512  }
   0x2   :  { %v129_v1 = vld [vmem:[%s208_s1] sm:$0xff]  ;;  %v29_v3 = vmul.f32 %v28_v0, %v28_v0  ;;  %v110_v25 = vand.u32 127, %v109_v24 }
   0x3   :  { %v18_v2 = vld [vmem:[%s209_s0] sm:$0xff]  ;;  %v130_v4 = vmul.f32 %v129_v1, %v129_v1 }
   0x4   :  { %30 = vadd.xlane.f32.xlu0 %v29_v3  ;;  %v19_v5 = vmul.f32 %v18_v2, %v18_v2  ;;  %vm114_vm2 = vcmp.lt.s32.totalorder %v110_v25, 4 }
   0x5   :  { %131 = vadd.xlane.f32.xlu1 %v130_v4  ;;  %v150_v26 = vsel %vm114_vm2, 1.0, %v170_v6 }
   0x8   :  { %20 = vadd.xlane.f32.xlu0 %v19_v5  ;;  %v117_v30 = vld [vmem:[#allocation3] sm:$0xff] }
  0x8d   :  { %v31_v7 = vpop.xlane.xlu0 %30 }
  0x8e   :  { %v132_v8 = vpop.xlane.xlu1 %131  ;;  %v32_v9 = vmax.f32 %v31_v7, 1e-24 }
  0x8f   :  { %v133_v10 = vmax.f32 %v132_v8, 1e-24 }
  0x90   :  { %160 = vrsqrt.f32 %v32_v9 }
  0x91   :  { %162 = vrsqrt.f32 %v133_v10  ;;  %v21_v11 = vpop.xlane.xlu0 %20 }
  0x92   :  { %v22_v12 = vmax.f32 %v21_v11, 1e-24 }
  0x94   :  { %164 = vrsqrt.f32 %v22_v12 }
  0x9d   :  { %v161_v13 = vpop.eup %160 }
  0x9e   :  { %v163_v14 = vpop.eup %162  ;;  %v34_v15 = vmul.f32 %v161_v13, %v28_v0 }
  0x9f   :  { %v135_v16 = vmul.f32 %v163_v14, %v129_v1 }
  0xa0   :  { %154 = vmatpush3.xpose.msra.mxu0 %v34_v15 }
  0xa1   :  { %v165_v17 = vpop.eup %164 }
  0xa2   :  { %v24_v18 = vmul.f32 %v165_v17, %v18_v2 }
  0xa4   :  { %156 = vmatmul.mubr.f32.vlgmr.msra.gmra.mxu0 %v24_v18  ;;  %v137_v19 = vmul.f32 %v135_v16, %v24_v18 }
  0xa6   :  { %138 = vadd.xlane.f32.xlu0 %v137_v19 }
 0x12f   :  { %v139_v34 = vpop.xlane.xlu0 %138 }
 0x130   :  { %v140_v36 = vmul.f32 4.0, %v139_v34 }
 0x164   :  { %v102_v20 = vpop.f32.mrf.mxu0 }
 0x165   :  { %v106_v21 = vmul.f32 4.0, %v102_v20 }
 0x166   :  { %v157_v22 = vpop.f32.mrf.mxu0 }
 0x167   :  { %v107_v23 = vmul.f32 1.442695, %v106_v21 }
 0x169   :  { %166 = vpow2.f32 %v107_v23 }
 0x176   :  { %v167_v27 = vpop.eup %166 }
 0x177   :  { %v118_v28 = vmul.f32 %v167_v27, %v150_v26 }
 0x179   :  { %v120_v29 = vsel %vm119_vm3, %v118_v28, 0.0 }
 0x17a   :  { %121 = vadd.xlane.f32.xlu1 %v120_v29 }
 0x203   :  { %v122_v31 = vpop.xlane.xlu1 %121 }
 0x204   :  { %v123_v32 = vadd.f32 %v122_v31, %v117_v30 }
 0x206   :  { %125 = vst.msk [vmem:[#allocation3] sm:$0xff] %vm26_vm0, %v123_v32 }
 0x20d   :  { %v141_v33 = vld [vmem:[#allocation3] sm:$0xff] }
 0x20e   :  { %168 = vlog2.f32 %v141_v33 }
 0x21b   :  { %v169_v35 = vpop.eup %168 }
 0x21c   :  { %v143_v37 = vmul.f32 0.6931472, %v169_v35 }
 0x21e   :  { %v144_v38 = vsub.f32 %v143_v37, %v140_v36 }
 0x220   :  { %145 = vst.msk [vmem:[%s210_s3] sm:$0xff] %vm26_vm0, %v144_v38 }

// kernel: bunca_forward.29
= control target key start
LH: loop header
LB: loop body
LE: loop exit
PB: predicated region body
PF: predicated region fallthrough
CT: control target
= control target key end

     0   :  { %vm28_vm0 = vcmask 1043456   ;;  %s215_s0 = inlined_call_operand.vmem [shape: f32[4,128], index: 0, kind: input, shape index: {}]   ;;  %s216_s1 = inlined_call_operand.vmem [shape: f32[4,128], index: 1, kind: input, shape index: {}]   ;;  %s217_s2 = inlined_call_operand.vmem [shape: f32[4,128], index: 2, kind: input, shape index: {}]   ;;  %s218_s3 = inlined_call_operand.vmem [shape: f32[4,128], index: 3, kind: input, shape index: {}]   ;;  %s219_s4 = inlined_call_operand.vmem [shape: f32[4,256], index: 4, kind: input, shape index: {}]   ;;  %s220_s5 = inlined_call_operand.vmem [shape: f32[4,256], index: 5, kind: input, shape index: {}]   ;;  %s221_s6 = inlined_call_operand.hbm [shape: f32[1,1], index: 6, kind: output, shape index: {}]  }
   0x1   :  { %v24_v0 = vld [vmem:[%s215_s0] sm:$0xf]  ;;  %v72_v9 = vld [vmem:[%s220_s5 + $0x4] sm:$0xf] }
   0x2   :  { %v38_v1 = vld [vmem:[%s219_s4] sm:$0xf]  ;;  %v67_v12 = vld [vmem:[%s219_s4 + $0x4] sm:$0xf] }
   0x3   :  { %v39_v2 = vmul.f32 %v38_v1, %v24_v0  ;;  %v26_v3 = vld [vmem:[%s217_s2] sm:$0xf] }
   0x4   :  { %v25_v4 = vld [vmem:[%s216_s1] sm:$0xf]  ;;  %v27_v6 = vmul.f32 %v26_v3, %v24_v0 }
   0x5   :  { %v43_v5 = vld [vmem:[%s220_s5] sm:$0xf]  ;;  %v40_v10 = vsel %vm28_vm0, %v39_v2, 0.0 }
   0x6   :  { %v44_v7 = vmul.f32 %v43_v5, %v25_v4  ;;  %v32_v8 = vld [vmem:[%s218_s3] sm:$0xf] }
   0x7   :  { %v33_v11 = vmul.f32 %v32_v8, %v25_v4 }
   0x8   :  { %11 = vsyncpa [#allocation3], 0  ;;  %41 = vadd.xlane.f32.xlu1 %v40_v10  ;;  %v29_v13 = vsel %vm28_vm0, %v27_v6, 0.0  ;;  %v45_v14 = vsel %vm28_vm0, %v44_v7, 0.0  ;;  %v73_v15 = vmul.f32 %v72_v9, %v25_v4  ;;  %v68_v17 = vmul.f32 %v67_v12, %v24_v0  ;;  %s144_s1 = smov [#allocation2]  }
   0x9   :  { %30 = vadd.xlane.f32.xlu0 %v29_v13  ;;  %v34_v16 = vsel %vm28_vm0, %v33_v11, 0.0  ;;  %s105_s3 = sshll.u32 %s144_s1, 4  ;;  %vm97_vm1 = vcmask 0   ;;  %s106_s3 = int_to_ptr.vmem [resolvable:$true] %s105_s3 }
   0xa   :  { %v74_v18 = vsel %vm28_vm0, %v73_v15, 0.0  ;;  %v69_v19 = vsel %vm28_vm0, %v68_v17, 0.0  ;;  %s122_s4 = scalar_lea.vmem %s106_s3, 16  ;;  %s126_s5 = scalar_lea.vmem %s106_s3, 32 }
   0xb   :  { %p123_p0 = scmp.ne.s32.totalorder %s106_s3, %s122_s4  ;;  %p127_p1 = scmp.lt.s32.totalorder %s106_s3, %s106_s3 }
   0xc   :  { %46 = vadd.xlane.f32.xlu1 %v45_v14  ;;  %p128_p2 = scmp.lt.s32.totalorder %s126_s5, %s122_s4 }
   0xd   :  { %35 = vadd.xlane.f32.xlu0 %v34_v16 }
   0xe   :  { %p129_p3 = por %p128_p2, %p127_p1 }
  0x10   :  { %75 = vadd.xlane.f32.xlu1 %v74_v18  ;;  %p130_p4 = pnand %p129_p3, %p123_p0 }
  0x11   :  { %70 = vadd.xlane.f32.xlu0 %v69_v19 }
  0x91   :  { %v42_v20 = vpop.xlane.xlu1 %41 }
  0x92   :  { %v31_v21 = vpop.xlane.xlu0 %30 }
  0x95   :  { %v47_v22 = vpop.xlane.xlu1 %46 }
  0x96   :  { %v48_v23 = vadd.f32 %v47_v22, %v42_v20  ;;  %v36_v24 = vpop.xlane.xlu0 %35 }
  0x97   :  { %v37_v25 = vadd.f32 %v36_v24, %v31_v21 }
  0x99   :  { %v49_v26 = vsub.f32 %v48_v23, %v37_v25  ;;  %v76_v27 = vpop.xlane.xlu1 %75 }
  0x9a   :  { %v71_v28 = vpop.xlane.xlu0 %70 }
  0x9b   :  { %v51_v29 = vand.u32 2147483647, %v49_v26  ;;  %v77_v30 = vadd.f32 %v76_v27, %v71_v28  ;;  %v50_v42 = vmax.f32 %v49_v26, 0.0 }
  0x9d   :  { %v52_v31 = vsub.f32 0.0, %v51_v29  ;;  %v78_v32 = vsub.f32 %v77_v30, %v37_v25 }
  0x9f   :  { %v53_v33 = vmul.f32 1.442695, %v52_v31  ;;  %v80_v34 = vand.u32 2147483647, %v78_v32  ;;  %v79_v47 = vmax.f32 %v78_v32, 0.0 }
  0xa1   :  { %114 = vpow2.f32 %v53_v33  ;;  %v81_v35 = vsub.f32 0.0, %v80_v34 }
  0xa3   :  { %v82_v36 = vmul.f32 1.442695, %v81_v35 }
  0xa5   :  { %116 = vpow2.f32 %v82_v36 }
  0xae   :  { %v115_v37 = vpop.eup %114 }
  0xaf   :  { %v55_v38 = vadd.f32 1.0, %v115_v37 }
  0xb1   :  { %118 = vlog2.f32 %v55_v38 }
  0xb2   :  { %v117_v39 = vpop.eup %116 }
  0xb3   :  { %v84_v40 = vadd.f32 1.0, %v117_v39 }
  0xb5   :  { %120 = vlog2.f32 %v84_v40 }
  0xbe   :  { %v119_v41 = vpop.eup %118 }
  0xbf   :  { %v57_v43 = vmul.f32 0.6931472, %v119_v41 }
  0xc1   :  { %v58_v44 = vadd.f32 %v57_v43, %v50_v42 }
  0xc2   :  { %v121_v45 = vpop.eup %120 }
  0xc3   :  { %v59_v46 = vsel %vm28_vm0, %v58_v44, 0.0  ;;  %v86_v48 = vmul.f32 0.6931472, %v121_v45 }
  0xc4   :  { %v60_v49 = vrot.slane %v59_v46, 4 }
  0xc5   :  { %v87_v50 = vadd.f32 %v86_v48, %v79_v47 }
  0xc6   :  { %v61_v51 = vadd.f32 %v60_v49, %v59_v46 }
  0xc7   :  { %v88_v52 = vsel %vm28_vm0, %v87_v50, 0.0 }
  0xc8   :  { %v89_v53 = vrot.slane %v88_v52, 4  ;;  %v62_v54 = vrot.slane %v61_v51, 2 }
  0xca   :  { %v90_v55 = vadd.f32 %v89_v53, %v88_v52  ;;  %v63_v56 = vadd.f32 %v62_v54, %v61_v51 }
  0xcc   :  { %v91_v57 = vrot.slane %v90_v55, 2  ;;  %v64_v58 = vrot.slane %v63_v56, 1 }
  0xce   :  { %v92_v59 = vadd.f32 %v91_v57, %v90_v55  ;;  %v65_v61 = vadd.f32 %v64_v58, %v63_v56 }
  0xd0   :  { %v93_v60 = vrot.slane %v92_v59, 1 }
  0xd2   :  { %v94_v62 = vadd.f32 %v93_v60, %v92_v59 }
  0xd4   :  { %v95_v63 = vadd.f32 %v94_v62, %v65_v61 }
  0xd6   :  { %v96_v0 = vmul.f32 0.125, %v95_v63 }
  0xd8   :  { %98 = vst.msk [vmem:[#allocation2] sm:$0x1] %vm97_vm1, %v96_v0 }
  0xd9   :  { %133 = shalt.err (!%p130_p4)
}
  0xda   :  { %108 = dma.vmem_to_hbm [thread:$0]  %s106_s3, 16, %s221_s6, [#allocation3]  }
  0xdb   :  { %142 = dma.done.wait [#allocation3], 16  }
  0xdc   :  { %143 = vsyncadd [#allocation3], 4294967280 }
  0xdd   :  { %112 = vsyncpa [#allocation3], 1 }

</bundles_post_ra>
